<compile_context>
chip_gen: v7x
topology: tpu7x:2x2x1
jax: 0.10.0
libtpu: 0.0.40
codegen_flags: <defaults>
</compile_context>

<pallas_src>
import functools
import math

import jax
import jax.numpy as jnp
from jax.experimental import pallas as pl
from jax.experimental.pallas import tpu as pltpu


def _round_up(x, m):
    return ((x + m - 1) // m) * m


# ---------------------------------------------------------------------------
# Fused Pallas kernel:
#   CTANEmbedding (TimeEncoder + TransformerConv + AntiSymmetricConv iters)
#   + TGBLinkPredictor readout.
# ---------------------------------------------------------------------------
def _ctan_fused_kernel(num_iters, epsilon, inv_sqrt_d,
                       x_ref, relt_ref, msg_ref,
                       src_ref, dst_ref, dst_row_ref, rs_ref, rd_ref,
                       w_time_ref, b_time_ref, w_et_ref, w_em_ref,
                       w_q_ref, b_q_ref, w_k_ref, b_k_ref, w_v_ref, b_v_ref,
                       w_skip_ref, b_skip_ref, w_anti_ref, b_anti_ref,
                       w_rs_ref, b_rs_ref, w_rd_ref, b_rd_ref,
                       w_rf_ref, b_rf_ref,
                       z_ref, logit_ref):
    f32, bf16 = jnp.float32, jnp.bfloat16
    N_pad, D_pad = x_ref.shape
    E_pad = relt_ref.shape[0]
    B_pad = rs_ref.shape[0]
    neg_big = jnp.float32(-1e30)

    # --- one-hot gather/scatter operators built in VMEM from int32 indices ---
    # Padded edges / readout rows carry index == N_pad, which never matches the
    # iota (0..N_pad-1), giving all-zero rows/columns that contribute nothing.
    lane_node = jax.lax.broadcasted_iota(jnp.int32, (E_pad, N_pad), 1)
    dst_hit = lane_node == dst_ref[...]                       # (E_pad, N_pad) bool
    oh_src = (lane_node == src_ref[...]).astype(bf16)         # gathers x_j per edge
    oh_dst = dst_hit.astype(bf16)                             # gathers x_i per edge
    sub_node = jax.lax.broadcasted_iota(jnp.int32, (N_pad, E_pad), 0)
    oh_dst_t = (sub_node == dst_row_ref[...]).astype(bf16)    # scatter-add operator

    # --- TimeEncoder + TransformerConv.lin_edge (loop invariant) ---
    # cos(Linear(rel_t)); padded time lanes give cos(0)=1 but hit zero weight rows.
    t_enc = jnp.cos(relt_ref[...] * w_time_ref[...] + b_time_ref[...])   # (E_pad, T_pad) f32
    e_lin = (jnp.dot(t_enc.astype(bf16), w_et_ref[...], preferred_element_type=f32)
             + jnp.dot(msg_ref[...], w_em_ref[...], preferred_element_type=f32))  # (E_pad, D_pad)

    # --- hoist weight loads and bias broadcasts out of the iteration loop ---
    w_q, w_k, w_v = w_q_ref[...], w_k_ref[...], w_v_ref[...]
    w_skip, w_anti = w_skip_ref[...], w_anti_ref[...]
    b_q = jnp.broadcast_to(b_q_ref[...], (E_pad, D_pad))
    b_ke = jnp.broadcast_to(b_k_ref[...], (E_pad, D_pad)) + e_lin        # lin_key bias + lin_edge
    b_ve = jnp.broadcast_to(b_v_ref[...], (E_pad, D_pad)) + e_lin        # lin_value bias + lin_edge
    b_skip = jnp.broadcast_to(b_skip_ref[...], (N_pad, D_pad))
    b_anti = jnp.broadcast_to(b_anti_ref[...], (N_pad, D_pad))

    def one_iter(_, x):
        # --- TransformerConv (heads=1, concat=True, root_weight=True) ---
        xb = x.astype(bf16)                                   # bf16 MXU operands, f32 accumulate
        x_src = jnp.dot(oh_src, xb, preferred_element_type=f32).astype(bf16)   # exact row gather
        x_dst = jnp.dot(oh_dst, xb, preferred_element_type=f32).astype(bf16)
        q_e = jnp.dot(x_dst, w_q, preferred_element_type=f32) + b_q
        k_e = jnp.dot(x_src, w_k, preferred_element_type=f32) + b_ke
        v_e = jnp.dot(x_src, w_v, preferred_element_type=f32) + b_ve
        s = jnp.sum(q_e * k_e, axis=-1, keepdims=True) * inv_sqrt_d             # (E_pad, 1)

        # segment softmax over edges sharing a destination, per-segment max shift
        seg_max = jnp.max(jnp.where(dst_hit, s, neg_big), axis=0, keepdims=True)      # (1, N_pad)
        m_e = jnp.max(jnp.where(dst_hit, seg_max, neg_big), axis=1, keepdims=True)    # (E_pad, 1)
        p = jnp.exp(jnp.minimum(s - m_e, 0.0))                 # clamp keeps padded edges finite
        seg_sum = jnp.sum(jnp.where(dst_hit, p, 0.0), axis=0, keepdims=True)          # (1, N_pad)
        inv_seg = pl.reciprocal(seg_sum + 1e-16, approx=True)  # EUP, per node not per edge
        inv_e = jnp.sum(jnp.where(dst_hit, inv_seg, 0.0), axis=1, keepdims=True)      # (E_pad, 1)
        alpha = p * inv_e

        weighted = (alpha * v_e).astype(bf16)
        agg = jnp.dot(oh_dst_t, weighted, preferred_element_type=f32)   # scatter-add -> (N_pad, D_pad)
        conv = agg + jnp.dot(xb, w_skip, preferred_element_type=f32) + b_skip

        # --- AntiSymmetricConv: x <- x + eps * tanh(x (W - W^T - g I)^T + conv + b) ---
        h = jnp.tanh(jnp.dot(xb, w_anti, preferred_element_type=f32) + conv + b_anti)
        return x + epsilon * h

    x = jax.lax.fori_loop(0, num_iters, one_iter, x_ref[...], unroll=True)
    z_ref[...] = x

    # --- fused TGBLinkPredictor: lin_final(relu(lin_src(zs) + lin_dst(zd))) ---
    zb = x.astype(bf16)
    lane_ro = jax.lax.broadcasted_iota(jnp.int32, (B_pad, N_pad), 1)
    zs = jnp.dot((lane_ro == rs_ref[...]).astype(bf16), zb, preferred_element_type=f32).astype(bf16)
    zd = jnp.dot((lane_ro == rd_ref[...]).astype(bf16), zb, preferred_element_type=f32).astype(bf16)
    hh = (jnp.dot(zs, w_rs_ref[...], preferred_element_type=f32) + b_rs_ref[...]
          + jnp.dot(zd, w_rd_ref[...], preferred_element_type=f32) + b_rd_ref[...])
    hh = jnp.maximum(hh, 0.0)
    # final D->1 projection as a lane reduction (no degenerate width-1 MXU matmul)
    logit_ref[...] = jnp.sum(hh * w_rf_ref[...], axis=-1, keepdims=True) + b_rf_ref[...]


# ---------------------------------------------------------------------------
# pallas_call wrapper
# ---------------------------------------------------------------------------
def _run_fused(kp, cfg, x0, rel_t, msg, src_idx, dst_idx, dst_row, rs_idx, rd_idx, d_model):
    inputs = (x0, rel_t, msg, src_idx, dst_idx, dst_row, rs_idx, rd_idx,
              kp['w_time'], kp['b_time'], kp['w_et'], kp['w_em'],
              kp['w_q'], kp['b_q'], kp['w_k'], kp['b_k'], kp['w_v'], kp['b_v'],
              kp['w_skip'], kp['b_skip'], kp['w_anti'], kp['b_anti'],
              kp['w_rs'], kp['b_rs'], kp['w_rd'], kp['b_rd'],
              kp['w_rf'], kp['b_rf'])
    kernel = functools.partial(_ctan_fused_kernel,
                               cfg['num_iters'], cfg['epsilon'],
                               1.0 / math.sqrt(d_model))
    N_pad, D_pad = x0.shape
    B_pad = rs_idx.shape[0]
    out_shape = (jax.ShapeDtypeStruct((N_pad, D_pad), jnp.float32),
                 jax.ShapeDtypeStruct((B_pad, 1), jnp.float32))
    out_specs = (pl.BlockSpec((N_pad, D_pad), lambda i: (0, 0)),
                 pl.BlockSpec((B_pad, 1), lambda i: (0, 0)))
    return pl.pallas_call(
        kernel,
        grid=(1,),
        in_specs=[pl.BlockSpec(a.shape, lambda i, n=a.ndim: (0,) * n) for a in inputs],
        out_specs=out_specs,
        out_shape=out_shape,
        compiler_params=pltpu.CompilerParams(
            dimension_semantics=("arbitrary",),
            vmem_limit_bytes=32 * 1024 * 1024),
    )(*inputs)


# ---------------------------------------------------------------------------
# parameter preparation: pad feature dims to 128 lanes, cast MXU operands bf16
# ---------------------------------------------------------------------------
def _prepare_kernel_params(p, D_pad, T_pad, M_pad):
    def pad(a, rows, cols, dtype):
        out = jnp.zeros((rows, cols), dtype)
        return out.at[:a.shape[0], :a.shape[1]].set(a.astype(dtype))

    bf16, f32 = jnp.bfloat16, jnp.float32
    kp = {}
    kp['w_time'] = pad(p['w_time'], 1, T_pad, f32)        # elementwise (cos) stays f32
    kp['b_time'] = pad(p['b_time'], 1, T_pad, f32)
    kp['w_et'] = pad(p['w_edge_t'], T_pad, D_pad, bf16)
    kp['w_em'] = pad(p['w_edge_m'], M_pad, D_pad, bf16)
    for name in ('q', 'k', 'v', 'skip', 'anti'):
        kp[f'w_{name}'] = pad(p[f'w_{name}'], D_pad, D_pad, bf16)
        kp[f'b_{name}'] = pad(p[f'b_{name}'], 1, D_pad, f32)
    kp['w_rs'] = pad(p['w_r_src'], D_pad, D_pad, bf16)
    kp['b_rs'] = pad(p['b_r_src'], 1, D_pad, f32)
    kp['w_rd'] = pad(p['w_r_dst'], D_pad, D_pad, bf16)
    kp['b_rd'] = pad(p['b_r_dst'], 1, D_pad, f32)
    kp['w_rf'] = pad(p['w_r_fin'].T, 1, D_pad, f32)        # row vector for lane reduction
    kp['b_rf'] = p['b_r_fin'].astype(f32)                  # (1, 1)
    return kp


# ---------------------------------------------------------------------------
# CTAN_tgb forward (glue + fused kernel)
# ---------------------------------------------------------------------------
def ctan_tgb_forward(params, cfg, memory, last_update, n_id, src, dst, n_neg,
                     t, msg, edge_index):
    N = n_id.shape[0]
    D = memory.shape[1]
    E = edge_index.shape[1]
    B = src.shape[0]
    num_nodes = memory.shape[0]

    N_pad = _round_up(max(N, 8), 128)      # lane dim of one-hots / MXU contraction dim
    D_pad = _round_up(D, 128)
    T_pad = _round_up(cfg['time_dim'], 128)
    M_pad = _round_up(cfg['edge_dim'], 128)
    E_pad = _round_up(max(E, 8), 8)
    B_pad = _round_up(max(B, 8), 8)

    # SimpleMemory(n_id): z, last_update  (gather = glue)
    z0 = memory[n_id].astype(jnp.float32)                 # (N, D)
    lu = last_update[n_id].astype(jnp.float32)            # (N,)
    # node_dim = 0 and batch has no `.x` -> no feature concat.

    # per-edge normalized relative time (edge_index holds LOCAL node indices)
    rel_t = (lu[edge_index[0]] - t - cfg['mean_delta_t']) / cfg['std_delta_t']

    # padded kernel inputs (padded edges/rows get index N_pad => zero one-hots)
    x0 = jnp.zeros((N_pad, D_pad), jnp.float32).at[:N, :D].set(z0)
    rel_t_p = jnp.zeros((E_pad, 1), jnp.float32).at[:E, 0].set(rel_t.astype(jnp.float32))
    msg_p = jnp.zeros((E_pad, M_pad), jnp.bfloat16).at[:E, :msg.shape[1]].set(
        msg.astype(jnp.bfloat16))
    src_i = edge_index[0].astype(jnp.int32)
    dst_i = edge_index[1].astype(jnp.int32)
    src_idx = jnp.full((E_pad, 1), N_pad, jnp.int32).at[:E, 0].set(src_i)
    dst_idx = jnp.full((E_pad, 1), N_pad, jnp.int32).at[:E, 0].set(dst_i)
    dst_row = jnp.full((1, E_pad), N_pad, jnp.int32).at[0, :E].set(dst_i)

    # id_mapper: global node id -> local row of z
    assoc = jnp.zeros((num_nodes,), jnp.int32).at[n_id].set(
        jnp.arange(N, dtype=jnp.int32))
    rs = assoc[src].astype(jnp.int32)
    rd = assoc[dst].astype(jnp.int32)
    rs_idx = jnp.full((B_pad, 1), N_pad, jnp.int32).at[:B, 0].set(rs)
    rd_idx = jnp.full((B_pad, 1), N_pad, jnp.int32).at[:B, 0].set(rd)

    kp = _prepare_kernel_params(params, D_pad, T_pad, M_pad)

    z_pad, logits_pad = _run_fused(kp, cfg, x0, rel_t_p, msg_p,
                                   src_idx, dst_idx, dst_row, rs_idx, rd_idx, D)

    # TODO(synk): CTAN_tgb reads self.layernorm but never defines it in the shown
    # __init__; treated as None (identity). final_act defaults to None as well.

    z = z_pad[:N, :D]                                      # un-pad node embeddings
    out = logits_pad[:B]                                   # (B, 1) logits
    pos_out, neg_out = out[:-n_neg], out[-n_neg:]
    emb_src = z[rs[:-n_neg]]
    emb_pos_dst = z[rd[:-n_neg]]
    return pos_out, neg_out, emb_src, emb_pos_dst


# ---------------------------------------------------------------------------
# deterministic parameter init (shapes from the module's __init__)
# ---------------------------------------------------------------------------
def init_params(key, memory_dim, time_dim, edge_dim, gamma):
    D = memory_dim
    ks = jax.random.split(key, 12)

    def lin(k, fan_in, fan_out):
        bound = 1.0 / math.sqrt(fan_in)
        kw, kb = jax.random.split(k)
        w = jax.random.uniform(kw, (fan_in, fan_out), jnp.float32, -bound, bound)
        b = jax.random.uniform(kb, (1, fan_out), jnp.float32, -bound, bound)
        return w, b

    p = {}
    # TimeEncoder: Linear(1, time_dim)
    p['w_time'], p['b_time'] = lin(ks[0], 1, time_dim)
    # TransformerConv(D, D, edge_dim=edge_dim + time_dim), heads=1
    p['w_q'], p['b_q'] = lin(ks[1], D, D)
    p['w_k'], p['b_k'] = lin(ks[2], D, D)
    p['w_v'], p['b_v'] = lin(ks[3], D, D)
    w_edge, _ = lin(ks[4], time_dim + edge_dim, D)      # lin_edge has no bias
    p['w_edge_t'] = w_edge[:time_dim]                   # (T, D)
    p['w_edge_m'] = w_edge[time_dim:]                   # (edge_dim, D)
    p['w_skip'], p['b_skip'] = lin(ks[5], D, D)
    # AntiSymmetricConv: W - W^T - gamma*I  (pre-transposed for x @ A^T)
    bound = 1.0 / math.sqrt(D)
    w_raw = jax.random.uniform(ks[6], (D, D), jnp.float32, -bound, bound)
    p['w_anti'] = (w_raw - w_raw.T - gamma * jnp.eye(D, dtype=jnp.float32)).T
    _, p['b_anti'] = lin(ks[7], D, D)
    # TGBLinkPredictor(memory_dim)
    p['w_r_src'], p['b_r_src'] = lin(ks[8], D, D)
    p['w_r_dst'], p['b_r_dst'] = lin(ks[9], D, D)
    p['w_r_fin'], p['b_r_fin'] = lin(ks[10], D, 1)
    return p


# ---------------------------------------------------------------------------
if __name__ == "__main__":
    key = jax.random.PRNGKey(0)

    num_nodes = 32     # total nodes in the temporal graph / memory table
    N = 16             # nodes touched by this batch (|n_id|)
    D = 32             # memory_dim
    time_dim = 8
    edge_dim = 4
    E = 24             # sampled temporal edges
    num_iters = 2
    B_pos, n_neg = 6, 4
    B = B_pos + n_neg

    cfg = dict(memory_dim=D, time_dim=time_dim, edge_dim=edge_dim,
               num_iters=num_iters, epsilon=0.1, gamma=0.1,
               mean_delta_t=0.0, std_delta_t=1.0)

    (k_par, k_mem, k_lu, k_nid, k_ei, k_msg, k_t, k_src, k_dst) = jax.random.split(key, 9)
    params = init_params(k_par, D, time_dim, edge_dim, cfg['gamma'])

    memory = jax.random.normal(k_mem, (num_nodes, D), jnp.float32)
    last_update = jax.random.uniform(k_lu, (num_nodes,), jnp.float32, 0.0, 100.0)
    n_id = jax.random.permutation(k_nid, num_nodes)[:N]                 # global ids in batch
    edge_index = jax.random.randint(k_ei, (2, E), 0, N)                 # local indices
    msg = jax.random.normal(k_msg, (E, edge_dim), jnp.float32)
    t_edges = jax.random.uniform(k_t, (E,), jnp.float32, 0.0, 100.0)
    # batch.src / batch.dst (global ids), positives followed by n_neg negatives
    src = n_id[jax.random.randint(k_src, (B,), 0, N)]
    dst = n_id[jax.random.randint(k_dst, (B,), 0, N)]

    pos_out, neg_out, emb_src, emb_pos_dst = ctan_tgb_forward(
        params, cfg, memory, last_update, n_id, src, dst, n_neg,
        t_edges, msg, edge_index)
    jax.block_until_ready((pos_out, neg_out, emb_src, emb_pos_dst))

    assert pos_out.shape == (B_pos, 1) and neg_out.shape == (n_neg, 1)
    assert emb_src.shape == (B_pos, D) and emb_pos_dst.shape == (B_pos, D)
    assert bool(jnp.all(jnp.isfinite(pos_out))) and bool(jnp.all(jnp.isfinite(neg_out)))
    assert bool(jnp.all(jnp.isfinite(emb_src))) and bool(jnp.all(jnp.isfinite(emb_pos_dst)))
    print("KERNEL_OK")
</pallas_src>

<mosaic_0001>
module attributes {stable_mosaic.version = 11 : i64} {
  func.func @_ctan_fused_kernel(%arg0: i32, %arg1: memref<128x128xf32, #tpu.memory_space<vmem>>, %arg2: memref<24x1xf32, #tpu.memory_space<vmem>>, %arg3: memref<24x128xbf16, #tpu.memory_space<vmem>>, %arg4: memref<24x1xi32, #tpu.memory_space<vmem>>, %arg5: memref<24x1xi32, #tpu.memory_space<vmem>>, %arg6: memref<1x24xi32, #tpu.memory_space<vmem>>, %arg7: memref<16x1xi32, #tpu.memory_space<vmem>>, %arg8: memref<16x1xi32, #tpu.memory_space<vmem>>, %arg9: memref<1x128xf32, #tpu.memory_space<vmem>>, %arg10: memref<1x128xf32, #tpu.memory_space<vmem>>, %arg11: memref<128x128xbf16, #tpu.memory_space<vmem>>, %arg12: memref<128x128xbf16, #tpu.memory_space<vmem>>, %arg13: memref<128x128xbf16, #tpu.memory_space<vmem>>, %arg14: memref<1x128xf32, #tpu.memory_space<vmem>>, %arg15: memref<128x128xbf16, #tpu.memory_space<vmem>>, %arg16: memref<1x128xf32, #tpu.memory_space<vmem>>, %arg17: memref<128x128xbf16, #tpu.memory_space<vmem>>, %arg18: memref<1x128xf32, #tpu.memory_space<vmem>>, %arg19: memref<128x128xbf16, #tpu.memory_space<vmem>>, %arg20: memref<1x128xf32, #tpu.memory_space<vmem>>, %arg21: memref<128x128xbf16, #tpu.memory_space<vmem>>, %arg22: memref<1x128xf32, #tpu.memory_space<vmem>>, %arg23: memref<128x128xbf16, #tpu.memory_space<vmem>>, %arg24: memref<1x128xf32, #tpu.memory_space<vmem>>, %arg25: memref<128x128xbf16, #tpu.memory_space<vmem>>, %arg26: memref<1x128xf32, #tpu.memory_space<vmem>>, %arg27: memref<1x128xf32, #tpu.memory_space<vmem>>, %arg28: memref<1x1xf32, #tpu.memory_space<vmem>>, %arg29: memref<128x128xf32, #tpu.memory_space<vmem>>, %arg30: memref<16x1xf32, #tpu.memory_space<vmem>>) attributes {dimension_semantics = [#tpu.dimension_semantics<arbitrary>], iteration_bounds = array<i64: 1>, scalar_prefetch = 0 : i64, scratch_operands = 0 : i64, tpu.core_type = #tpu.core_type<tc>, window_params = [{pipeline_mode = #tpu.pipeline_mode<synchronous>, transform_indices = @transform_0, window_bounds = array<i64: 128, 128>}, {pipeline_mode = #tpu.pipeline_mode<synchronous>, transform_indices = @transform_1, window_bounds = array<i64: 24, 1>}, {pipeline_mode = #tpu.pipeline_mode<synchronous>, transform_indices = @transform_2, window_bounds = array<i64: 24, 128>}, {pipeline_mode = #tpu.pipeline_mode<synchronous>, transform_indices = @transform_3, window_bounds = array<i64: 24, 1>}, {pipeline_mode = #tpu.pipeline_mode<synchronous>, transform_indices = @transform_4, window_bounds = array<i64: 24, 1>}, {pipeline_mode = #tpu.pipeline_mode<synchronous>, transform_indices = @transform_5, window_bounds = array<i64: 1, 24>}, {pipeline_mode = #tpu.pipeline_mode<synchronous>, transform_indices = @transform_6, window_bounds = array<i64: 16, 1>}, {pipeline_mode = #tpu.pipeline_mode<synchronous>, transform_indices = @transform_7, window_bounds = array<i64: 16, 1>}, {pipeline_mode = #tpu.pipeline_mode<synchronous>, transform_indices = @transform_8, window_bounds = array<i64: 1, 128>}, {pipeline_mode = #tpu.pipeline_mode<synchronous>, transform_indices = @transform_9, window_bounds = array<i64: 1, 128>}, {pipeline_mode = #tpu.pipeline_mode<synchronous>, transform_indices = @transform_10, window_bounds = array<i64: 128, 128>}, {pipeline_mode = #tpu.pipeline_mode<synchronous>, transform_indices = @transform_11, window_bounds = array<i64: 128, 128>}, {pipeline_mode = #tpu.pipeline_mode<synchronous>, transform_indices = @transform_12, window_bounds = array<i64: 128, 128>}, {pipeline_mode = #tpu.pipeline_mode<synchronous>, transform_indices = @transform_13, window_bounds = array<i64: 1, 128>}, {pipeline_mode = #tpu.pipeline_mode<synchronous>, transform_indices = @transform_14, window_bounds = array<i64: 128, 128>}, {pipeline_mode = #tpu.pipeline_mode<synchronous>, transform_indices = @transform_15, window_bounds = array<i64: 1, 128>}, {pipeline_mode = #tpu.pipeline_mode<synchronous>, transform_indices = @transform_16, window_bounds = array<i64: 128, 128>}, {pipeline_mode = #tpu.pipeline_mode<synchronous>, transform_indices = @transform_17, window_bounds = array<i64: 1, 128>}, {pipeline_mode = #tpu.pipeline_mode<synchronous>, transform_indices = @transform_18, window_bounds = array<i64: 128, 128>}, {pipeline_mode = #tpu.pipeline_mode<synchronous>, transform_indices = @transform_19, window_bounds = array<i64: 1, 128>}, {pipeline_mode = #tpu.pipeline_mode<synchronous>, transform_indices = @transform_20, window_bounds = array<i64: 128, 128>}, {pipeline_mode = #tpu.pipeline_mode<synchronous>, transform_indices = @transform_21, window_bounds = array<i64: 1, 128>}, {pipeline_mode = #tpu.pipeline_mode<synchronous>, transform_indices = @transform_22, window_bounds = array<i64: 128, 128>}, {pipeline_mode = #tpu.pipeline_mode<synchronous>, transform_indices = @transform_23, window_bounds = array<i64: 1, 128>}, {pipeline_mode = #tpu.pipeline_mode<synchronous>, transform_indices = @transform_24, window_bounds = array<i64: 128, 128>}, {pipeline_mode = #tpu.pipeline_mode<synchronous>, transform_indices = @transform_25, window_bounds = array<i64: 1, 128>}, {pipeline_mode = #tpu.pipeline_mode<synchronous>, transform_indices = @transform_26, window_bounds = array<i64: 1, 128>}, {pipeline_mode = #tpu.pipeline_mode<synchronous>, transform_indices = @transform_27, window_bounds = array<i64: 1, 1>}, {pipeline_mode = #tpu.pipeline_mode<synchronous>, transform_indices = @transform_28, window_bounds = array<i64: 128, 128>}, {pipeline_mode = #tpu.pipeline_mode<synchronous>, transform_indices = @transform_29, window_bounds = array<i64: 16, 1>}]} {
    %0 = tpu.iota {dimensions = array<i32: 1>} : vector<24x128xi32>
    %c0 = arith.constant 0 : index
    %c0_0 = arith.constant 0 : index
    %1 = vector.load %arg5[%c0, %c0_0] : memref<24x1xi32, #tpu.memory_space<vmem>>, vector<24x1xi32>
    %2 = vector.broadcast %1 : vector<24x1xi32> to vector<24x128xi32>
    %3 = arith.cmpi eq, %0, %2 : vector<24x128xi32>
    %c0_1 = arith.constant 0 : index
    %c0_2 = arith.constant 0 : index
    %4 = vector.load %arg4[%c0_1, %c0_2] : memref<24x1xi32, #tpu.memory_space<vmem>>, vector<24x1xi32>
    %5 = vector.broadcast %4 : vector<24x1xi32> to vector<24x128xi32>
    %6 = arith.cmpi eq, %0, %5 : vector<24x128xi32>
    %7 = arith.extui %6 : vector<24x128xi1> to vector<24x128xi32>
    %8 = arith.sitofp %7 : vector<24x128xi32> to vector<24x128xf32>
    %9 = arith.truncf %8 : vector<24x128xf32> to vector<24x128xbf16>
    %10 = arith.extui %3 : vector<24x128xi1> to vector<24x128xi32>
    %11 = arith.sitofp %10 : vector<24x128xi32> to vector<24x128xf32>
    %12 = arith.truncf %11 : vector<24x128xf32> to vector<24x128xbf16>
    %13 = tpu.iota {dimensions = array<i32: 0>} : vector<128x24xi32>
    %c0_3 = arith.constant 0 : index
    %c0_4 = arith.constant 0 : index
    %14 = vector.load %arg6[%c0_3, %c0_4] : memref<1x24xi32, #tpu.memory_space<vmem>>, vector<1x24xi32>
    %15 = vector.broadcast %14 : vector<1x24xi32> to vector<128x24xi32>
    %16 = arith.cmpi eq, %13, %15 : vector<128x24xi32>
    %17 = arith.extui %16 : vector<128x24xi1> to vector<128x24xi32>
    %18 = arith.sitofp %17 : vector<128x24xi32> to vector<128x24xf32>
    %19 = arith.truncf %18 : vector<128x24xf32> to vector<128x24xbf16>
    %c0_5 = arith.constant 0 : index
    %c0_6 = arith.constant 0 : index
    %20 = vector.load %arg2[%c0_5, %c0_6] : memref<24x1xf32, #tpu.memory_space<vmem>>, vector<24x1xf32>
    %c0_7 = arith.constant 0 : index
    %c0_8 = arith.constant 0 : index
    %21 = vector.load %arg9[%c0_7, %c0_8] : memref<1x128xf32, #tpu.memory_space<vmem>>, vector<1x128xf32>
    %22 = vector.broadcast %20 : vector<24x1xf32> to vector<24x128xf32>
    %23 = vector.broadcast %21 : vector<1x128xf32> to vector<24x128xf32>
    %24 = arith.mulf %22, %23 : vector<24x128xf32>
    %c0_9 = arith.constant 0 : index
    %c0_10 = arith.constant 0 : index
    %25 = vector.load %arg10[%c0_9, %c0_10] : memref<1x128xf32, #tpu.memory_space<vmem>>, vector<1x128xf32>
    %26 = vector.broadcast %25 : vector<1x128xf32> to vector<24x128xf32>
    %27 = arith.addf %24, %26 : vector<24x128xf32>
    %28 = math.cos %27 : vector<24x128xf32>
    %29 = arith.truncf %28 : vector<24x128xf32> to vector<24x128xbf16>
    %c0_11 = arith.constant 0 : index
    %c0_12 = arith.constant 0 : index
    %30 = vector.load %arg11[%c0_11, %c0_12] : memref<128x128xbf16, #tpu.memory_space<vmem>>, vector<128x128xbf16>
    %cst = arith.constant dense<0.000000e+00> : vector<24x128xf32>
    %31 = tpu.matmul %29, %30, %cst {dimension_numbers = #tpu.dot_dimension_numbers<[1], [0], [0], [1], [0, 0, 1, 1], [], []>} : vector<24x128xbf16>, vector<128x128xbf16>, vector<24x128xf32> -> vector<24x128xf32>
    %c0_13 = arith.constant 0 : index
    %c0_14 = arith.constant 0 : index
    %32 = vector.load %arg3[%c0_13, %c0_14] : memref<24x128xbf16, #tpu.memory_space<vmem>>, vector<24x128xbf16>
    %c0_15 = arith.constant 0 : index
    %c0_16 = arith.constant 0 : index
    %33 = vector.load %arg12[%c0_15, %c0_16] : memref<128x128xbf16, #tpu.memory_space<vmem>>, vector<128x128xbf16>
    %cst_17 = arith.constant dense<0.000000e+00> : vector<24x128xf32>
    %34 = tpu.matmul %32, %33, %cst_17 {dimension_numbers = #tpu.dot_dimension_numbers<[1], [0], [0], [1], [0, 0, 1, 1], [], []>} : vector<24x128xbf16>, vector<128x128xbf16>, vector<24x128xf32> -> vector<24x128xf32>
    %35 = arith.addf %31, %34 : vector<24x128xf32>
    %c0_18 = arith.constant 0 : index
    %c0_19 = arith.constant 0 : index
    %36 = vector.load %arg13[%c0_18, %c0_19] : memref<128x128xbf16, #tpu.memory_space<vmem>>, vector<128x128xbf16>
    %c0_20 = arith.constant 0 : index
    %c0_21 = arith.constant 0 : index
    %37 = vector.load %arg15[%c0_20, %c0_21] : memref<128x128xbf16, #tpu.memory_space<vmem>>, vector<128x128xbf16>
    %c0_22 = arith.constant 0 : index
    %c0_23 = arith.constant 0 : index
    %38 = vector.load %arg17[%c0_22, %c0_23] : memref<128x128xbf16, #tpu.memory_space<vmem>>, vector<128x128xbf16>
    %c0_24 = arith.constant 0 : index
    %c0_25 = arith.constant 0 : index
    %39 = vector.load %arg19[%c0_24, %c0_25] : memref<128x128xbf16, #tpu.memory_space<vmem>>, vector<128x128xbf16>
    %c0_26 = arith.constant 0 : index
    %c0_27 = arith.constant 0 : index
    %40 = vector.load %arg21[%c0_26, %c0_27] : memref<128x128xbf16, #tpu.memory_space<vmem>>, vector<128x128xbf16>
    %c0_28 = arith.constant 0 : index
    %c0_29 = arith.constant 0 : index
    %41 = vector.load %arg14[%c0_28, %c0_29] : memref<1x128xf32, #tpu.memory_space<vmem>>, vector<1x128xf32>
    %42 = vector.shape_cast %41 : vector<1x128xf32> to vector<1x128xf32>
    %43 = vector.broadcast %42 : vector<1x128xf32> to vector<24x128xf32>
    %c0_30 = arith.constant 0 : index
    %c0_31 = arith.constant 0 : index
    %44 = vector.load %arg16[%c0_30, %c0_31] : memref<1x128xf32, #tpu.memory_space<vmem>>, vector<1x128xf32>
    %45 = vector.shape_cast %44 : vector<1x128xf32> to vector<1x128xf32>
    %46 = vector.broadcast %45 : vector<1x128xf32> to vector<24x128xf32>
    %47 = arith.addf %46, %35 : vector<24x128xf32>
    %c0_32 = arith.constant 0 : index
    %c0_33 = arith.constant 0 : index
    %48 = vector.load %arg18[%c0_32, %c0_33] : memref<1x128xf32, #tpu.memory_space<vmem>>, vector<1x128xf32>
    %49 = vector.shape_cast %48 : vector<1x128xf32> to vector<1x128xf32>
    %50 = vector.broadcast %49 : vector<1x128xf32> to vector<24x128xf32>
    %51 = arith.addf %50, %35 : vector<24x128xf32>
    %c0_34 = arith.constant 0 : index
    %c0_35 = arith.constant 0 : index
    %52 = vector.load %arg20[%c0_34, %c0_35] : memref<1x128xf32, #tpu.memory_space<vmem>>, vector<1x128xf32>
    %53 = vector.shape_cast %52 : vector<1x128xf32> to vector<1x128xf32>
    %54 = vector.broadcast %53 : vector<1x128xf32> to vector<128x128xf32>
    %c0_36 = arith.constant 0 : index
    %c0_37 = arith.constant 0 : index
    %55 = vector.load %arg22[%c0_36, %c0_37] : memref<1x128xf32, #tpu.memory_space<vmem>>, vector<1x128xf32>
    %56 = vector.shape_cast %55 : vector<1x128xf32> to vector<1x128xf32>
    %57 = vector.broadcast %56 : vector<1x128xf32> to vector<128x128xf32>
    %c0_38 = arith.constant 0 : index
    %c0_39 = arith.constant 0 : index
    %58 = vector.load %arg1[%c0_38, %c0_39] : memref<128x128xf32, #tpu.memory_space<vmem>>, vector<128x128xf32>
    %cst_40 = arith.constant -1.000000e+30 : f32
    %c0_i32 = arith.constant 0 : i32
    %59 = arith.truncf %58 : vector<128x128xf32> to vector<128x128xbf16>
    %cst_41 = arith.constant dense<0.000000e+00> : vector<24x128xf32>
    %60 = tpu.matmul %9, %59, %cst_41 {dimension_numbers = #tpu.dot_dimension_numbers<[1], [0], [0], [1], [0, 0, 1, 1], [], []>} : vector<24x128xbf16>, vector<128x128xbf16>, vector<24x128xf32> -> vector<24x128xf32>
    %61 = arith.truncf %60 : vector<24x128xf32> to vector<24x128xbf16>
    %cst_42 = arith.constant dense<0.000000e+00> : vector<24x128xf32>
    %62 = tpu.matmul %12, %59, %cst_42 {dimension_numbers = #tpu.dot_dimension_numbers<[1], [0], [0], [1], [0, 0, 1, 1], [], []>} : vector<24x128xbf16>, vector<128x128xbf16>, vector<24x128xf32> -> vector<24x128xf32>
    %63 = arith.truncf %62 : vector<24x128xf32> to vector<24x128xbf16>
    %cst_43 = arith.constant dense<0.000000e+00> : vector<24x128xf32>
    %64 = tpu.matmul %63, %36, %cst_43 {dimension_numbers = #tpu.dot_dimension_numbers<[1], [0], [0], [1], [0, 0, 1, 1], [], []>} : vector<24x128xbf16>, vector<128x128xbf16>, vector<24x128xf32> -> vector<24x128xf32>
    %65 = arith.addf %64, %43 : vector<24x128xf32>
    %cst_44 = arith.constant dense<0.000000e+00> : vector<24x128xf32>
    %66 = tpu.matmul %61, %37, %cst_44 {dimension_numbers = #tpu.dot_dimension_numbers<[1], [0], [0], [1], [0, 0, 1, 1], [], []>} : vector<24x128xbf16>, vector<128x128xbf16>, vector<24x128xf32> -> vector<24x128xf32>
    %67 = arith.addf %66, %47 : vector<24x128xf32>
    %cst_45 = arith.constant dense<0.000000e+00> : vector<24x128xf32>
    %68 = tpu.matmul %61, %38, %cst_45 {dimension_numbers = #tpu.dot_dimension_numbers<[1], [0], [0], [1], [0, 0, 1, 1], [], []>} : vector<24x128xbf16>, vector<128x128xbf16>, vector<24x128xf32> -> vector<24x128xf32>
    %69 = arith.addf %68, %51 : vector<24x128xf32>
    %70 = arith.mulf %65, %67 : vector<24x128xf32>
    %cst_46 = arith.constant dense<0.000000e+00> : vector<24xf32>
    %71 = vector.multi_reduction <add>, %70, %cst_46 [1] : vector<24x128xf32> to vector<24xf32>
    %72 = vector.shape_cast %71 : vector<24xf32> to vector<24x1xf32>
    %cst_47 = arith.constant 0.176776692 : f32
    %73 = vector.broadcast %cst_47 : f32 to vector<24x1xf32>
    %74 = arith.mulf %72, %73 : vector<24x1xf32>
    %75 = vector.shape_cast %74 : vector<24x1xf32> to vector<24x1xf32>
    %76 = vector.broadcast %75 : vector<24x1xf32> to vector<24x128xf32>
    %77 = vector.broadcast %cst_40 : f32 to vector<24x128xf32>
    %78 = arith.select %3, %76, %77 : vector<24x128xi1>, vector<24x128xf32>
    %cst_48 = arith.constant dense<0xFF800000> : vector<128xf32>
    %79 = vector.multi_reduction <maximumf>, %78, %cst_48 [0] : vector<24x128xf32> to vector<128xf32>
    %80 = vector.shape_cast %79 : vector<128xf32> to vector<1x128xf32>
    %81 = vector.shape_cast %80 : vector<1x128xf32> to vector<1x128xf32>
    %82 = vector.broadcast %81 : vector<1x128xf32> to vector<24x128xf32>
    %83 = vector.broadcast %cst_40 : f32 to vector<24x128xf32>
    %84 = arith.select %3, %82, %83 : vector<24x128xi1>, vector<24x128xf32>
    %cst_49 = arith.constant dense<0xFF800000> : vector<24xf32>
    %85 = vector.multi_reduction <maximumf>, %84, %cst_49 [1] : vector<24x128xf32> to vector<24xf32>
    %86 = vector.shape_cast %85 : vector<24xf32> to vector<24x1xf32>
    %87 = arith.subf %74, %86 : vector<24x1xf32>
    %cst_50 = arith.constant 0.000000e+00 : f32
    %88 = vector.broadcast %cst_50 : f32 to vector<24x1xf32>
    %89 = arith.minimumf %87, %88 : vector<24x1xf32>
    %90 = math.exp %89 : vector<24x1xf32>
    %cst_51 = arith.constant 0.000000e+00 : f32
    %91 = vector.shape_cast %90 : vector<24x1xf32> to vector<24x1xf32>
    %92 = vector.broadcast %91 : vector<24x1xf32> to vector<24x128xf32>
    %93 = vector.broadcast %cst_51 : f32 to vector<24x128xf32>
    %94 = arith.select %3, %92, %93 : vector<24x128xi1>, vector<24x128xf32>
    %cst_52 = arith.constant dense<0.000000e+00> : vector<128xf32>
    %95 = vector.multi_reduction <add>, %94, %cst_52 [0] : vector<24x128xf32> to vector<128xf32>
    %96 = vector.shape_cast %95 : vector<128xf32> to vector<1x128xf32>
    %cst_53 = arith.constant 1.000000e-16 : f32
    %97 = vector.broadcast %cst_53 : f32 to vector<1x128xf32>
    %98 = arith.addf %96, %97 : vector<1x128xf32>
    %99 = tpu.reciprocal %98 {approx = true} : vector<1x128xf32> -> vector<1x128xf32>
    %cst_54 = arith.constant 0.000000e+00 : f32
    %100 = vector.shape_cast %99 : vector<1x128xf32> to vector<1x128xf32>
    %101 = vector.broadcast %100 : vector<1x128xf32> to vector<24x128xf32>
    %102 = vector.broadcast %cst_54 : f32 to vector<24x128xf32>
    %103 = arith.select %3, %101, %102 : vector<24x128xi1>, vector<24x128xf32>
    %cst_55 = arith.constant dense<0.000000e+00> : vector<24xf32>
    %104 = vector.multi_reduction <add>, %103, %cst_55 [1] : vector<24x128xf32> to vector<24xf32>
    %105 = vector.shape_cast %104 : vector<24xf32> to vector<24x1xf32>
    %106 = arith.mulf %90, %105 : vector<24x1xf32>
    %107 = vector.broadcast %106 : vector<24x1xf32> to vector<24x128xf32>
    %108 = arith.mulf %107, %69 : vector<24x128xf32>
    %109 = arith.truncf %108 : vector<24x128xf32> to vector<24x128xbf16>
    %cst_56 = arith.constant dense<0.000000e+00> : vector<128x128xf32>
    %110 = tpu.matmul %19, %109, %cst_56 {dimension_numbers = #tpu.dot_dimension_numbers<[1], [0], [0], [1], [0, 0, 1, 1], [], []>} : vector<128x24xbf16>, vector<24x128xbf16>, vector<128x128xf32> -> vector<128x128xf32>
    %cst_57 = arith.constant dense<0.000000e+00> : vector<128x128xf32>
    %111 = tpu.matmul %59, %39, %cst_57 {dimension_numbers = #tpu.dot_dimension_numbers<[1], [0], [0], [1], [0, 0, 1, 1], [], []>} : vector<128x128xbf16>, vector<128x128xbf16>, vector<128x128xf32> -> vector<128x128xf32>
    %112 = arith.addf %110, %111 : vector<128x128xf32>
    %113 = arith.addf %112, %54 : vector<128x128xf32>
    %cst_58 = arith.constant dense<0.000000e+00> : vector<128x128xf32>
    %114 = tpu.matmul %59, %40, %cst_58 {dimension_numbers = #tpu.dot_dimension_numbers<[1], [0], [0], [1], [0, 0, 1, 1], [], []>} : vector<128x128xbf16>, vector<128x128xbf16>, vector<128x128xf32> -> vector<128x128xf32>
    %115 = arith.addf %114, %113 : vector<128x128xf32>
    %116 = arith.addf %115, %57 : vector<128x128xf32>
    %117 = math.tanh %116 : vector<128x128xf32>
    %cst_59 = arith.constant 1.000000e-01 : f32
    %118 = vector.broadcast %cst_59 : f32 to vector<128x128xf32>
    %119 = arith.mulf %118, %117 : vector<128x128xf32>
    %120 = arith.addf %58, %119 : vector<128x128xf32>
    %c1_i32 = arith.constant 1 : i32
    %121 = arith.truncf %120 : vector<128x128xf32> to vector<128x128xbf16>
    %cst_60 = arith.constant dense<0.000000e+00> : vector<24x128xf32>
    %122 = tpu.matmul %9, %121, %cst_60 {dimension_numbers = #tpu.dot_dimension_numbers<[1], [0], [0], [1], [0, 0, 1, 1], [], []>} : vector<24x128xbf16>, vector<128x128xbf16>, vector<24x128xf32> -> vector<24x128xf32>
    %123 = arith.truncf %122 : vector<24x128xf32> to vector<24x128xbf16>
    %cst_61 = arith.constant dense<0.000000e+00> : vector<24x128xf32>
    %124 = tpu.matmul %12, %121, %cst_61 {dimension_numbers = #tpu.dot_dimension_numbers<[1], [0], [0], [1], [0, 0, 1, 1], [], []>} : vector<24x128xbf16>, vector<128x128xbf16>, vector<24x128xf32> -> vector<24x128xf32>
    %125 = arith.truncf %124 : vector<24x128xf32> to vector<24x128xbf16>
    %cst_62 = arith.constant dense<0.000000e+00> : vector<24x128xf32>
    %126 = tpu.matmul %125, %36, %cst_62 {dimension_numbers = #tpu.dot_dimension_numbers<[1], [0], [0], [1], [0, 0, 1, 1], [], []>} : vector<24x128xbf16>, vector<128x128xbf16>, vector<24x128xf32> -> vector<24x128xf32>
    %127 = arith.addf %126, %43 : vector<24x128xf32>
    %cst_63 = arith.constant dense<0.000000e+00> : vector<24x128xf32>
    %128 = tpu.matmul %123, %37, %cst_63 {dimension_numbers = #tpu.dot_dimension_numbers<[1], [0], [0], [1], [0, 0, 1, 1], [], []>} : vector<24x128xbf16>, vector<128x128xbf16>, vector<24x128xf32> -> vector<24x128xf32>
    %129 = arith.addf %128, %47 : vector<24x128xf32>
    %cst_64 = arith.constant dense<0.000000e+00> : vector<24x128xf32>
    %130 = tpu.matmul %123, %38, %cst_64 {dimension_numbers = #tpu.dot_dimension_numbers<[1], [0], [0], [1], [0, 0, 1, 1], [], []>} : vector<24x128xbf16>, vector<128x128xbf16>, vector<24x128xf32> -> vector<24x128xf32>
    %131 = arith.addf %130, %51 : vector<24x128xf32>
    %132 = arith.mulf %127, %129 : vector<24x128xf32>
    %cst_65 = arith.constant dense<0.000000e+00> : vector<24xf32>
    %133 = vector.multi_reduction <add>, %132, %cst_65 [1] : vector<24x128xf32> to vector<24xf32>
    %134 = vector.shape_cast %133 : vector<24xf32> to vector<24x1xf32>
    %cst_66 = arith.constant 0.176776692 : f32
    %135 = vector.broadcast %cst_66 : f32 to vector<24x1xf32>
    %136 = arith.mulf %134, %135 : vector<24x1xf32>
    %137 = vector.shape_cast %136 : vector<24x1xf32> to vector<24x1xf32>
    %138 = vector.broadcast %137 : vector<24x1xf32> to vector<24x128xf32>
    %139 = vector.broadcast %cst_40 : f32 to vector<24x128xf32>
    %140 = arith.select %3, %138, %139 : vector<24x128xi1>, vector<24x128xf32>
    %cst_67 = arith.constant dense<0xFF800000> : vector<128xf32>
    %141 = vector.multi_reduction <maximumf>, %140, %cst_67 [0] : vector<24x128xf32> to vector<128xf32>
    %142 = vector.shape_cast %141 : vector<128xf32> to vector<1x128xf32>
    %143 = vector.shape_cast %142 : vector<1x128xf32> to vector<1x128xf32>
    %144 = vector.broadcast %143 : vector<1x128xf32> to vector<24x128xf32>
    %145 = vector.broadcast %cst_40 : f32 to vector<24x128xf32>
    %146 = arith.select %3, %144, %145 : vector<24x128xi1>, vector<24x128xf32>
    %cst_68 = arith.constant dense<0xFF800000> : vector<24xf32>
    %147 = vector.multi_reduction <maximumf>, %146, %cst_68 [1] : vector<24x128xf32> to vector<24xf32>
    %148 = vector.shape_cast %147 : vector<24xf32> to vector<24x1xf32>
    %149 = arith.subf %136, %148 : vector<24x1xf32>
    %cst_69 = arith.constant 0.000000e+00 : f32
    %150 = vector.broadcast %cst_69 : f32 to vector<24x1xf32>
    %151 = arith.minimumf %149, %150 : vector<24x1xf32>
    %152 = math.exp %151 : vector<24x1xf32>
    %cst_70 = arith.constant 0.000000e+00 : f32
    %153 = vector.shape_cast %152 : vector<24x1xf32> to vector<24x1xf32>
    %154 = vector.broadcast %153 : vector<24x1xf32> to vector<24x128xf32>
    %155 = vector.broadcast %cst_70 : f32 to vector<24x128xf32>
    %156 = arith.select %3, %154, %155 : vector<24x128xi1>, vector<24x128xf32>
    %cst_71 = arith.constant dense<0.000000e+00> : vector<128xf32>
    %157 = vector.multi_reduction <add>, %156, %cst_71 [0] : vector<24x128xf32> to vector<128xf32>
    %158 = vector.shape_cast %157 : vector<128xf32> to vector<1x128xf32>
    %cst_72 = arith.constant 1.000000e-16 : f32
    %159 = vector.broadcast %cst_72 : f32 to vector<1x128xf32>
    %160 = arith.addf %158, %159 : vector<1x128xf32>
    %161 = tpu.reciprocal %160 {approx = true} : vector<1x128xf32> -> vector<1x128xf32>
    %cst_73 = arith.constant 0.000000e+00 : f32
    %162 = vector.shape_cast %161 : vector<1x128xf32> to vector<1x128xf32>
    %163 = vector.broadcast %162 : vector<1x128xf32> to vector<24x128xf32>
    %164 = vector.broadcast %cst_73 : f32 to vector<24x128xf32>
    %165 = arith.select %3, %163, %164 : vector<24x128xi1>, vector<24x128xf32>
    %cst_74 = arith.constant dense<0.000000e+00> : vector<24xf32>
    %166 = vector.multi_reduction <add>, %165, %cst_74 [1] : vector<24x128xf32> to vector<24xf32>
    %167 = vector.shape_cast %166 : vector<24xf32> to vector<24x1xf32>
    %168 = arith.mulf %152, %167 : vector<24x1xf32>
    %169 = vector.broadcast %168 : vector<24x1xf32> to vector<24x128xf32>
    %170 = arith.mulf %169, %131 : vector<24x128xf32>
    %171 = arith.truncf %170 : vector<24x128xf32> to vector<24x128xbf16>
    %cst_75 = arith.constant dense<0.000000e+00> : vector<128x128xf32>
    %172 = tpu.matmul %19, %171, %cst_75 {dimension_numbers = #tpu.dot_dimension_numbers<[1], [0], [0], [1], [0, 0, 1, 1], [], []>} : vector<128x24xbf16>, vector<24x128xbf16>, vector<128x128xf32> -> vector<128x128xf32>
    %cst_76 = arith.constant dense<0.000000e+00> : vector<128x128xf32>
    %173 = tpu.matmul %121, %39, %cst_76 {dimension_numbers = #tpu.dot_dimension_numbers<[1], [0], [0], [1], [0, 0, 1, 1], [], []>} : vector<128x128xbf16>, vector<128x128xbf16>, vector<128x128xf32> -> vector<128x128xf32>
    %174 = arith.addf %172, %173 : vector<128x128xf32>
    %175 = arith.addf %174, %54 : vector<128x128xf32>
    %cst_77 = arith.constant dense<0.000000e+00> : vector<128x128xf32>
    %176 = tpu.matmul %121, %40, %cst_77 {dimension_numbers = #tpu.dot_dimension_numbers<[1], [0], [0], [1], [0, 0, 1, 1], [], []>} : vector<128x128xbf16>, vector<128x128xbf16>, vector<128x128xf32> -> vector<128x128xf32>
    %177 = arith.addf %176, %175 : vector<128x128xf32>
    %178 = arith.addf %177, %57 : vector<128x128xf32>
    %179 = math.tanh %178 : vector<128x128xf32>
    %cst_78 = arith.constant 1.000000e-01 : f32
    %180 = vector.broadcast %cst_78 : f32 to vector<128x128xf32>
    %181 = arith.mulf %180, %179 : vector<128x128xf32>
    %182 = arith.addf %120, %181 : vector<128x128xf32>
    %c0_79 = arith.constant 0 : index
    %c0_80 = arith.constant 0 : index
    %183 = vector.load %arg29[%c0_79, %c0_80] : memref<128x128xf32, #tpu.memory_space<vmem>>, vector<128x128xf32>
    tpu.vector_store %arg29[%c0_79, %c0_80], %182 {strides = array<i32>} : memref<128x128xf32, #tpu.memory_space<vmem>>, vector<128x128xf32>,
    %184 = arith.truncf %182 : vector<128x128xf32> to vector<128x128xbf16>
    %185 = tpu.iota {dimensions = array<i32: 1>} : vector<16x128xi32>
    %c0_81 = arith.constant 0 : index
    %c0_82 = arith.constant 0 : index
    %186 = vector.load %arg7[%c0_81, %c0_82] : memref<16x1xi32, #tpu.memory_space<vmem>>, vector<16x1xi32>
    %187 = vector.broadcast %186 : vector<16x1xi32> to vector<16x128xi32>
    %188 = arith.cmpi eq, %185, %187 : vector<16x128xi32>
    %189 = arith.extui %188 : vector<16x128xi1> to vector<16x128xi32>
    %190 = arith.sitofp %189 : vector<16x128xi32> to vector<16x128xf32>
    %191 = arith.truncf %190 : vector<16x128xf32> to vector<16x128xbf16>
    %cst_83 = arith.constant dense<0.000000e+00> : vector<16x128xf32>
    %192 = tpu.matmul %191, %184, %cst_83 {dimension_numbers = #tpu.dot_dimension_numbers<[1], [0], [0], [1], [0, 0, 1, 1], [], []>} : vector<16x128xbf16>, vector<128x128xbf16>, vector<16x128xf32> -> vector<16x128xf32>
    %193 = arith.truncf %192 : vector<16x128xf32> to vector<16x128xbf16>
    %c0_84 = arith.constant 0 : index
    %c0_85 = arith.constant 0 : index
    %194 = vector.load %arg8[%c0_84, %c0_85] : memref<16x1xi32, #tpu.memory_space<vmem>>, vector<16x1xi32>
    %195 = vector.broadcast %194 : vector<16x1xi32> to vector<16x128xi32>
    %196 = arith.cmpi eq, %185, %195 : vector<16x128xi32>
    %197 = arith.extui %196 : vector<16x128xi1> to vector<16x128xi32>
    %198 = arith.sitofp %197 : vector<16x128xi32> to vector<16x128xf32>
    %199 = arith.truncf %198 : vector<16x128xf32> to vector<16x128xbf16>
    %cst_86 = arith.constant dense<0.000000e+00> : vector<16x128xf32>
    %200 = tpu.matmul %199, %184, %cst_86 {dimension_numbers = #tpu.dot_dimension_numbers<[1], [0], [0], [1], [0, 0, 1, 1], [], []>} : vector<16x128xbf16>, vector<128x128xbf16>, vector<16x128xf32> -> vector<16x128xf32>
    %201 = arith.truncf %200 : vector<16x128xf32> to vector<16x128xbf16>
    %c0_87 = arith.constant 0 : index
    %c0_88 = arith.constant 0 : index
    %202 = vector.load %arg23[%c0_87, %c0_88] : memref<128x128xbf16, #tpu.memory_space<vmem>>, vector<128x128xbf16>
    %cst_89 = arith.constant dense<0.000000e+00> : vector<16x128xf32>
    %203 = tpu.matmul %193, %202, %cst_89 {dimension_numbers = #tpu.dot_dimension_numbers<[1], [0], [0], [1], [0, 0, 1, 1], [], []>} : vector<16x128xbf16>, vector<128x128xbf16>, vector<16x128xf32> -> vector<16x128xf32>
    %c0_90 = arith.constant 0 : index
    %c0_91 = arith.constant 0 : index
    %204 = vector.load %arg24[%c0_90, %c0_91] : memref<1x128xf32, #tpu.memory_space<vmem>>, vector<1x128xf32>
    %205 = vector.broadcast %204 : vector<1x128xf32> to vector<16x128xf32>
    %206 = arith.addf %203, %205 : vector<16x128xf32>
    %c0_92 = arith.constant 0 : index
    %c0_93 = arith.constant 0 : index
    %207 = vector.load %arg25[%c0_92, %c0_93] : memref<128x128xbf16, #tpu.memory_space<vmem>>, vector<128x128xbf16>
    %cst_94 = arith.constant dense<0.000000e+00> : vector<16x128xf32>
    %208 = tpu.matmul %201, %207, %cst_94 {dimension_numbers = #tpu.dot_dimension_numbers<[1], [0], [0], [1], [0, 0, 1, 1], [], []>} : vector<16x128xbf16>, vector<128x128xbf16>, vector<16x128xf32> -> vector<16x128xf32>
    %209 = arith.addf %206, %208 : vector<16x128xf32>
    %c0_95 = arith.constant 0 : index
    %c0_96 = arith.constant 0 : index
    %210 = vector.load %arg26[%c0_95, %c0_96] : memref<1x128xf32, #tpu.memory_space<vmem>>, vector<1x128xf32>
    %211 = vector.broadcast %210 : vector<1x128xf32> to vector<16x128xf32>
    %212 = arith.addf %209, %211 : vector<16x128xf32>
    %cst_97 = arith.constant 0.000000e+00 : f32
    %213 = vector.broadcast %cst_97 : f32 to vector<16x128xf32>
    %214 = arith.maximumf %212, %213 : vector<16x128xf32>
    %c0_98 = arith.constant 0 : index
    %c0_99 = arith.constant 0 : index
    %215 = vector.load %arg27[%c0_98, %c0_99] : memref<1x128xf32, #tpu.memory_space<vmem>>, vector<1x128xf32>
    %216 = vector.broadcast %215 : vector<1x128xf32> to vector<16x128xf32>
    %217 = arith.mulf %214, %216 : vector<16x128xf32>
    %cst_100 = arith.constant dense<0.000000e+00> : vector<16xf32>
    %218 = vector.multi_reduction <add>, %217, %cst_100 [1] : vector<16x128xf32> to vector<16xf32>
    %219 = vector.shape_cast %218 : vector<16xf32> to vector<16x1xf32>
    %c0_101 = arith.constant 0 : index
    %c0_102 = arith.constant 0 : index
    %220 = vector.load %arg28[%c0_101, %c0_102] : memref<1x1xf32, #tpu.memory_space<vmem>>, vector<1x1xf32>
    %221 = vector.broadcast %220 : vector<1x1xf32> to vector<16x1xf32>
    %222 = arith.addf %219, %221 : vector<16x1xf32>
    %c0_103 = arith.constant 0 : index
    %c0_104 = arith.constant 0 : index
    %223 = vector.load %arg30[%c0_103, %c0_104] : memref<16x1xf32, #tpu.memory_space<vmem>>, vector<16x1xf32>
    tpu.vector_store %arg30[%c0_103, %c0_104], %222 {strides = array<i32>} : memref<16x1xf32, #tpu.memory_space<vmem>>, vector<16x1xf32>,
    return
  }
  func.func @transform_0(%arg0: i32) -> (i32, i32) {
    %c0_i32 = arith.constant 0 : i32
    %c0_i32_0 = arith.constant 0 : i32
    %c0_i32_1 = arith.constant 0 : i32
    return %c0_i32, %c0_i32_0 : i32, i32
  }
  func.func @transform_1(%arg0: i32) -> (i32, i32) {
    %c0_i32 = arith.constant 0 : i32
    %c0_i32_0 = arith.constant 0 : i32
    %c0_i32_1 = arith.constant 0 : i32
    return %c0_i32, %c0_i32_0 : i32, i32
  }
  func.func @transform_2(%arg0: i32) -> (i32, i32) {
    %c0_i32 = arith.constant 0 : i32
    %c0_i32_0 = arith.constant 0 : i32
    %c0_i32_1 = arith.constant 0 : i32
    return %c0_i32, %c0_i32_0 : i32, i32
  }
  func.func @transform_3(%arg0: i32) -> (i32, i32) {
    %c0_i32 = arith.constant 0 : i32
    %c0_i32_0 = arith.constant 0 : i32
    %c0_i32_1 = arith.constant 0 : i32
    return %c0_i32, %c0_i32_0 : i32, i32
  }
  func.func @transform_4(%arg0: i32) -> (i32, i32) {
    %c0_i32 = arith.constant 0 : i32
    %c0_i32_0 = arith.constant 0 : i32
    %c0_i32_1 = arith.constant 0 : i32
    return %c0_i32, %c0_i32_0 : i32, i32
  }
  func.func @transform_5(%arg0: i32) -> (i32, i32) {
    %c0_i32 = arith.constant 0 : i32
    %c0_i32_0 = arith.constant 0 : i32
    %c0_i32_1 = arith.constant 0 : i32
    return %c0_i32, %c0_i32_0 : i32, i32
  }
  func.func @transform_6(%arg0: i32) -> (i32, i32) {
    %c0_i32 = arith.constant 0 : i32
    %c0_i32_0 = arith.constant 0 : i32
    %c0_i32_1 = arith.constant 0 : i32
    return %c0_i32, %c0_i32_0 : i32, i32
  }
  func.func @transform_7(%arg0: i32) -> (i32, i32) {
    %c0_i32 = arith.constant 0 : i32
    %c0_i32_0 = arith.constant 0 : i32
    %c0_i32_1 = arith.constant 0 : i32
    return %c0_i32, %c0_i32_0 : i32, i32
  }
  func.func @transform_8(%arg0: i32) -> (i32, i32) {
    %c0_i32 = arith.constant 0 : i32
    %c0_i32_0 = arith.constant 0 : i32
    %c0_i32_1 = arith.constant 0 : i32
    return %c0_i32, %c0_i32_0 : i32, i32
  }
  func.func @transform_9(%arg0: i32) -> (i32, i32) {
    %c0_i32 = arith.constant 0 : i32
    %c0_i32_0 = arith.constant 0 : i32
    %c0_i32_1 = arith.constant 0 : i32
    return %c0_i32, %c0_i32_0 : i32, i32
  }
  func.func @transform_10(%arg0: i32) -> (i32, i32) {
    %c0_i32 = arith.constant 0 : i32
    %c0_i32_0 = arith.constant 0 : i32
    %c0_i32_1 = arith.constant 0 : i32
    return %c0_i32, %c0_i32_0 : i32, i32
  }
  func.func @transform_11(%arg0: i32) -> (i32, i32) {
    %c0_i32 = arith.constant 0 : i32
    %c0_i32_0 = arith.constant 0 : i32
    %c0_i32_1 = arith.constant 0 : i32
    return %c0_i32, %c0_i32_0 : i32, i32
  }
  func.func @transform_12(%arg0: i32) -> (i32, i32) {
    %c0_i32 = arith.constant 0 : i32
    %c0_i32_0 = arith.constant 0 : i32
    %c0_i32_1 = arith.constant 0 : i32
    return %c0_i32, %c0_i32_0 : i32, i32
  }
  func.func @transform_13(%arg0: i32) -> (i32, i32) {
    %c0_i32 = arith.constant 0 : i32
    %c0_i32_0 = arith.constant 0 : i32
    %c0_i32_1 = arith.constant 0 : i32
    return %c0_i32, %c0_i32_0 : i32, i32
  }
  func.func @transform_14(%arg0: i32) -> (i32, i32) {
    %c0_i32 = arith.constant 0 : i32
    %c0_i32_0 = arith.constant 0 : i32
    %c0_i32_1 = arith.constant 0 : i32
    return %c0_i32, %c0_i32_0 : i32, i32
  }
  func.func @transform_15(%arg0: i32) -> (i32, i32) {
    %c0_i32 = arith.constant 0 : i32
    %c0_i32_0 = arith.constant 0 : i32
    %c0_i32_1 = arith.constant 0 : i32
    return %c0_i32, %c0_i32_0 : i32, i32
  }
  func.func @transform_16(%arg0: i32) -> (i32, i32) {
    %c0_i32 = arith.constant 0 : i32
    %c0_i32_0 = arith.constant 0 : i32
    %c0_i32_1 = arith.constant 0 : i32
    return %c0_i32, %c0_i32_0 : i32, i32
  }
  func.func @transform_17(%arg0: i32) -> (i32, i32) {
    %c0_i32 = arith.constant 0 : i32
    %c0_i32_0 = arith.constant 0 : i32
    %c0_i32_1 = arith.constant 0 : i32
    return %c0_i32, %c0_i32_0 : i32, i32
  }
  func.func @transform_18(%arg0: i32) -> (i32, i32) {
    %c0_i32 = arith.constant 0 : i32
    %c0_i32_0 = arith.constant 0 : i32
    %c0_i32_1 = arith.constant 0 : i32
    return %c0_i32, %c0_i32_0 : i32, i32
  }
  func.func @transform_19(%arg0: i32) -> (i32, i32) {
    %c0_i32 = arith.constant 0 : i32
    %c0_i32_0 = arith.constant 0 : i32
    %c0_i32_1 = arith.constant 0 : i32
    return %c0_i32, %c0_i32_0 : i32, i32
  }
  func.func @transform_20(%arg0: i32) -> (i32, i32) {
    %c0_i32 = arith.constant 0 : i32
    %c0_i32_0 = arith.constant 0 : i32
    %c0_i32_1 = arith.constant 0 : i32
    return %c0_i32, %c0_i32_0 : i32, i32
  }
  func.func @transform_21(%arg0: i32) -> (i32, i32) {
    %c0_i32 = arith.constant 0 : i32
    %c0_i32_0 = arith.constant 0 : i32
    %c0_i32_1 = arith.constant 0 : i32
    return %c0_i32, %c0_i32_0 : i32, i32
  }
  func.func @transform_22(%arg0: i32) -> (i32, i32) {
    %c0_i32 = arith.constant 0 : i32
    %c0_i32_0 = arith.constant 0 : i32
    %c0_i32_1 = arith.constant 0 : i32
    return %c0_i32, %c0_i32_0 : i32, i32
  }
  func.func @transform_23(%arg0: i32) -> (i32, i32) {
    %c0_i32 = arith.constant 0 : i32
    %c0_i32_0 = arith.constant 0 : i32
    %c0_i32_1 = arith.constant 0 : i32
    return %c0_i32, %c0_i32_0 : i32, i32
  }
  func.func @transform_24(%arg0: i32) -> (i32, i32) {
    %c0_i32 = arith.constant 0 : i32
    %c0_i32_0 = arith.constant 0 : i32
    %c0_i32_1 = arith.constant 0 : i32
    return %c0_i32, %c0_i32_0 : i32, i32
  }
  func.func @transform_25(%arg0: i32) -> (i32, i32) {
    %c0_i32 = arith.constant 0 : i32
    %c0_i32_0 = arith.constant 0 : i32
    %c0_i32_1 = arith.constant 0 : i32
    return %c0_i32, %c0_i32_0 : i32, i32
  }
  func.func @transform_26(%arg0: i32) -> (i32, i32) {
    %c0_i32 = arith.constant 0 : i32
    %c0_i32_0 = arith.constant 0 : i32
    %c0_i32_1 = arith.constant 0 : i32
    return %c0_i32, %c0_i32_0 : i32, i32
  }
  func.func @transform_27(%arg0: i32) -> (i32, i32) {
    %c0_i32 = arith.constant 0 : i32
    %c0_i32_0 = arith.constant 0 : i32
    %c0_i32_1 = arith.constant 0 : i32
    return %c0_i32, %c0_i32_0 : i32, i32
  }
  func.func @transform_28(%arg0: i32) -> (i32, i32) {
    %c0_i32 = arith.constant 0 : i32
    %c0_i32_0 = arith.constant 0 : i32
    %c0_i32_1 = arith.constant 0 : i32
    return %c0_i32, %c0_i32_0 : i32, i32
  }
  func.func @transform_29(%arg0: i32) -> (i32, i32) {
    %c0_i32 = arith.constant 0 : i32
    %c0_i32_0 = arith.constant 0 : i32
    %c0_i32_1 = arith.constant 0 : i32
    return %c0_i32, %c0_i32_0 : i32, i32
  }
}

</mosaic_0001>

<bundles_post_ra>
// kernel: tpu_custom_call.1
= control target key start
LH: loop header
LB: loop body
LE: loop exit
PB: predicated region body
PF: predicated region fallthrough
CT: control target
= control target key end

     0   :  { %s4939_s6 = smov 1   ;;  %s4940_s10 = smov 2   ;;  %s6298_s0 = inlined_call_operand.smem [shape: u32[30], index: -1, kind: input, shape index: {}] }
   0x1   :  { %s5007_s5 = sld [smem:[%s6298_s0]]   ;;  %s4941_s14 = smov 3  }
   0x2   :  { %s5012_s9 = sld [smem:[%s6298_s0 + %s4939_s6]]   ;;  %s4942_s18 = smov 4  }
   0x3   :  { %s5017_s13 = sld [smem:[%s6298_s0 + %s4940_s10]]   ;;  %s4943_s22 = smov 5  }
   0x4   :  { %s5022_s17 = sld [smem:[%s6298_s0 + %s4941_s14]]   ;;  %s4944_s26 = smov 6  }
   0x5   :  { %s5027_s21 = sld [smem:[%s6298_s0 + %s4942_s18]]   ;;  %s4945_s30 = smov 7  }
   0x6   :  { %s5032_s25 = sld [smem:[%s6298_s0 + %s4943_s22]]   ;;  %s4946_s4 = smov 8  }
   0x7   :  { %s5037_s29 = sld [smem:[%s6298_s0 + %s4944_s26]]   ;;  %s4947_s10 = smov 9  }
   0x8   :  { %6342 = sst [smem:[#allocation40_spill]] %s5012_s9  ;;  %s4948_s15 = smov 10  }
   0x9   :  { %s5042_s3 = sld [smem:[%s6298_s0 + %s4945_s30]]   ;;  %s4949_s20 = smov 11  }
   0xa   :  { %6343 = sst [smem:[#allocation41_spill]] %s5022_s17  ;;  %s4950_s26 = smov 12  }
   0xb   :  { %6344 = sst [smem:[#allocation42_spill]] %s5027_s21  ;;  %s4951_s1 = smov 13  }
   0xc   :  { %s5047_s8 = sld [smem:[%s6298_s0 + %s4946_s4]]   ;;  %s4952_s7 = smov 14  }
   0xd   :  { %6345 = sst [smem:[#allocation43_spill]] %s5037_s29  ;;  %s4954_s22 = smov 16  }
   0xe   :  { %s5052_s14 = sld [smem:[%s6298_s0 + %s4947_s10]]   ;;  %s4955_s28 = smov 17  }
   0xf   :  { %6346 = sst [smem:[#allocation44_spill]] %s5042_s3  ;;  %s4966_s23 = smov 28  }
  0x10   :  { %s5057_s19 = sld [smem:[%s6298_s0 + %s4948_s15]]   ;;  %s4953_s15 = smov 15  }
  0x11   :  { %s5062_s24 = sld [smem:[%s6298_s0 + %s4949_s20]]  }
  0x12   :  { %s5067_s30 = sld [smem:[%s6298_s0 + %s4950_s26]]  }
  0x13   :  { %s5072_s6 = sld [smem:[%s6298_s0 + %s4951_s1]]   ;;  %s4967_s1 = smov 29  }
  0x14   :  { %s5077_s12 = sld [smem:[%s6298_s0 + %s4952_s7]]   ;;  %s4956_s7 = smov 18  }
  0x15   :  { %s5082_s20 = sld [smem:[%s6298_s0 + %s4953_s15]]   ;;  %s4957_s15 = smov 19  }
  0x16   :  { %6347 = sst [smem:[#allocation45_spill]] %s5057_s19 }
  0x17   :  { %6348 = sst [smem:[#allocation46_spill]] %s5062_s24 }
  0x18   :  { %s5087_s27 = sld [smem:[%s6298_s0 + %s4954_s22]]   ;;  %s4958_s22 = smov 20  }
  0x19   :  { %s5092_s4 = sld [smem:[%s6298_s0 + %s4955_s28]]   ;;  %s4959_s28 = smov 21  }
  0x1a   :  { %s5097_s3 = sld [smem:[%s6298_s0 + %s4956_s7]]   ;;  %s4960_s7 = smov 22  }
  0x1b   :  { %s5102_s29 = sld [smem:[%s6298_s0 + %s4957_s15]]   ;;  %s4961_s15 = smov 23  }
  0x1c   :  { %s5107_s19 = sld [smem:[%s6298_s0 + %s4958_s22]]   ;;  %s4962_s22 = smov 24  }
  0x1d   :  { %s5112_s24 = sld [smem:[%s6298_s0 + %s4959_s28]]   ;;  %s4963_s28 = smov 25  }
  0x1e   :  { %s5117_s9 = sld [smem:[%s6298_s0 + %s4960_s7]]   ;;  %s4964_s7 = smov 26  }
  0x1f   :  { %s5122_s21 = sld [smem:[%s6298_s0 + %s4961_s15]]   ;;  %s4965_s15 = smov 27  }
  0x20   :  { %s5127_s17 = sld [smem:[%s6298_s0 + %s4962_s22]]  }
  0x23   :  { %6349 = sst [smem:[#allocation47_spill]] %s5112_s24 }
  0x24   :  { %6350 = sst [smem:[#allocation48_spill]] %s5117_s9 }
  0x25   :  { %6351 = sst [smem:[#allocation49_spill]] %s5122_s21 }
  0x26   :  { %6352 = sst [smem:[#allocation50_spill]] %s5127_s17 }
  0x27   :  { %s5132_s24 = sld [smem:[%s6298_s0 + %s4963_s28]]  }
  0x28   :  { %s5137_s9 = sld [smem:[%s6298_s0 + %s4964_s7]]  }
  0x29   :  { %s3289_s21 = sld [smem:[%s6298_s0 + %s4965_s15]]  }
  0x2a   :  { %s5145_s17 = sld [smem:[%s6298_s0 + %s4966_s23]]  }
  0x2d   :  { %6353 = sst [smem:[#allocation51_spill]] %s5132_s24 }
  0x2e   :  { %s5150_s24 = sld [smem:[%s6298_s0 + %s4967_s1]]  }
  0x2f   :  { %v65_v0 = vstv %s3289_s21 }
  0x30   :  { %66 = vst [vmem:[#allocation2] sm:$0x1] %v65_v0 }
  0x31   :  { %67 = vsyncpa [#allocation4], 0 }
  0x32   :  { %68 = vsyncpa [#allocation7], 0 }
  0x33   :  { %69 = vsyncpa [#allocation10], 0 }
  0x34   :  { %70 = vsyncpa [#allocation13], 0 }
  0x35   :  { %71 = vsyncpa [#allocation16], 0 }
  0x36   :  { %72 = vsyncpa [#allocation19], 0 }
  0x37   :  { %73 = vsyncpa [#allocation22], 0 }
  0x38   :  { %74 = vsyncpa [#allocation25], 0 }
  0x39   :  { %75 = vsyncpa [#allocation28], 0 }
  0x3a   :  { %76 = vsyncpa [#allocation5], 0  ;;  %s4968_s7 = smov [#allocation6]   ;;  %s4545_s0 = scalar_lea.hbm %s5017_s13, 192 }
  0x3b   :  { %s96_s10 = sshll.u32 %s4968_s7, 4  ;;  %p4546_p0 = scmp.ne.s32.totalorder %s5017_s13, %s4545_s0  ;;  %s97_s10 = int_to_ptr.vmem [resolvable:$true] %s96_s10 }
  0x3c   :  { %p4549_p1 = scmp.lt.u32.totalorder %s4545_s0, %s5017_s13 }
  0x3e   :  { %p4551_p2 = pnand %p4549_p1, %p4546_p0 }
  0x40   :  { %4554 = shalt.err (!%p4551_p2)
}
  0x41   :  { %s4555_s21 = scalar_lea.vmem %s97_s10, 192  ;;  %p4560_p4 = scmp.lt.s32.totalorder %s97_s10, %s97_s10 }
  0x42   :  { %p4556_p3 = scmp.ne.s32.totalorder %s97_s10, %s4555_s21  ;;  %p4561_p5 = scmp.lt.s32.totalorder %s4555_s21, %s4555_s21 }
  0x44   :  { %p4562_p6 = por %p4561_p5, %p4560_p4 }
  0x46   :  { %p4563_p7 = pnand %p4562_p6, %p4556_p3 }
  0x48   :  { %4566 = shalt.err (!%p4563_p7)
}
  0x49   :  { %s4969_s11 = smov 64   ;;  %s4970_s15 = smov 4  }
  0x4a   :  { %102 = dma.hbm_to_vmem [thread:$0]  %s5017_s13, 192, %s97_s10, [#allocation7], %s4969_s11, %s4969_s11, %s4970_s15  }
  0x4b   :  { %s4971_s16 = smov [#allocation9]   ;;  %s4972_s23 = smov [#allocation12]  }
  0x4c   :  { %s127_s18 = sshll.u32 %s4971_s16, 4  ;;  %s150_s22 = sshll.u32 %s4972_s23, 4  ;;  %s128_s18 = int_to_ptr.vmem [resolvable:$true] %s127_s18  ;;  %s151_s22 = int_to_ptr.vmem [resolvable:$true] %s150_s22 }
  0x4d   :  { %s4567_s26 = scalar_lea.hbm %s5047_s8, 16 }
  0x4e   :  { %p4568_p8 = scmp.ne.s32.totalorder %s5047_s8, %s4567_s26  ;;  %p4571_p9 = scmp.lt.u32.totalorder %s4567_s26, %s5047_s8 }
  0x50   :  { %p4573_p10 = pnand %p4571_p9, %p4568_p8 }
  0x52   :  { %4576 = shalt.err (!%p4573_p10)
}
  0x53   :  { %s4577_s1 = scalar_lea.vmem %s128_s18, 16  ;;  %s4581_s28 = scalar_lea.vmem %s128_s18, 32 }
  0x54   :  { %p4578_p11 = scmp.ne.s32.totalorder %s128_s18, %s4577_s1  ;;  %p4582_p12 = scmp.lt.s32.totalorder %s128_s18, %s128_s18 }
  0x55   :  { %p4583_p13 = scmp.lt.s32.totalorder %s4581_s28, %s4577_s1 }
  0x57   :  { %p4584_p0 = por %p4583_p13, %p4582_p12 }
  0x59   :  { %p4585_p1 = pnand %p4584_p0, %p4578_p11 }
  0x5b   :  { %4588 = shalt.err (!%p4585_p1)
}
  0x5c   :  { %130 = dma.hbm_to_vmem [thread:$0]  %s5047_s8, 16, %s128_s18, [#allocation10]  }
  0x5d   :  { %s4589_s13 = scalar_lea.hbm %s5067_s30, 1024 }
  0x5e   :  { %p4590_p2 = scmp.ne.s32.totalorder %s5067_s30, %s4589_s13  ;;  %p4593_p3 = scmp.lt.u32.totalorder %s4589_s13, %s5067_s30 }
  0x60   :  { %p4595_p4 = pnand %p4593_p3, %p4590_p2 }
  0x62   :  { %4598 = shalt.err (!%p4595_p4)
}
  0x63   :  { %s4599_s2 = scalar_lea.vmem %s151_s22, 1024  ;;  %p4604_p6 = scmp.lt.s32.totalorder %s151_s22, %s151_s22 }
  0x64   :  { %p4600_p5 = scmp.ne.s32.totalorder %s151_s22, %s4599_s2  ;;  %p4605_p7 = scmp.lt.s32.totalorder %s4599_s2, %s4599_s2 }
  0x66   :  { %p4606_p8 = por %p4605_p7, %p4604_p6 }
  0x68   :  { %p4607_p9 = pnand %p4606_p8, %p4600_p5 }
  0x6a   :  { %4610 = shalt.err (!%p4607_p9)
}
  0x6b   :  { %156 = dma.hbm_to_vmem [thread:$0]  %s5067_s30, 1024, %s151_s22, [#allocation13], %s4969_s11, %s4969_s11, %s4970_s15  }
  0x6c   :  { %s4973_s8 = smov [#allocation15]   ;;  %s4974_s10 = smov [#allocation18]  }
  0x6d   :  { %s172_s7 = sshll.u32 %s4973_s8, 4  ;;  %s194_s0 = sshll.u32 %s4974_s10, 4  ;;  %s173_s7 = int_to_ptr.vmem [resolvable:$true] %s172_s7  ;;  %s195_s0 = int_to_ptr.vmem [resolvable:$true] %s194_s0 }
  0x6e   :  { %s4611_s21 = scalar_lea.hbm %s5077_s12, 1024 }
  0x6f   :  { %p4612_p10 = scmp.ne.s32.totalorder %s5077_s12, %s4611_s21  ;;  %p4615_p11 = scmp.lt.u32.totalorder %s4611_s21, %s5077_s12 }
  0x71   :  { %p4617_p12 = pnand %p4615_p11, %p4612_p10 }
  0x73   :  { %4620 = shalt.err (!%p4617_p12)
}
  0x74   :  { %s4621_s16 = scalar_lea.vmem %s173_s7, 1024  ;;  %p4626_p0 = scmp.lt.s32.totalorder %s173_s7, %s173_s7 }
  0x75   :  { %p4622_p13 = scmp.ne.s32.totalorder %s173_s7, %s4621_s16  ;;  %p4627_p1 = scmp.lt.s32.totalorder %s4621_s16, %s4621_s16 }
  0x77   :  { %p4628_p2 = por %p4627_p1, %p4626_p0 }
  0x79   :  { %p4629_p3 = pnand %p4628_p2, %p4622_p13 }
  0x7b   :  { %4632 = shalt.err (!%p4629_p3)
}
  0x7c   :  { %178 = dma.hbm_to_vmem [thread:$0]  %s5077_s12, 1024, %s173_s7, [#allocation16], %s4969_s11, %s4969_s11, %s4970_s15  }
  0x7d   :  { %s4633_s30 = scalar_lea.hbm %s5087_s27, 1024 }
  0x7e   :  { %p4634_p4 = scmp.ne.s32.totalorder %s5087_s27, %s4633_s30  ;;  %p4637_p5 = scmp.lt.u32.totalorder %s4633_s30, %s5087_s27 }
  0x80   :  { %p4639_p6 = pnand %p4637_p5, %p4634_p4 }
  0x82   :  { %4642 = shalt.err (!%p4639_p6)
}
  0x83   :  { %s4643_s18 = scalar_lea.vmem %s195_s0, 1024  ;;  %p4648_p8 = scmp.lt.s32.totalorder %s195_s0, %s195_s0 }
  0x84   :  { %p4644_p7 = scmp.ne.s32.totalorder %s195_s0, %s4643_s18  ;;  %p4649_p9 = scmp.lt.s32.totalorder %s4643_s18, %s4643_s18 }
  0x86   :  { %p4650_p10 = por %p4649_p9, %p4648_p8 }
  0x88   :  { %p4651_p11 = pnand %p4650_p10, %p4644_p7 }
  0x8a   :  { %4654 = shalt.err (!%p4651_p11)
}
  0x8b   :  { %200 = dma.hbm_to_vmem [thread:$0]  %s5087_s27, 1024, %s195_s0, [#allocation19], %s4969_s11, %s4969_s11, %s4970_s15  }
  0x8c   :  { %s4975_s12 = smov [#allocation21]   ;;  %s4976_s22 = smov [#allocation24]  }
  0x8d   :  { %s216_s23 = sshll.u32 %s4975_s12, 4  ;;  %s238_s26 = sshll.u32 %s4976_s22, 4  ;;  %s217_s23 = int_to_ptr.vmem [resolvable:$true] %s216_s23  ;;  %s239_s26 = int_to_ptr.vmem [resolvable:$true] %s238_s26 }
  0x8e   :  { %s4655_s1 = scalar_lea.hbm %s5097_s3, 1024 }
  0x8f   :  { %p4656_p12 = scmp.ne.s32.totalorder %s5097_s3, %s4655_s1  ;;  %p4659_p13 = scmp.lt.u32.totalorder %s4655_s1, %s5097_s3 }
  0x91   :  { %p4661_p0 = pnand %p4659_p13, %p4656_p12 }
  0x93   :  { %4664 = shalt.err (!%p4661_p0)
}
  0x94   :  { %s4665_s28 = scalar_lea.vmem %s217_s23, 1024  ;;  %p4670_p2 = scmp.lt.s32.totalorder %s217_s23, %s217_s23 }
  0x95   :  { %p4666_p1 = scmp.ne.s32.totalorder %s217_s23, %s4665_s28  ;;  %p4671_p3 = scmp.lt.s32.totalorder %s4665_s28, %s4665_s28 }
  0x97   :  { %p4672_p4 = por %p4671_p3, %p4670_p2 }
  0x99   :  { %p4673_p5 = pnand %p4672_p4, %p4666_p1 }
  0x9b   :  { %4676 = shalt.err (!%p4673_p5)
}
  0x9c   :  { %222 = dma.hbm_to_vmem [thread:$0]  %s5097_s3, 1024, %s217_s23, [#allocation22], %s4969_s11, %s4969_s11, %s4970_s15  }
  0x9d   :  { %s4677_s27 = scalar_lea.hbm %s5107_s19, 1024 }
  0x9e   :  { %p4678_p6 = scmp.ne.s32.totalorder %s5107_s19, %s4677_s27  ;;  %p4681_p7 = scmp.lt.u32.totalorder %s4677_s27, %s5107_s19 }
  0xa0   :  { %p4683_p8 = pnand %p4681_p7, %p4678_p6 }
  0xa2   :  { %4686 = shalt.err (!%p4683_p8)
}
  0xa3   :  { %s4687_s13 = scalar_lea.vmem %s239_s26, 1024  ;;  %p4692_p10 = scmp.lt.s32.totalorder %s239_s26, %s239_s26 }
  0xa4   :  { %p4688_p9 = scmp.ne.s32.totalorder %s239_s26, %s4687_s13  ;;  %p4693_p11 = scmp.lt.s32.totalorder %s4687_s13, %s4687_s13 }
  0xa6   :  { %p4694_p12 = por %p4693_p11, %p4692_p10 }
  0xa8   :  { %p4695_p13 = pnand %p4694_p12, %p4688_p9 }
  0xaa   :  { %4698 = shalt.err (!%p4695_p13)
}
  0xab   :  { %244 = dma.hbm_to_vmem [thread:$0]  %s5107_s19, 1024, %s239_s26, [#allocation25], %s4969_s11, %s4969_s11, %s4970_s15  }
  0xac   :  { %s4977_s3 = smov [#allocation3]   ;;  %s4699_s8 = scalar_lea.hbm %s5007_s5, 2048 }
  0xad   :  { %s82_s2 = sshll.u32 %s4977_s3, 4  ;;  %p4700_p0 = scmp.ne.s32.totalorder %s5007_s5, %s4699_s8  ;;  %s83_s2 = int_to_ptr.vmem [resolvable:$true] %s82_s2 }
  0xae   :  { %p4703_p1 = scmp.lt.u32.totalorder %s4699_s8, %s5007_s5 }
  0xb0   :  { %p4705_p2 = pnand %p4703_p1, %p4700_p0 }
  0xb2   :  { %4708 = shalt.err (!%p4705_p2)
}
  0xb3   :  { %s4709_s7 = scalar_lea.vmem %s83_s2, 2048  ;;  %p4714_p4 = scmp.lt.s32.totalorder %s83_s2, %s83_s2 }
  0xb4   :  { %p4710_p3 = scmp.ne.s32.totalorder %s83_s2, %s4709_s7  ;;  %p4715_p5 = scmp.lt.s32.totalorder %s4709_s7, %s4709_s7 }
  0xb6   :  { %p4716_p6 = por %p4715_p5, %p4714_p4 }
  0xb8   :  { %p4717_p7 = pnand %p4716_p6, %p4710_p3 }
  0xba   :  { %4720 = shalt.err (!%p4717_p7)
}
  0xbb   :  { %s4978_s10 = smov 128   ;;  %s4979_s19 = smov 8  }
  0xbc   :  { %88 = dma.hbm_to_vmem [thread:$0]  %s5007_s5, 2048, %s83_s2, [#allocation4], %s4978_s10, %s4978_s10, %s4979_s19  }
  0xbd   :  { %s4980_s0 = smov [#allocation8]   ;;  %s4981_s16 = smov [#allocation11]  }
  0xbe   :  { %s113_s21 = sshll.u32 %s4980_s0, 4  ;;  %s137_s30 = sshll.u32 %s4981_s16, 4  ;;  %s114_s21 = int_to_ptr.vmem [resolvable:$true] %s113_s21  ;;  %s138_s30 = int_to_ptr.vmem [resolvable:$true] %s137_s30 }
  0xbf   :  { %s4721_s18 = scalar_lea.hbm %s5032_s25, 16 }
  0xc0   :  { %p4722_p8 = scmp.ne.s32.totalorder %s5032_s25, %s4721_s18  ;;  %p4725_p9 = scmp.lt.u32.totalorder %s4721_s18, %s5032_s25 }
  0xc2   :  { %p4727_p10 = pnand %p4725_p9, %p4722_p8 }
  0xc4   :  { %4730 = shalt.err (!%p4727_p10)
}
  0xc5   :  { %s4731_s12 = scalar_lea.vmem %s114_s21, 16  ;;  %s4735_s23 = scalar_lea.vmem %s114_s21, 32 }
  0xc6   :  { %p4732_p11 = scmp.ne.s32.totalorder %s114_s21, %s4731_s12  ;;  %p4736_p12 = scmp.lt.s32.totalorder %s114_s21, %s114_s21 }
  0xc7   :  { %p4737_p13 = scmp.lt.s32.totalorder %s4735_s23, %s4731_s12 }
  0xc9   :  { %p4738_p0 = por %p4737_p13, %p4736_p12 }
  0xcb   :  { %p4739_p1 = pnand %p4738_p0, %p4732_p11 }
  0xcd   :  { %4742 = shalt.err (!%p4739_p1)
}
  0xce   :  { %116 = dma.hbm_to_vmem [thread:$0]  %s5032_s25, 16, %s114_s21, [#allocation7]  }
  0xcf   :  { %s4743_s5 = scalar_lea.hbm %s5052_s14, 16 }
  0xd0   :  { %p4744_p2 = scmp.ne.s32.totalorder %s5052_s14, %s4743_s5  ;;  %p4747_p3 = scmp.lt.u32.totalorder %s4743_s5, %s5052_s14 }
  0xd2   :  { %p4749_p4 = pnand %p4747_p3, %p4744_p2 }
  0xd4   :  { %4752 = shalt.err (!%p4749_p4)
}
  0xd5   :  { %s4753_s22 = scalar_lea.vmem %s138_s30, 16  ;;  %s4757_s26 = scalar_lea.vmem %s138_s30, 32 }
  0xd6   :  { %p4754_p5 = scmp.ne.s32.totalorder %s138_s30, %s4753_s22  ;;  %p4758_p6 = scmp.lt.s32.totalorder %s138_s30, %s138_s30 }
  0xd7   :  { %p4759_p7 = scmp.lt.s32.totalorder %s4757_s26, %s4753_s22 }
  0xd9   :  { %p4760_p8 = por %p4759_p7, %p4758_p6 }
  0xdb   :  { %p4761_p9 = pnand %p4760_p8, %p4754_p5 }
  0xdd   :  { %4764 = shalt.err (!%p4761_p9)
}
  0xde   :  { %140 = dma.hbm_to_vmem [thread:$0]  %s5052_s14, 16, %s138_s30, [#allocation10]  }
  0xdf   :  { %s4982_s1 = smov [#allocation14]   ;;  %s4983_s28 = smov [#allocation17]  }
  0xe0   :  { %s163_s25 = sshll.u32 %s4982_s1, 4  ;;  %s185_s27 = sshll.u32 %s4983_s28, 4  ;;  %s164_s25 = int_to_ptr.vmem [resolvable:$true] %s163_s25  ;;  %s186_s27 = int_to_ptr.vmem [resolvable:$true] %s185_s27 }
  0xe1   :  { %s4765_s13 = scalar_lea.hbm %s5072_s6, 16 }
  0xe2   :  { %p4766_p10 = scmp.ne.s32.totalorder %s5072_s6, %s4765_s13  ;;  %p4769_p11 = scmp.lt.u32.totalorder %s4765_s13, %s5072_s6 }
  0xe4   :  { %p4771_p12 = pnand %p4769_p11, %p4766_p10 }
  0xe6   :  { %4774 = shalt.err (!%p4771_p12)
}
  0xe7   :  { %s4775_s3 = scalar_lea.vmem %s164_s25, 16  ;;  %s4779_s2 = scalar_lea.vmem %s164_s25, 32 }
  0xe8   :  { %p4776_p13 = scmp.ne.s32.totalorder %s164_s25, %s4775_s3  ;;  %p4780_p0 = scmp.lt.s32.totalorder %s164_s25, %s164_s25 }
  0xe9   :  { %p4781_p1 = scmp.lt.s32.totalorder %s4779_s2, %s4775_s3 }
  0xeb   :  { %p4782_p2 = por %p4781_p1, %p4780_p0 }
  0xed   :  { %p4783_p3 = pnand %p4782_p2, %p4776_p13 }
  0xef   :  { %4786 = shalt.err (!%p4783_p3)
}
  0xf0   :  { %166 = dma.hbm_to_vmem [thread:$0]  %s5072_s6, 16, %s164_s25, [#allocation13]  }
  0xf1   :  { %s4787_s14 = scalar_lea.hbm %s5082_s20, 16 }
  0xf2   :  { %p4788_p4 = scmp.ne.s32.totalorder %s5082_s20, %s4787_s14  ;;  %p4791_p5 = scmp.lt.u32.totalorder %s4787_s14, %s5082_s20 }
  0xf4   :  { %p4793_p6 = pnand %p4791_p5, %p4788_p4 }
  0xf6   :  { %4796 = shalt.err (!%p4793_p6)
}
  0xf7   :  { %s4797_s8 = scalar_lea.vmem %s186_s27, 16  ;;  %s4801_s7 = scalar_lea.vmem %s186_s27, 32 }
  0xf8   :  { %p4798_p7 = scmp.ne.s32.totalorder %s186_s27, %s4797_s8  ;;  %p4802_p8 = scmp.lt.s32.totalorder %s186_s27, %s186_s27 }
  0xf9   :  { %p4803_p9 = scmp.lt.s32.totalorder %s4801_s7, %s4797_s8 }
  0xfb   :  { %p4804_p10 = por %p4803_p9, %p4802_p8 }
  0xfd   :  { %p4805_p11 = pnand %p4804_p10, %p4798_p7 }
  0xff   :  { %4808 = shalt.err (!%p4805_p11)
}
 0x100   :  { %188 = dma.hbm_to_vmem [thread:$0]  %s5082_s20, 16, %s186_s27, [#allocation16]  }
 0x101   :  { %s4984_s0 = smov [#allocation20]   ;;  %s4985_s21 = smov [#allocation23]  }
 0x102   :  { %s207_s6 = sshll.u32 %s4984_s0, 4  ;;  %s229_s16 = sshll.u32 %s4985_s21, 4  ;;  %s208_s6 = int_to_ptr.vmem [resolvable:$true] %s207_s6  ;;  %s230_s16 = int_to_ptr.vmem [resolvable:$true] %s229_s16 }
 0x103   :  { %s4809_s30 = scalar_lea.hbm %s5092_s4, 16 }
 0x104   :  { %p4810_p12 = scmp.ne.s32.totalorder %s5092_s4, %s4809_s30  ;;  %p4813_p13 = scmp.lt.u32.totalorder %s4809_s30, %s5092_s4 }
 0x106   :  { %p4815_p0 = pnand %p4813_p13, %p4810_p12 }
 0x108   :  { %4818 = shalt.err (!%p4815_p0)
}
 0x109   :  { %s4819_s18 = scalar_lea.vmem %s208_s6, 16  ;;  %s4823_s12 = scalar_lea.vmem %s208_s6, 32 }
 0x10a   :  { %p4820_p1 = scmp.ne.s32.totalorder %s208_s6, %s4819_s18  ;;  %p4824_p2 = scmp.lt.s32.totalorder %s208_s6, %s208_s6 }
 0x10b   :  { %p4825_p3 = scmp.lt.s32.totalorder %s4823_s12, %s4819_s18 }
 0x10d   :  { %p4826_p4 = por %p4825_p3, %p4824_p2 }
 0x10f   :  { %p4827_p5 = pnand %p4826_p4, %p4820_p1 }
 0x111   :  { %4830 = shalt.err (!%p4827_p5)
}
 0x112   :  { %210 = dma.hbm_to_vmem [thread:$0]  %s5092_s4, 16, %s208_s6, [#allocation19]  }
 0x113   :  { %s4831_s20 = scalar_lea.hbm %s5102_s29, 16 }
 0x114   :  { %p4832_p6 = scmp.ne.s32.totalorder %s5102_s29, %s4831_s20  ;;  %p4835_p7 = scmp.lt.u32.totalorder %s4831_s20, %s5102_s29 }
 0x116   :  { %p4837_p8 = pnand %p4835_p7, %p4832_p6 }
 0x118   :  { %4840 = shalt.err (!%p4837_p8)
}
 0x119   :  { %s4841_s23 = scalar_lea.vmem %s230_s16, 16  ;;  %s4845_s5 = scalar_lea.vmem %s230_s16, 32 }
 0x11a   :  { %p4842_p9 = scmp.ne.s32.totalorder %s230_s16, %s4841_s23  ;;  %p4846_p10 = scmp.lt.s32.totalorder %s230_s16, %s230_s16 }
 0x11b   :  { %p4847_p11 = scmp.lt.s32.totalorder %s4845_s5, %s4841_s23 }
 0x11d   :  { %p4848_p12 = por %p4847_p11, %p4846_p10 }
 0x11f   :  { %p4849_p13 = pnand %p4848_p12, %p4842_p9 }
 0x121   :  { %4852 = shalt.err (!%p4849_p13)
}
 0x122   :  { %s6354_s22 = sld [smem:[#allocation47_spill]]  ;;  %s4986_s26 = smov [#allocation26]  }
 0x123   :  { %232 = dma.hbm_to_vmem [thread:$0]  %s5102_s29, 16, %s230_s16, [#allocation22]  }
 0x124   :  { %s251_s4 = sshll.u32 %s4986_s26, 4  ;;  %s4987_s1 = smov [#allocation27]   ;;  %s252_s4 = int_to_ptr.vmem [resolvable:$true] %s251_s4 }
 0x125   :  { %s264_s25 = sshll.u32 %s4987_s1, 4  ;;  %s5229_s25 = int_to_ptr.vmem [resolvable:$true] %s264_s25 }
 0x128   :  { %s4853_s28 = scalar_lea.hbm %s6354_s22, 16 }
 0x129   :  { %p4854_p0 = scmp.ne.s32.totalorder %s6354_s22, %s4853_s28  ;;  %p4857_p1 = scmp.lt.u32.totalorder %s4853_s28, %s6354_s22 }
 0x12b   :  { %p4859_p2 = pnand %p4857_p1, %p4854_p0 }
 0x12d   :  { %4862 = shalt.err (!%p4859_p2)
}
 0x12e   :  { %s4863_s27 = scalar_lea.vmem %s252_s4, 16  ;;  %s4867_s13 = scalar_lea.vmem %s252_s4, 32 }
 0x12f   :  { %p4864_p3 = scmp.ne.s32.totalorder %s252_s4, %s4863_s27  ;;  %p4868_p4 = scmp.lt.s32.totalorder %s252_s4, %s252_s4 }
 0x130   :  { %p4869_p5 = scmp.lt.s32.totalorder %s4867_s13, %s4863_s27 }
 0x132   :  { %p4870_p6 = por %p4869_p5, %p4868_p4 }
 0x134   :  { %p4871_p7 = pnand %p4870_p6, %p4864_p3 }
 0x136   :  { %4874 = shalt.err (!%p4871_p7)
}
 0x137   :  { %s6355_s29 = sld [smem:[#allocation50_spill]] }
 0x138   :  { %254 = dma.hbm_to_vmem [thread:$0]  %s6354_s22, 16, %s252_s4, [#allocation25]  }
 0x13d   :  { %s4875_s3 = scalar_lea.hbm %s6355_s29, 1024 }
 0x13e   :  { %p4876_p8 = scmp.ne.s32.totalorder %s6355_s29, %s4875_s3  ;;  %p4879_p9 = scmp.lt.u32.totalorder %s4875_s3, %s6355_s29 }
 0x140   :  { %p4881_p10 = pnand %p4879_p9, %p4876_p8 }
 0x142   :  { %4884 = shalt.err (!%p4881_p10)
}
 0x143   :  { %s4885_s2 = scalar_lea.vmem %s5229_s25, 1024  ;;  %p4890_p12 = scmp.lt.s32.totalorder %s5229_s25, %s5229_s25 }
 0x144   :  { %p4886_p11 = scmp.ne.s32.totalorder %s5229_s25, %s4885_s2  ;;  %p4891_p13 = scmp.lt.s32.totalorder %s4885_s2, %s4885_s2 }
 0x146   :  { %p4892_p0 = por %p4891_p13, %p4890_p12 }
 0x148   :  { %p4893_p1 = pnand %p4892_p0, %p4886_p11 }
 0x14a   :  { %4896 = shalt.err (!%p4893_p1)
}
 0x14b   :  { %270 = dma.hbm_to_vmem [thread:$0]  %s6355_s29, 1024, %s5229_s25, [#allocation28], %s4969_s11, %s4969_s11, %s4970_s15  }
 0x14c   :  { %4919 = dma.done.wait [#allocation4], 2048  }
 0x14d   :  { %4920 = vsyncadd [#allocation4], 4294965248 }
 0x14e   :  { %4921 = dma.done.wait [#allocation7], 208  }
 0x14f   :  { %4922 = vsyncadd [#allocation7], 4294967088 }
 0x150   :  { %4923 = dma.done.wait [#allocation10], 32  }
 0x151   :  { %4924 = vsyncadd [#allocation10], 4294967264 }
 0x152   :  { %4925 = dma.done.wait [#allocation13], 1040  }
 0x153   :  { %4926 = vsyncadd [#allocation13], 4294966256 }
 0x154   :  { %4927 = dma.done.wait [#allocation16], 1040  }
 0x155   :  { %4928 = vsyncadd [#allocation16], 4294966256 }
 0x156   :  { %4929 = dma.done.wait [#allocation19], 1040  }
 0x157   :  { %4930 = vsyncadd [#allocation19], 4294966256 }
 0x158   :  { %4931 = dma.done.wait [#allocation22], 1040  }
 0x159   :  { %4932 = vsyncadd [#allocation22], 4294966256 }
 0x15a   :  { %4933 = dma.done.wait [#allocation25], 1040  }
 0x15b   :  { %4934 = vsyncadd [#allocation25], 4294966256 }
 0x15c   :  { %4935 = dma.done.wait [#allocation28], 1024  }
 0x15d   :  { %4936 = vsyncadd [#allocation28], 4294966272  ;;  %s6356_s14 = sld [smem:[#allocation41_spill]]  ;;  %s6357_s11 = sld [smem:[#allocation42_spill]]  ;;  %v4988_v1 = vmov 0   ;;  %v1159_v6 = vld [vmem:[#allocation3] sm:$0xff]  ;;  %v6311_v53 = vlaneseq }
 0x15e   :  { %4355 = vset.pattern.permute.xlu1 %v4988_v1  ;;  %4354 = vset.pattern.permute.xlu0 %v4988_v1  ;;  %s6358_s15 = sld [smem:[#allocation40_spill]]  ;;  %v1160_v7 = vld [vmem:[#allocation3 + $0x8] sm:$0xff]  ;;  %v1161_v8 = vld [vmem:[#allocation3 + $0x10] sm:$0xff]  ;;  %v1162_v10 = vld [vmem:[#allocation3 + $0x18] sm:$0xff]  ;;  %s6359_s8 = sld [smem:[#allocation46_spill]] }
 0x15f   :  { %v5251_v9 = vpack.c.bf16 %v1160_v7, %v1159_v6  ;;  %v5253_v11 = vpack.c.bf16 %v1162_v10, %v1161_v8  ;;  %v1163_v12 = vld [vmem:[#allocation3 + $0x20] sm:$0xff]  ;;  %v1164_v13 = vld [vmem:[#allocation3 + $0x28] sm:$0xff]  ;;  %v1165_v16 = vld [vmem:[#allocation3 + $0x30] sm:$0xff]  ;;  %s6360_s7 = sld [smem:[#allocation45_spill]]  ;;  %v5306_v54 = vand.u32 127, %v6311_v53  ;;  %s6411_s0 = sld [smem:[#allocation43_spill]] }
 0x160   :  { %v5262_v19 = vpack.c.bf16 %v1164_v13, %v1163_v12  ;;  %v1166_v20 = vld [vmem:[#allocation3 + $0x38] sm:$0xff]  ;;  %v1167_v22 = vld [vmem:[#allocation3 + $0x40] sm:$0xff]  ;;  %v1168_v23 = vld [vmem:[#allocation3 + $0x48] sm:$0xff]  ;;  %v6309_v61 = vmov 1.0|1.0   ;;  %s6412_s6 = sld [smem:[#allocation44_spill]] }
 0x161   :  { %3732 = vmatprep.subr.bf16.mxu1 %v5251_v9  ;;  %v5266_v21 = vpack.c.bf16 %v1166_v20, %v1165_v16  ;;  %v1169_v25 = vld [vmem:[#allocation3 + $0x50] sm:$0xff]  ;;  %v1170_v26 = vld [vmem:[#allocation3 + $0x58] sm:$0xff]  ;;  %v5271_v27 = vpack.c.bf16 %v1168_v23, %v1167_v22  ;;  %v1171_v28 = vld [vmem:[#allocation3 + $0x60] sm:$0xff]  ;;  %6361 = vst [vmem:[#allocation52_spill] sm:$0xff] %v5306_v54  ;;  %s6426_s21 = sld [smem:[#allocation48_spill]]  ;;  %s6427_s16 = sld [smem:[#allocation49_spill]] }
 0x162   :  { %3733 = vmatpush3.bf16.msra.mxu1 %v5251_v9  ;;  %v1172_v29 = vld [vmem:[#allocation3 + $0x68] sm:$0xff]  ;;  %v5275_v30 = vpack.c.bf16 %v1170_v26, %v1169_v25  ;;  %v1173_v31 = vld [vmem:[#allocation3 + $0x70] sm:$0xff]  ;;  %v1174_v32 = vld [vmem:[#allocation3 + $0x78] sm:$0xff]  ;;  %s6428_s30 = sld [smem:[#allocation51_spill]]  ;;  %s4998_s18 = smov [#allocation29]  }
 0x163   :  { %v345_v2 = vld [vmem:[%s6356_s14 + $0x10] sm:$0xff]  ;;  %v343_v3 = vld [vmem:[%s6356_s14] sm:$0xff]  ;;  %v344_v4 = vld [vmem:[%s6356_s14 + $0x8] sm:$0xff]  ;;  %3734 = vmatprep.subr.bf16.mxu1 %v5253_v11  ;;  %v5279_v33 = vpack.c.bf16 %v1172_v29, %v1171_v28  ;;  %v5283_v34 = vpack.c.bf16 %v1174_v32, %v1173_v31  ;;  %s3239_s12 = sshll.u32 %s4998_s18, 4  ;;  %s3240_s12 = int_to_ptr.vmem [resolvable:$true] %s3239_s12 }
 0x164   :  { %353 = vperm.xlu1 %4355, %v345_v2   ;;  %347 = vperm.xlu0 %4354, %v343_v3   ;;  %v328_v5 = vld [vmem:[%s6357_s11] sm:$0xff]  ;;  %v329_v14 = vld [vmem:[%s6357_s11 + $0x8] sm:$0xff]  ;;  %v330_v15 = vld [vmem:[%s6357_s11 + $0x10] sm:$0xff]  ;;  %s4897_s20 = scalar_lea.vmem %s3240_s12, 2048  ;;  %p4902_p3 = scmp.lt.s32.totalorder %s3240_s12, %s3240_s12 }
 0x165   :  { %v452_v17 = vld [vmem:[%s6358_s15] sm:$0xff]  ;;  %v453_v18 = vld [vmem:[%s6358_s15 + $0x8] sm:$0xff]  ;;  %v454_v24 = vld [vmem:[%s6358_s15 + $0x10] sm:$0xff]  ;;  %p4898_p2 = scmp.ne.s32.totalorder %s3240_s12, %s4897_s20  ;;  %p4903_p4 = scmp.lt.s32.totalorder %s4897_s20, %s4897_s20 }
 0x166   :  { %3735 = vmatpush3.bf16.msra.mxu1 %v5253_v11  ;;  %v4356_v35 = vld [vmem:[%s6359_s8] sm:$0xff]   ;;  %v4357_v36 = vld [vmem:[%s6359_s8 + $0x8] sm:$0xff]   ;;  %v4358_v37 = vld [vmem:[%s6359_s8 + $0x10] sm:$0xff]  }
 0x167   :  { %3736 = vmatprep.subr.bf16.mxu1 %v5262_v19  ;;  %3692 = vmatprep.subr.bf16.mxu0 %v4356_v35  ;;  %v4359_v38 = vld [vmem:[%s6359_s8 + $0x18] sm:$0xff]   ;;  %v4360_v39 = vld [vmem:[%s6359_s8 + $0x20] sm:$0xff]   ;;  %v4361_v40 = vld [vmem:[%s6359_s8 + $0x28] sm:$0xff]   ;;  %p4904_p5 = por %p4903_p4, %p4902_p3 }
 0x168   :  { %350 = vperm.xlu0 %4354, %v344_v4   ;;  %332 = vperm.xlu1 %4355, %v328_v5   ;;  %v4362_v41 = vld [vmem:[%s6359_s8 + $0x30] sm:$0xff]   ;;  %v4363_v42 = vld [vmem:[%s6359_s8 + $0x38] sm:$0xff]   ;;  %v4364_v43 = vld [vmem:[#allocation6] sm:$0xff]  }
 0x169   :  { %3693 = vmatpush3.bf16.msra.mxu0 %v4356_v35  ;;  %v4365_v44 = vld [vmem:[%s6360_s7] sm:$0xff]   ;;  %v4366_v45 = vld [vmem:[#allocation6 + $0x8] ss:$0 sps:$4 sm:$0xff]   ;;  %3708 = vmatprep.mubr.bf16.mxu0 %v4364_v43  ;;  %v4368_v47 = vld [vmem:[%s6360_s7 + $0x10] sm:$0xff]   ;;  %p4905_p6 = pnand %p4904_p5, %p4898_p2 }
 0x16a   :  { %3737 = vmatpush3.bf16.msra.mxu1 %v5262_v19  ;;  %3694 = vmatprep.subr.bf16.mxu0 %v4357_v36  ;;  %v4367_v46 = vld [vmem:[%s6360_s7 + $0x8] sm:$0xff]   ;;  %v4369_v48 = vld [vmem:[%s6360_s7 + $0x18] sm:$0xff]   ;;  %v4370_v49 = vld [vmem:[%s6360_s7 + $0x20] sm:$0xff]  }
 0x16b   :  { %3738 = vmatprep.subr.bf16.mxu1 %v5266_v21  ;;  %v4371_v50 = vld [vmem:[%s6360_s7 + $0x28] sm:$0xff]   ;;  %v4372_v51 = vld [vmem:[%s6360_s7 + $0x30] sm:$0xff]   ;;  %v4373_v52 = vld [vmem:[%s6360_s7 + $0x38] sm:$0xff]  }
 0x16c   :  { %335 = vperm.xlu0 %4354, %v329_v14   ;;  %338 = vperm.xlu1 %4355, %v330_v15   ;;  %v3315_v2 = vld [vmem:[#allocation9] ss:$0 sm:$0xff]  ;;  %v3316_v3 = vld [vmem:[#allocation11] ss:$0 sm:$0xff]  ;;  %v4543_v59 = vld [vmem:[#allocation12] sm:$0xff]  }
 0x16d   :  { %3695 = vmatpush3.bf16.msra.mxu0 %v4357_v36 }
 0x16e   :  { %3739 = vmatpush3.bf16.msra.mxu1 %v5266_v21  ;;  %3696 = vmatprep.subr.bf16.mxu0 %v4358_v37 }
 0x16f   :  { %3740 = vmatprep.subr.bf16.mxu1 %v5271_v27 }
 0x170   :  { %458 = vperm.xlu0 %4354, %v452_v17   ;;  %463 = vperm.xlu1 %4355, %v453_v18  }
 0x171   :  { %3697 = vmatpush3.bf16.msra.mxu0 %v4358_v37 }
 0x172   :  { %3741 = vmatpush3.bf16.msra.mxu1 %v5271_v27  ;;  %3698 = vmatprep.subr.bf16.mxu0 %v4359_v38 }
 0x173   :  { %3742 = vmatprep.subr.bf16.mxu1 %v5275_v30 }
 0x174   :  { %468 = vperm.xlu0 %4354, %v454_v24  }
 0x175   :  { %3699 = vmatpush3.bf16.msra.mxu0 %v4359_v38 }
 0x176   :  { %3743 = vmatpush3.bf16.msra.mxu1 %v5275_v30  ;;  %3700 = vmatprep.subr.bf16.mxu0 %v4360_v39 }
 0x177   :  { %3744 = vmatprep.subr.bf16.mxu1 %v5279_v33 }
 0x179   :  { %3701 = vmatpush3.bf16.msra.mxu0 %v4360_v39 }
 0x17a   :  { %3745 = vmatpush3.bf16.msra.mxu1 %v5279_v33  ;;  %3702 = vmatprep.subr.bf16.mxu0 %v4361_v40 }
 0x17b   :  { %3746 = vmatprep.subr.bf16.mxu1 %v5283_v34 }
 0x17d   :  { %3703 = vmatpush3.bf16.msra.mxu0 %v4361_v40 }
 0x17e   :  { %3747 = vmatpush3.bf16.msra.mxu1 %v5283_v34  ;;  %3704 = vmatprep.subr.bf16.mxu0 %v4362_v41 }
 0x17f   :  { %3752 = vmatprep.subr.bf16.mxu1 %v5251_v9 }
 0x181   :  { %3705 = vmatpush3.bf16.msra.mxu0 %v4362_v41 }
 0x182   :  { %3706 = vmatprep.subr.bf16.mxu0 %v4363_v42 }
 0x185   :  { %3707 = vmatpush3.bf16.msra.mxu0 %v4363_v42 }
 0x186   :  { %3712 = vmatprep.subr.bf16.mxu0 %v4365_v44 }
 0x188   :  { %3709 = vmatmul.mubr.bf16.vlgmr.msra.gmra.mrb[0].mxu0 %v4366_v45 }
 0x189   :  { %3713 = vmatpush3.bf16.msra.mxu0 %v4365_v44 }
 0x18a   :  { %3714 = vmatprep.subr.bf16.mxu0 %v4367_v46 }
 0x18d   :  { %3715 = vmatpush3.bf16.msra.mxu0 %v4367_v46 }
 0x18e   :  { %3716 = vmatprep.subr.bf16.mxu0 %v4368_v47 }
 0x191   :  { %3717 = vmatpush3.bf16.msra.mxu0 %v4368_v47 }
 0x192   :  { %3718 = vmatprep.subr.bf16.mxu0 %v4369_v48 }
 0x195   :  { %3719 = vmatpush3.bf16.msra.mxu0 %v4369_v48 }
 0x196   :  { %3720 = vmatprep.subr.bf16.mxu0 %v4370_v49 }
 0x199   :  { %3721 = vmatpush3.bf16.msra.mxu0 %v4370_v49  ;;  %v4990_v49 = vmov 683565275  }
 0x19a   :  { %3722 = vmatprep.subr.bf16.mxu0 %v4371_v50 }
 0x19d   :  { %3723 = vmatpush3.bf16.msra.mxu0 %v4371_v50 }
 0x19e   :  { %3724 = vmatprep.subr.bf16.mxu0 %v4372_v51 }
 0x1a1   :  { %3725 = vmatpush3.bf16.msra.mxu0 %v4372_v51  ;;  %v4991_v51 = vmov 2475754826  }
 0x1a2   :  { %3726 = vmatprep.subr.bf16.mxu0 %v4373_v52 }
 0x1a5   :  { %3727 = vmatpush3.bf16.msra.mxu0 %v4373_v52 }
 0x1e3   :  { %v354_v55 = vpop.permute.xlu1 %353  ;;  %v348_v56 = vpop.permute.xlu0 %347 }
 0x1e4   :  { %vm357_vm0 = vcmp.eq.s32.totalorder %v5306_v54, %v354_v55  ;;  %vm355_vm2 = vcmp.eq.s32.totalorder %v5306_v54, %v348_v56  ;;  %v4992_v56 = vmov 2131351028  }
 0x1e5   :  { %vm5309_vm1 = vmpackc.low %vm357_vm0, %vm357_vm0 }
 0x1e7   :  { %v351_v57 = vpop.permute.xlu0 %350  ;;  %v333_v58 = vpop.permute.xlu1 %332 }
 0x1e8   :  { %vm356_vm3 = vcmp.eq.s32.totalorder %v5306_v54, %v351_v57  ;;  %vm5326_vm5 = vcmp.eq.s32.totalorder %v5306_v54, %v333_v58  ;;  %v4993_v58 = vmov 2102212464  }
 0x1e9   :  { %vm5315_vm4 = vmpackc.low %vm356_vm3, %vm355_vm2 }
 0x1ea   :  { %3748 = vmatprep.mubr.msk.bf16.mxu1 %vm5315_vm4, %v6309_v61 }
 0x1eb   :  { %3749 = vmatmul.mubr.msk.bf16.vlgmr.msra.gmra.mrb[0].mxu1 %vm5309_vm1, %v6309_v61  ;;  %v336_v62 = vpop.permute.xlu0 %335  ;;  %v339_v63 = vpop.permute.xlu1 %338 }
 0x1ec   :  { %3753 = vmatpush3.bf16.msra.mxu1 %v5251_v9  ;;  %vm5332_vm6 = vcmp.eq.s32.totalorder %v5306_v54, %v336_v62  ;;  %vm5372_vm10 = vcmp.eq.s32.totalorder %v5306_v54, %v339_v63  ;;  %v4994_v63 = vmov 920167782  }
 0x1ed   :  { %3754 = vmatprep.subr.bf16.mxu1 %v5253_v11  ;;  %vm3356_vm7 = vmpackc.low %vm5332_vm6, %vm5326_vm5 }
 0x1ee   :  { %3768 = vmatprep.mubr.msk.bf16.mxu1 %vm3356_vm7, %v6309_v61  ;;  %vm3358_vm15 = vmpackc.low %vm5372_vm10, %vm5372_vm10 }
 0x1ef   :  { %v459_v4 = vpop.permute.xlu0 %458  ;;  %v464_v5 = vpop.permute.xlu1 %463 }
 0x1f0   :  { %3755 = vmatpush3.bf16.msra.mxu1 %v5253_v11  ;;  %v477_v6 = vmul.f32 %v3315_v2, %v459_v4  ;;  %v478_v7 = vmul.f32 %v3315_v2, %v464_v5 }
 0x1f1   :  { %3756 = vmatprep.subr.bf16.mxu1 %v5262_v19 }
 0x1f2   :  { %v5349_v8 = vadd.f32 %v3316_v3, %v477_v6  ;;  %v5351_v10 = vadd.f32 %v3316_v3, %v478_v7 }
 0x1f3   :  { %v469_v12 = vpop.permute.xlu0 %468 }
 0x1f4   :  { %v490_v13 = vand.u32 2147483647, %v5349_v8  ;;  %v493_v14 = vand.u32 2139095040, %v5349_v8  ;;  %v593_v15 = vand.u32 2147483647, %v5351_v10  ;;  %3757 = vmatpush3.bf16.msra.mxu1 %v5262_v19  ;;  %v596_v16 = vand.u32 2139095040, %v5351_v10 }
 0x1f5   :  { %v479_v17 = vmul.f32 %v3315_v2, %v469_v12  ;;  %3758 = vmatprep.subr.bf16.mxu1 %v5266_v21  ;;  %v4995_v12 = vmov 1326507024  }
 0x1f6   :  { %v494_v18 = vshrl.u32 %v493_v14, 23  ;;  %v497_v20 = vand.u32 8388607, %v490_v13  ;;  %v597_v22 = vshrl.u32 %v596_v16, 23  ;;  %v600_v23 = vand.u32 8388607, %v593_v15 }
 0x1f7   :  { %v5363_v24 = vadd.f32 %v3316_v3, %v479_v17 }
 0x1f8   :  { %v3317_v25 = vadd.s32 4294967169, %v494_v18  ;;  %3759 = vmatpush3.bf16.msra.mxu1 %v5266_v21  ;;  %v3321_v26 = vadd.s32 4294967169, %v597_v22  ;;  %v498_v31 = vor.u32 8388608, %v497_v20  ;;  %v601_v32 = vor.u32 8388608, %v600_v23 }
 0x1f9   :  { %v699_v28 = vand.u32 2139095040, %v5363_v24  ;;  %3760 = vmatprep.subr.bf16.mxu1 %v5271_v27  ;;  %v696_v42 = vand.u32 2147483647, %v5363_v24 }
 0x1fa   :  { %v500_v29 = vadd.s32 1, %v3317_v25  ;;  %v603_v35 = vadd.s32 1, %v3321_v26  ;;  %v5376_v44 = vshll.u32 %v498_v31, 8  ;;  %v5382_v47 = vshll.u32 %v601_v32, 8  ;;  %v4374_v26 = vld [vmem:[#allocation15] sm:$0xff]  }
 0x1fb   :  { %v700_v36 = vshrl.u32 %v699_v28, 23 }
 0x1fc   :  { %vm501_vm8 = vcmp.gt.s32.totalorder %v500_v29, 0  ;;  %3761 = vmatpush3.bf16.msra.mxu1 %v5271_v27  ;;  %vm604_vm9 = vcmp.gt.s32.totalorder %v603_v35, 0 }
 0x1fd   :  { %v502_v37 = vsel %vm501_vm8, %v500_v29, 0  ;;  %v3325_v38 = vadd.s32 4294967169, %v700_v36  ;;  %3762 = vmatprep.subr.bf16.mxu1 %v5275_v30  ;;  %v605_v41 = vsel %vm604_vm9, %v603_v35, 0 }
 0x1fe   :  { %v503_v39 = vshrl.u32 %v502_v37, 5  ;;  %v504_v40 = vand.u32 31, %v502_v37  ;;  %v5378_v45 = vshrl.u32 %v605_v41, 5  ;;  %v5380_v46 = vand.u32 31, %v605_v41 }
 0x1ff   :  { %v5386_v55 = vadd.s32 1, %v3325_v38 }
 0x200   :  { %v505_v48 = vsub.s32 32, %v504_v40  ;;  %v507_v50 = vshll.u32 %v4990_v49, %v504_v40  ;;  %v510_v52 = vshll.u32 %v4991_v51, %v504_v40  ;;  %3763 = vmatpush3.bf16.msra.mxu1 %v5275_v30  ;;  %v513_v57 = vshll.u32 %v4992_v56, %v504_v40 }
 0x201   :  { %v516_v62 = vshll.u32 %v4993_v58, %v504_v40  ;;  %v519_v2 = vshll.u32 %v4994_v63, %v504_v40  ;;  %vm522_vm11 = vcmp.lt.s32.totalorder %v503_v39, 1  ;;  %3764 = vmatprep.subr.bf16.mxu1 %v5279_v33  ;;  %vm523_vm12 = vcmp.lt.s32.totalorder %v503_v39, 2 }
 0x202   :  { %v508_v3 = vshrl.u32 %v4991_v51, %v505_v48  ;;  %v511_v4 = vshrl.u32 %v4992_v56, %v505_v48  ;;  %v514_v5 = vshrl.u32 %v4993_v58, %v505_v48  ;;  %v506_v6 = vshrl.u32 %v4990_v49, %v505_v48 }
 0x203   :  { %v517_v7 = vshrl.u32 %v4994_v63, %v505_v48  ;;  %v520_v14 = vshrl.u32 %v4995_v12, %v505_v48  ;;  %vm524_vm13 = vcmp.lt.s32.totalorder %v503_v39, 3  ;;  %v608_v20 = vsub.s32 32, %v5380_v46 }
 0x204   :  { %v509_v16 = vor.u32 %v508_v3, %v507_v50  ;;  %v512_v17 = vor.u32 %v511_v4, %v510_v52  ;;  %v515_v18 = vor.u32 %v514_v5, %v513_v57  ;;  %3765 = vmatpush3.bf16.msra.mxu1 %v5279_v33  ;;  %vm525_vm14 = vcmp.lt.s32.totalorder %v503_v39, 4  ;;  %v4375_v3 = vld [vmem:[#allocation15 + $0x8] sm:$0xff]  }
 0x205   :  { %v518_v22 = vor.u32 %v517_v7, %v516_v62  ;;  %v521_v23 = vor.u32 %v520_v14, %v519_v2  ;;  %v610_v25 = vshll.u32 %v4990_v49, %v5380_v46  ;;  %3766 = vmatprep.subr.bf16.mxu1 %v5283_v34  ;;  %v613_v38 = vshll.u32 %v4991_v51, %v5380_v46 }
 0x206   :  { %v526_v28 = vsel %vm522_vm11, %v506_v6, %v509_v16  ;;  %v527_v29 = vsel %vm525_vm14, %v515_v18, 2102212464  ;;  %v530_v31 = vsel %vm522_vm11, %v509_v16, %v512_v17  ;;  %v534_v32 = vsel %vm522_vm11, %v512_v17, %v515_v18 }
 0x207   :  { %v528_v35 = vsel %vm524_vm13, %v512_v17, %v527_v29  ;;  %v531_v36 = vsel %vm525_vm14, %v518_v22, 920167782  ;;  %v535_v37 = vsel %vm525_vm14, %v521_v23, 1326507024  ;;  %v609_v48 = vshrl.u32 %v4990_v49, %v608_v20 }
 0x208   :  { %v532_v40 = vsel %vm524_vm13, %v515_v18, %v531_v36  ;;  %v536_v41 = vsel %vm524_vm13, %v518_v22, %v535_v37  ;;  %v611_v50 = vshrl.u32 %v4991_v51, %v608_v20  ;;  %3767 = vmatpush3.bf16.msra.mxu1 %v5283_v34  ;;  %v529_v52 = vsel %vm523_vm12, %v526_v28, %v528_v35 }
 0x209   :  { %v533_v57 = vsel %vm523_vm12, %v530_v31, %v532_v40  ;;  %v537_v62 = vsel %vm523_vm12, %v534_v32, %v536_v41  ;;  %v614_v2 = vshrl.u32 %v4992_v56, %v608_v20  ;;  %3792 = vmatprep.subr.bf16.mxu1 %v4374_v26  ;;  %v616_v16 = vshll.u32 %v4992_v56, %v5380_v46  ;;  %v4376_v31 = vld [vmem:[#allocation15 + $0x10] sm:$0xff]  }
 0x20a   :  { %v5420_v4 = vmul.u32.u64.low %v5376_v44, %v537_v62  ;;  %v5421_v5 = vmul.u32.u64.high %v5376_v44, %v537_v62, %v5420_v4  ;;  %v5424_v6 = vmul.u32.u64.low %v5376_v44, %v533_v57  ;;  %v5425_v7 = vmul.u32.u64.high %v5376_v44, %v533_v57, %v5424_v6  ;;  %v4377_v57 = vld [vmem:[#allocation15 + $0x18] sm:$0xff]  }
 0x20b   :  { %v612_v14 = vor.u32 %v611_v50, %v610_v25  ;;  %v615_v39 = vor.u32 %v614_v2, %v613_v38  ;;  %v617_v17 = vshrl.u32 %v4993_v58, %v608_v20  ;;  %3769 = vmatmul.mubr.msk.bf16.vlgmr.msra.gmra.mrb[4].mxu1 %vm3358_vm15, %v6309_v61  ;;  %v545_v18 = vmul.u32 %v5376_v44, %v529_v52 }
 0x20c   :  { %v619_v22 = vshll.u32 %v4993_v58, %v5380_v46  ;;  %v620_v23 = vshrl.u32 %v4994_v63, %v608_v20  ;;  %v623_v25 = vshrl.u32 %v4995_v12, %v608_v20  ;;  %3793 = vmatpush3.bf16.msra.mxu1 %v4374_v26  ;;  %v622_v29 = vshll.u32 %v4994_v63, %v5380_v46 }
 0x20d   :  { %v618_v28 = vor.u32 %v617_v17, %v616_v16  ;;  %vm625_vm0 = vcmp.lt.s32.totalorder %v5378_v45, 1  ;;  %vm626_vm2 = vcmp.lt.s32.totalorder %v5378_v45, 2  ;;  %3794 = vmatprep.subr.bf16.mxu1 %v4375_v3  ;;  %vm547_vm3 = vc.u32 %v5421_v5, %v5424_v6 }
 0x20e   :  { %v548_v44 = vadd.s32 1, %v5425_v7  ;;  %v621_v32 = vor.u32 %v620_v23, %v619_v22  ;;  %vm627_vm8 = vcmp.lt.s32.totalorder %v5378_v45, 3  ;;  %v624_v20 = vor.u32 %v623_v25, %v622_v29  ;;  %v4378_v25 = vld [vmem:[#allocation15 + $0x20] sm:$0xff]  }
 0x20f   :  { %vm628_vm9 = vcmp.lt.s32.totalorder %v5378_v45, 4  ;;  %v629_v26 = vsel %vm625_vm0, %v609_v48, %v612_v14  ;;  %v633_v35 = vsel %vm625_vm0, %v612_v14, %v615_v39  ;;  %v637_v38 = vsel %vm625_vm0, %v615_v39, %v618_v28 }
 0x210   :  { %v549_v46 = vsel %vm547_vm3, %v548_v44, %v5425_v7  ;;  %v630_v36 = vsel %vm628_vm9, %v618_v28, 2102212464  ;;  %v634_v37 = vsel %vm628_vm9, %v621_v32, 920167782  ;;  %3795 = vmatpush3.bf16.msra.mxu1 %v4375_v3  ;;  %v638_v52 = vsel %vm628_vm9, %v624_v20, 1326507024 }
 0x211   :  { %v550_v40 = vadd.s32 %v549_v46, %v545_v18  ;;  %v631_v41 = vsel %vm627_vm8, %v615_v39, %v630_v36  ;;  %v635_v50 = vsel %vm627_vm8, %v618_v28, %v634_v37  ;;  %3796 = vmatprep.subr.bf16.mxu1 %v4376_v31  ;;  %v639_v62 = vsel %vm627_vm8, %v621_v32, %v638_v52  ;;  %v5496_v36 = vld [vmem:[#allocation15 + $0x28] sm:$0xff]  }
 0x212   :  { %v636_v48 = vsel %vm626_vm2, %v633_v35, %v635_v50  ;;  %v703_v2 = vand.u32 8388607, %v696_v42  ;;  %vm707_vm11 = vcmp.gt.s32.totalorder %v5386_v55, 0  ;;  %v640_v4 = vsel %vm626_vm2, %v637_v38, %v639_v62 }
 0x213   :  { %v551_v3 = vadd.s32 536870912, %v550_v40  ;;  %v5469_v7 = vmul.u32.u64.low %v5382_v47, %v636_v48  ;;  %v5470_v14 = vmul.u32.u64.high %v5382_v47, %v636_v48, %v5469_v7  ;;  %v632_v39 = vsel %vm626_vm2, %v629_v26, %v631_v41 }
 0x214   :  { %v5476_v16 = vmul.u32.u64.low %v5382_v47, %v640_v4  ;;  %v5477_v17 = vmul.u32.u64.high %v5382_v47, %v640_v4, %v5476_v16  ;;  %v708_v18 = vsel %vm707_vm11, %v5386_v55, 0  ;;  %3797 = vmatpush3.bf16.msra.mxu1 %v4376_v31  ;;  %v704_v28 = vor.u32 8388608, %v703_v2 }
 0x215   :  { %v5480_v22 = vshrl.u32 %v551_v3, 30  ;;  %v710_v23 = vand.u32 31, %v708_v18  ;;  %3798 = vmatprep.subr.bf16.mxu1 %v4377_v57  ;;  %v648_v44 = vmul.u32 %v5382_v47, %v632_v39  ;;  %v651_v45 = vadd.s32 1, %v5470_v14 }
 0x216   :  { %vm650_vm12 = vc.u32 %v5477_v17, %v5469_v7  ;;  %v5487_v20 = vshrl.u32 %v708_v18, 5  ;;  %v744_v39 = vshll.u32 %v704_v28, 8  ;;  %vm492_vm11 = vcmp.lt.s32.totalorder %v5349_v8, 0 }
 0x217   :  { %v553_v29 = vshll.u32 %v5480_v22, 30  ;;  %v711_v32 = vsub.s32 32, %v710_v23  ;;  %v713_v55 = vshll.u32 %v4990_v49, %v710_v23  ;;  %v716_v31 = vshll.u32 %v4991_v51, %v710_v23 }
 0x218   :  { %3799 = vmatpush3.bf16.msra.mxu1 %v4377_v57  ;;  %v652_v35 = vsel %vm650_vm12, %v651_v45, %v5470_v14  ;;  %v719_v47 = vshll.u32 %v4992_v56, %v710_v23  ;;  %v722_v50 = vshll.u32 %v4993_v58, %v710_v23  ;;  %v725_v48 = vshll.u32 %v4994_v63, %v710_v23 }
 0x219   :  { %v5491_v26 = vsub.s32 %v550_v40, %v553_v29  ;;  %v714_v46 = vshrl.u32 %v4991_v51, %v711_v32  ;;  %3800 = vmatprep.subr.bf16.mxu1 %v4378_v25  ;;  %v653_v37 = vadd.s32 %v652_v35, %v648_v44  ;;  %v717_v38 = vshrl.u32 %v4992_v56, %v711_v32 }
 0x21a   :  { %v720_v41 = vshrl.u32 %v4993_v58, %v711_v32  ;;  %v723_v57 = vshrl.u32 %v4994_v63, %v711_v32  ;;  %v726_v3 = vshrl.u32 %v4995_v12, %v711_v32  ;;  %v712_v56 = vshrl.u32 %v4990_v49, %v711_v32  ;;  %v5508_v58 = vld [vmem:[#allocation15 + $0x30] sm:$0xff]  }
 0x21b   :  { %v556_v52 = vsub.s32 0, %v5491_v26  ;;  %v715_v40 = vor.u32 %v714_v46, %v713_v55  ;;  %v654_v51 = vadd.s32 536870912, %v653_v37  ;;  %v718_v62 = vor.u32 %v717_v38, %v716_v31 }
 0x21c   :  { %v721_v2 = vor.u32 %v720_v41, %v719_v47  ;;  %3801 = vmatpush3.bf16.msra.mxu1 %v4378_v25  ;;  %v724_v14 = vor.u32 %v723_v57, %v722_v50  ;;  %v727_v18 = vor.u32 %v726_v3, %v725_v48  ;;  %vm728_vm13 = vcmp.lt.s32.totalorder %v5487_v20, 1 }
 0x21d   :  { %v3318_v4 = vmin.u32 %v556_v52, %v5491_v26  ;;  %3802 = vmatprep.subr.bf16.mxu1 %v5496_v36  ;;  %v5510_v16 = vshrl.u32 %v654_v51, 30  ;;  %vm731_vm14 = vcmp.lt.s32.totalorder %v5487_v20, 4  ;;  %vm729_vm0 = vcmp.lt.s32.totalorder %v5487_v20, 2 }
 0x21e   :  { %v733_v12 = vsel %vm731_vm14, %v721_v2, 2102212464  ;;  %v736_v23 = vsel %vm728_vm13, %v715_v40, %v718_v62  ;;  %vm730_vm2 = vcmp.lt.s32.totalorder %v5487_v20, 3  ;;  %v737_v25 = vsel %vm731_vm14, %v724_v14, 920167782 }
 0x21f   :  { %v558_v63 = vclz %v3318_v4  ;;  %v656_v49 = vshll.u32 %v5510_v16, 30  ;;  %v740_v28 = vsel %vm728_vm13, %v718_v62, %v721_v2  ;;  %v732_v44 = vsel %vm728_vm13, %v712_v56, %v715_v40 }
 0x220   :  { %3803 = vmatpush3.bf16.msra.mxu1 %v5496_v36  ;;  %v738_v45 = vsel %vm730_vm2, %v721_v2, %v737_v25  ;;  %v741_v32 = vsel %vm731_vm14, %v727_v18, 1326507024  ;;  %v734_v31 = vsel %vm730_vm2, %v718_v62, %v733_v12  ;;  %vm5550_vm12 = vcmp.le.f32.partialorder %v490_v13, 0.7853982 }
 0x221   :  { %v3319_v29 = vadd.s32 4294967294, %v558_v63  ;;  %3804 = vmatprep.subr.bf16.mxu1 %v5508_v58  ;;  %v657_v55 = vsub.s32 %v653_v37, %v656_v49  ;;  %v739_v35 = vsel %vm729_vm0, %v736_v23, %v738_v45  ;;  %v742_v46 = vsel %vm730_vm2, %v724_v14, %v741_v32 }
 0x222   :  { %v743_v47 = vsel %vm729_vm0, %v740_v28, %v742_v46  ;;  %v5523_v38 = vmul.u32.u64.low %v744_v39, %v739_v35  ;;  %v5524_v41 = vmul.u32.u64.high %v744_v39, %v739_v35, %v5523_v38  ;;  %v546_v37 = vadd.s32 %v5424_v6, %v5421_v5 }
 0x223   :  { %vm3320_vm3 = vcmp.lt.s32.totalorder %v3319_v29, 0  ;;  %v659_v52 = vsub.s32 0, %v657_v55  ;;  %v5527_v40 = vmul.u32.u64.low %v744_v39, %v743_v47  ;;  %v5528_v57 = vmul.u32.u64.high %v744_v39, %v743_v47, %v5527_v40 }
 0x224   :  { %v561_v50 = vsel %vm3320_vm3, 0, %v3319_v29  ;;  %3805 = vmatpush3.bf16.msra.mxu1 %v5508_v58  ;;  %v735_v62 = vsel %vm729_vm0, %v732_v44, %v734_v31  ;;  %v754_v14 = vadd.s32 1, %v5524_v41  ;;  %v649_v44 = vadd.s32 %v5469_v7, %v5477_v17 }
 0x225   :  { %v562_v48 = vsub.s32 32, %v561_v50  ;;  %v566_v51 = vsub.s32 4294967266, %v561_v50  ;;  %v3322_v2 = vmin.u32 %v659_v52, %v657_v55  ;;  %v563_v3 = vshll.u32 %v5491_v26, %v561_v50 }
 0x226   :  { %v751_v63 = vmul.u32 %v744_v39, %v735_v62  ;;  %vm753_vm8 = vc.u32 %v5528_v57, %v5523_v38  ;;  %v576_v62 = vsub.s32 4, %v5480_v22  ;;  %vm595_vm13 = vcmp.lt.s32.totalorder %v5351_v10, 0 }
 0x227   :  { %v564_v4 = vshrl.u32 %v546_v37, %v562_v48  ;;  %v567_v56 = vadd.s32 127, %v566_v51  ;;  %v661_v18 = vclz %v3322_v2  ;;  %v755_v5 = vsel %vm753_vm8, %v754_v14, %v5524_v41 }
 0x228   :  { %v756_v49 = vadd.s32 %v755_v5, %v751_v63  ;;  %v577_v63 = vsel %vm492_vm11, %v576_v62, %v5480_v22  ;;  %vm5565_vm0 = vcmp.le.f32.partialorder %v593_v15, 0.7853982 }
 0x229   :  { %v565_v12 = vor.u32 %v564_v4, %v563_v3  ;;  %v568_v23 = vshll.u32 %v567_v56, 23  ;;  %v3323_v6 = vadd.s32 4294967294, %v661_v18 }
 0x22a   :  { %v757_v25 = vadd.s32 536870912, %v756_v49 }
 0x22b   :  { %v569_v20 = vor.u32 4788187, %v568_v23  ;;  %vm3324_vm9 = vcmp.lt.s32.totalorder %v3323_v6, 0  ;;  %v572_v26 = vcvt.s32.f32 %v565_v12  ;;  %v679_v12 = vsub.s32 4, %v5510_v16 }
 0x22c   :  { %v664_v29 = vsel %vm3324_vm9, 0, %v3323_v6  ;;  %v5542_v32 = vshrl.u32 %v757_v25, 30  ;;  %v752_v6 = vadd.s32 %v5523_v38, %v5528_v57  ;;  %vm582_vm9 = vweird.f32 %v5349_v8 }
 0x22d   :  { %v570_v28 = vand.u32 2147483647, %v569_v20  ;;  %v665_v45 = vsub.s32 32, %v664_v29  ;;  %v669_v39 = vsub.s32 4294967266, %v664_v29  ;;  %v666_v35 = vshll.u32 %v657_v55, %v664_v29 }
 0x22e   :  { %v759_v41 = vshll.u32 %v5542_v32, 30  ;;  %v579_v20 = vsel %vm5550_vm12, 0, %v577_v63  ;;  %v782_v63 = vsub.s32 4, %v5542_v32 }
 0x22f   :  { %v573_v31 = vmul.f32 %v572_v26, %v570_v28  ;;  %v667_v46 = vshrl.u32 %v649_v44, %v665_v45  ;;  %v670_v47 = vadd.s32 127, %v669_v39  ;;  %v680_v26 = vsel %vm595_vm13, %v679_v12, %v5510_v16 }
 0x230   :  { %v760_v37 = vsub.s32 %v756_v49, %v759_v41  ;;  %v583_v38 = vand.u32 3, %v579_v20  ;;  %v682_v57 = vsel %vm5565_vm0, 0, %v680_v26  ;;  %v5579_v41 = vld [vmem:[#allocation15 + $0x38] sm:$0xff]  }
 0x231   :  { %v574_v50 = vxor.u32 2147483648, %v573_v31  ;;  %v668_v52 = vor.u32 %v667_v46, %v666_v35  ;;  %v671_v40 = vshll.u32 %v670_v47, 23  ;;  %3806 = vmatprep.subr.bf16.mxu1 %v5579_v41  ;;  %v686_v16 = vand.u32 3, %v682_v57  ;;  %v5619_v57 = vld [vmem:[#allocation12 + $0x28] sm:$0xff]  }
 0x232   :  { %v762_v55 = vsub.s32 0, %v760_v37  ;;  %vm585_vm2 = vcmp.eq.s32.totalorder %v583_v38, 0  ;;  %vm588_vm3 = vcmp.eq.s32.totalorder %v583_v38, 2  ;;  %3807 = vmatpush3.bf16.msra.mxu1 %v5579_v41  ;;  %vm584_vm8 = vcmp.lt.s32.totalorder %v583_v38, 2  ;;  %v5611_v38 = vld [vmem:[#allocation12 + $0x18] sm:$0xff]  }
 0x233   :  { %v575_v48 = vsel %vm492_vm11, %v574_v50, %v573_v31  ;;  %v672_v17 = vor.u32 4788187, %v671_v40  ;;  %v675_v3 = vcvt.s32.f32 %v668_v52  ;;  %v4382_v50 = vld [vmem:[#allocation12] sm:$0xff]   ;;  %vm698_vm11 = vcmp.lt.s32.totalorder %v5363_v24, 0 }
 0x234   :  { %v578_v51 = vsel %vm5550_vm12, %v5349_v8, %v575_v48  ;;  %v3326_v4 = vmin.u32 %v762_v55, %v760_v37  ;;  %3772 = vmatprep.subr.bf16.mxu0 %v4382_v50  ;;  %vm691_vm12 = vcmp.eq.s32.totalorder %v686_v16, 2 }
 0x235   :  { %4430 = vcosq.f32 %v578_v51  ;;  %v673_v2 = vand.u32 2147483647, %v672_v17 }
 0x236   :  { %4432 = vsinq.f32 %v578_v51  ;;  %v764_v14 = vclz %v3326_v4 }
 0x237   :  { %v676_v56 = vmul.f32 %v675_v3, %v673_v2 }
 0x238   :  { %v3327_v13 = vadd.s32 4294967294, %v764_v14 }
 0x239   :  { %v677_v18 = vxor.u32 2147483648, %v676_v56 }
 0x23a   :  { %vm3328_vm14 = vcmp.lt.s32.totalorder %v3327_v13, 0 }
 0x23b   :  { %v678_v23 = vsel %vm595_vm13, %v677_v18, %v676_v56  ;;  %v767_v49 = vsel %vm3328_vm14, 0, %v3327_v13  ;;  %vm5587_vm13 = vcmp.le.f32.partialorder %v696_v42, 0.7853982  ;;  %vm687_vm14 = vcmp.lt.s32.totalorder %v686_v16, 2  ;;  %v5648_v56 = vld [vmem:[#allocation18 + $0x20] sm:$0xff]  }
 0x23c   :  { %v681_v22 = vsel %vm5565_vm0, %v5351_v10, %v678_v23  ;;  %v768_v25 = vsub.s32 32, %v767_v49  ;;  %v772_v28 = vsub.s32 4294967266, %v767_v49  ;;  %v769_v44 = vshll.u32 %v760_v37, %v767_v49  ;;  %6378 = vst [vmem:[#allocation53_spill] sm:$0xff] %v5648_v56 }
 0x23d   :  { %4434 = vcosq.f32 %v681_v22  ;;  %vm688_vm0 = vcmp.eq.s32.totalorder %v686_v16, 0 }
 0x23e   :  { %4436 = vsinq.f32 %v681_v22  ;;  %v770_v45 = vshrl.u32 %v752_v6, %v768_v25  ;;  %v773_v39 = vadd.s32 127, %v772_v28  ;;  %v783_v6 = vsel %vm698_vm11, %v782_v63, %v5542_v32  ;;  %v5604_v32 = vld [vmem:[#allocation12 + $0x8] sm:$0xff]  }
 0x23f   :  { %v4431_v15 = vpop.eup %4430  ;;  %v785_v49 = vsel %vm5587_vm13, 0, %v783_v6 }
 0x240   :  { %v4433_v29 = vpop.eup %4432  ;;  %v771_v31 = vor.u32 %v770_v45, %v769_v44  ;;  %v774_v35 = vshll.u32 %v773_v39, 23  ;;  %v589_v47 = vxor.u32 2147483648, %v4431_v15  ;;  %v789_v20 = vand.u32 3, %v785_v49  ;;  %v5607_v39 = vld [vmem:[#allocation12 + $0x10] sm:$0xff]  }
 0x241   :  { %v586_v46 = vxor.u32 2147483648, %v4433_v29 }
 0x242   :  { %v775_v52 = vor.u32 4788187, %v774_v35  ;;  %v778_v37 = vcvt.s32.f32 %v771_v31  ;;  %v590_v7 = vsel %vm588_vm3, %v589_v47, %v4433_v29  ;;  %vm794_vm3 = vcmp.eq.s32.totalorder %v789_v20, 2  ;;  %v5623_v31 = vld [vmem:[#allocation12 + $0x30] sm:$0xff]   ;;  %v5627_v35 = vld [vmem:[#allocation12 + $0x38] sm:$0xff]  }
 0x243   :  { %v587_v48 = vsel %vm585_vm2, %v4431_v15, %v586_v46  ;;  %vm685_vm2 = vweird.f32 %v5351_v10  ;;  %v5631_v46 = vld [vmem:[#allocation18] sm:$0xff]  }
 0x244   :  { %v776_v40 = vand.u32 2147483647, %v775_v52  ;;  %v591_v62 = vsel %vm584_vm8, %v587_v48, %v590_v7  ;;  %vm791_vm8 = vcmp.eq.s32.totalorder %v789_v20, 0 }
 0x245   :  { %v592_v8 = vsel %vm582_vm9, nan, %v591_v62  ;;  %vm790_vm9 = vcmp.lt.s32.totalorder %v789_v20, 2  ;;  %v3348_v20 = vld [vmem:[#allocation17] ss:$0 sm:$0xff] }
 0x246   :  { %v779_v55 = vmul.f32 %v778_v37, %v776_v40 }
 0x247   :  { %v4435_v17 = vpop.eup %4434 }
 0x248   :  { %v4437_v51 = vpop.eup %4436  ;;  %v692_v2 = vxor.u32 2147483648, %v4435_v17  ;;  %v780_v3 = vxor.u32 2147483648, %v779_v55 }
 0x249   :  { %v689_v4 = vxor.u32 2147483648, %v4437_v51 }
 0x24a   :  { %v693_v14 = vsel %vm691_vm12, %v692_v2, %v4437_v51  ;;  %v781_v18 = vsel %vm698_vm11, %v780_v3, %v779_v55  ;;  %vm788_vm12 = vweird.f32 %v5363_v24  ;;  %v5636_v2 = vld [vmem:[#allocation18 + $0x8] sm:$0xff]   ;;  %v5640_v3 = vld [vmem:[#allocation18 + $0x10] sm:$0xff]  }
 0x24b   :  { %v690_v13 = vsel %vm688_vm0, %v4435_v17, %v689_v4  ;;  %v784_v12 = vsel %vm5587_vm13, %v5363_v24, %v781_v18  ;;  %v5615_v24 = vld [vmem:[#allocation12 + $0x20] sm:$0xff]   ;;  %v5656_v18 = vld [vmem:[#allocation18 + $0x30] sm:$0xff]  }
 0x24c   :  { %v694_v42 = vsel %vm687_vm14, %v690_v13, %v693_v14  ;;  %4438 = vcosq.f32 %v784_v12  ;;  %v5644_v4 = vld [vmem:[#allocation18 + $0x18] sm:$0xff]   ;;  %v5652_v14 = vld [vmem:[#allocation18 + $0x28] sm:$0xff]   ;;  %6380 = vst [vmem:[#allocation55_spill] sm:$0xff] %v5656_v18  ;;  %vm1790_vm14 = vcmask 195584  }
 0x24d   :  { %v695_v23 = vsel %vm685_vm2, nan, %v694_v42  ;;  %4440 = vsinq.f32 %v784_v12  ;;  %6379 = vst [vmem:[#allocation54_spill] sm:$0xff] %v5652_v14 }
 0x24e   :  { %v799_v5 = vpack.c.bf16 %v695_v23, %v592_v8  ;;  %v5660_v8 = vld [vmem:[#allocation18 + $0x38] sm:$0xff]  }
 0x24f   :  { %6381 = vst [vmem:[#allocation56_spill] sm:$0xff] %v5660_v8 }
 0x250   :  { %3728 = vmatprep.mubr.bf16.mxu0 %v799_v5 }
 0x256   :  { %v4439_v22 = vpop.eup %4438 }
 0x257   :  { %v4441_v25 = vpop.eup %4440  ;;  %v795_v28 = vxor.u32 2147483648, %v4439_v22 }
 0x258   :  { %v792_v26 = vxor.u32 2147483648, %v4441_v25 }
 0x259   :  { %v796_v10 = vsel %vm794_vm3, %v795_v28, %v4441_v25 }
 0x25a   :  { %v793_v15 = vsel %vm791_vm8, %v4439_v22, %v792_v26  ;;  %v5674_v22 = vld [vmem:[#allocation14] ss:$0 sm:$0xff] }
 0x25b   :  { %v797_v29 = vsel %vm790_vm9, %v793_v15, %v796_v10  ;;  %6382 = vst [vmem:[#allocation57_spill] sm:$0xff] %v5674_v22 }
 0x25c   :  { %v798_v44 = vsel %vm788_vm12, nan, %v797_v29 }
 0x25d   :  { %v800_v45 = vpack.c.bf16 %v798_v44, %v798_v44 }
 0x25f   :  { %3729 = vmatmul.mubr.bf16.vlgmr.msra.gmra.mrb[0].mxu0 %v800_v45 }
 0x260   :  { %3773 = vmatpush3.bf16.msra.mxu0 %v4382_v50 }
 0x261   :  { %3774 = vmatprep.subr.bf16.mxu0 %v5604_v32 }
 0x264   :  { %3775 = vmatpush3.bf16.msra.mxu0 %v5604_v32 }
 0x265   :  { %3776 = vmatprep.subr.bf16.mxu0 %v5607_v39 }
 0x268   :  { %3777 = vmatpush3.bf16.msra.mxu0 %v5607_v39 }
 0x269   :  { %3778 = vmatprep.subr.bf16.mxu0 %v5611_v38 }
 0x26c   :  { %3779 = vmatpush3.bf16.msra.mxu0 %v5611_v38 }
 0x26d   :  { %3780 = vmatprep.subr.bf16.mxu0 %v5615_v24 }
 0x270   :  { %3781 = vmatpush3.bf16.msra.mxu0 %v5615_v24 }
 0x271   :  { %3782 = vmatprep.subr.bf16.mxu0 %v5619_v57 }
 0x274   :  { %3783 = vmatpush3.bf16.msra.mxu0 %v5619_v57 }
 0x275   :  { %3784 = vmatprep.subr.bf16.mxu0 %v5623_v31 }
 0x278   :  { %3785 = vmatpush3.bf16.msra.mxu0 %v5623_v31 }
 0x279   :  { %3786 = vmatprep.subr.bf16.mxu0 %v5627_v35 }
 0x27c   :  { %3787 = vmatpush3.bf16.msra.mxu0 %v5627_v35 }
 0x27d   :  { %3812 = vmatprep.subr.bf16.mxu0 %v5631_v46 }
 0x2be   :  { %v3750_v47 = vpop.f32.mrb[0].mxu1 }
 0x2bf   :  { %v1217_v50 = vpop.f32.mrb[1].mxu1  ;;  %v1232_v37 = vpack.c.bf16 %v3750_v47, %v3750_v47 }
 0x2c0   :  { %v3751_v52 = vpop.f32.mrb[2].mxu1 }
 0x2c1   :  { %v1220_v16 = vpop.f32.mrb[3].mxu1 }
 0x2c2   :  { %v1231_v40 = vpack.c.bf16 %v1220_v16, %v1217_v50 }
 0x2c4   :  { %3808 = vmatprep.mubr.bf16.mxu1 %v1231_v40 }
 0x2c5   :  { %3809 = vmatmul.mubr.bf16.vlgmr.msra.gmra.mrb[8].mxu1 %v1232_v37 }
 0x2c6   :  { %3848 = vmatprep.mubr.bf16.mxu1 %v5251_v9 }
 0x2de   :  { %v3770_v48 = vpop.f32.mrb[4].mxu1 }
 0x2df   :  { %v1267_v7 = vpop.f32.mrb[5].mxu1  ;;  %v1282_v62 = vpack.c.bf16 %v3770_v48, %v3770_v48 }
 0x2e0   :  { %v3771_v17 = vpop.f32.mrb[6].mxu1 }
 0x2e1   :  { %v1270_v55 = vpop.f32.mrb[7].mxu1 }
 0x2e2   :  { %v1281_v51 = vpack.c.bf16 %v1270_v55, %v1267_v7 }
 0x2e4   :  { %3788 = vmatprep.mubr.bf16.mxu0 %v1281_v51 }
 0x2e5   :  { %3789 = vmatmul.mubr.bf16.vlgmr.msra.gmra.mrb[4].mxu0 %v1282_v62 }
 0x2e6   :  { %3813 = vmatpush3.bf16.msra.mxu0 %v5631_v46  ;;  %3828 = vmatprep.mubr.bf16.mxu0 %v1231_v40 }
 0x2e7   :  { %3814 = vmatprep.subr.bf16.mxu0 %v5636_v2 }
 0x2ea   :  { %3815 = vmatpush3.bf16.msra.mxu0 %v5636_v2 }
 0x2eb   :  { %3816 = vmatprep.subr.bf16.mxu0 %v5640_v3 }
 0x2ee   :  { %3817 = vmatpush3.bf16.msra.mxu0 %v5640_v3 }
 0x2ef   :  { %3818 = vmatprep.subr.bf16.mxu0 %v5644_v4 }
 0x2f2   :  { %3819 = vmatpush3.bf16.msra.mxu0 %v5644_v4 }
 0x2f3   :  { %3820 = vmatprep.subr.bf16.mxu0 %v5648_v56 }
 0x2f6   :  { %3821 = vmatpush3.bf16.msra.mxu0 %v5648_v56 }
 0x2f7   :  { %3822 = vmatprep.subr.bf16.mxu0 %v5652_v14 }
 0x2fa   :  { %3823 = vmatpush3.bf16.msra.mxu0 %v5652_v14 }
 0x2fb   :  { %3824 = vmatprep.subr.bf16.mxu0 %v5656_v18 }
 0x2fe   :  { %3825 = vmatpush3.bf16.msra.mxu0 %v5656_v18 }
 0x2ff   :  { %3826 = vmatprep.subr.bf16.mxu0 %v5660_v8 }
 0x302   :  { %3827 = vmatpush3.bf16.msra.mxu0 %v5660_v8 }
 0x305   :  { %3829 = vmatmul.mubr.bf16.vlgmr.msra.gmra.mrb[8].mxu0 %v1232_v37 }
 0x306   :  { %3932 = vmatprep.mubr.msk.bf16.mxu0 %vm5315_vm4, %v6309_v61 }
 0x332   :  { %v5668_v13 = vpop.f32.mrb[0].mxu0 }
 0x333   :  { %v5670_v63 = vpop.f32.mrb[1].mxu0  ;;  %v5677_v25 = vadd.f32 %v5668_v13, %v3348_v20 }
 0x334   :  { %v3731_v12 = vpop.f32.mrb[2].mxu0  ;;  %v5680_v60 = vadd.f32 %v3348_v20, %v5670_v63 }
 0x335   :  { %v5672_v42 = vpop.f32.mrb[3].mxu0  ;;  %6383 = vst [vmem:[#allocation58_spill] sm:$0xff] %v5677_v25 }
 0x336   :  { %6384 = vst [vmem:[#allocation59_spill] sm:$0xff] %v5680_v60  ;;  %v5685_v29 = vadd.f32 %v3348_v20, %v5672_v42 }
 0x338   :  { %6385 = vst [vmem:[#allocation60_spill] sm:$0xff] %v5685_v29 }
 0x398   :  { %v3810_v23 = vpop.f32.mrb[8].mxu1 }
 0x399   :  { %v1461_v5 = vpop.f32.mrb[9].mxu1  ;;  %v1470_v26 = vadd.f32 %v3810_v23, %v5677_v25 }
 0x39a   :  { %v3811_v6 = vpop.f32.mrb[10].mxu1  ;;  %v1462_v44 = vadd.f32 %v1461_v5, %v5680_v60 }
 0x39b   :  { %v1464_v49 = vpop.f32.mrb[11].mxu1 }
 0x39c   :  { %v1465_v16 = vadd.f32 %v1464_v49, %v5685_v29 }
 0x3b8   :  { %v3790_v28 = vpop.f32.mrb[4].mxu0 }
 0x3b9   :  { %v1374_v10 = vadd.f32 %v3790_v28, %v5674_v22  ;;  %v1365_v15 = vpop.f32.mrb[5].mxu0 }
 0x3ba   :  { %v1366_v45 = vadd.f32 %v5674_v22, %v1365_v15  ;;  %v3791_v47 = vpop.f32.mrb[6].mxu0 }
 0x3bb   :  { %v1368_v50 = vpop.f32.mrb[7].mxu0  ;;  %v1573_v52 = vmul.f32 %v1470_v26, %v1374_v10 }
 0x3bc   :  { %v1369_v40 = vadd.f32 %v5674_v22, %v1368_v50  ;;  %v1571_v37 = vmul.f32 %v1462_v44, %v1366_v45 }
 0x3be   :  { %1574 = vadd.xlane.f32.xlu1 %v1571_v37  ;;  %v1572_v48 = vmul.f32 %v1465_v16, %v1369_v40 }
 0x3c0   :  { %1576 = vadd.xlane.f32.xlu0 %v1572_v48 }
 0x3c4   :  { %1578 = vadd.xlane.f32.xlu0 %v1573_v52 }
 0x3d8   :  { %v5691_v7 = vpop.f32.mrb[8].mxu0 }
 0x3d9   :  { %v5693_v17 = vpop.f32.mrb[9].mxu0 }
 0x3da   :  { %v3831_v55 = vpop.f32.mrb[10].mxu0 }
 0x3db   :  { %v5695_v51 = vpop.f32.mrb[11].mxu0  ;;  %v5709_v55 = vld [vmem:[#allocation21] sm:$0xff]  }
 0x3dc   :  { %3832 = vmatprep.subr.bf16.mxu1 %v5709_v55 }
 0x3dd   :  { %3833 = vmatpush3.bf16.msra.mxu1 %v5709_v55 }
 0x44b   :  { %v1575_v62 = vpop.xlane.xlu1 %1574 }
 0x44c   :  { %v1580_v23 = vmul.f32 0.17677669, %v1575_v62  ;;  %v5711_v62 = vld [vmem:[#allocation21 + $0x8] sm:$0xff]  }
 0x44d   :  { %v1577_v12 = vpop.xlane.xlu0 %1576  ;;  %3834 = vmatprep.subr.bf16.mxu1 %v5711_v62 }
 0x44e   :  { %v1581_v5 = vmul.f32 0.17677669, %v1577_v12  ;;  %v1583_v20 = vsel %vm5326_vm5, %v1580_v23, -1e+30  ;;  %v5716_v12 = vld [vmem:[#allocation21 + $0x10] sm:$0xff]   ;;  %3835 = vmatpush3.bf16.msra.mxu1 %v5711_v62 }
 0x44f   :  { %3836 = vmatprep.subr.bf16.mxu1 %v5716_v12 }
 0x450   :  { %v1584_v6 = vsel %vm5332_vm6, %v1581_v5, -1e+30 }
 0x451   :  { %v1579_v49 = vpop.xlane.xlu0 %1578  ;;  %v1586_v26 = vmax.f32 %v1583_v20, %v1584_v6  ;;  %v5720_v6 = vld [vmem:[#allocation21 + $0x18] sm:$0xff]   ;;  %v5728_v20 = vld [vmem:[#allocation21 + $0x28] sm:$0xff]  }
 0x452   :  { %v1582_v28 = vmul.f32 0.17677669, %v1579_v49  ;;  %3837 = vmatpush3.bf16.msra.mxu1 %v5716_v12  ;;  %v5724_v49 = vld [vmem:[#allocation21 + $0x20] sm:$0xff]  }
 0x453   :  { %3838 = vmatprep.subr.bf16.mxu1 %v5720_v6 }
 0x454   :  { %v1585_v10 = vsel %vm5372_vm10, %v1582_v28, -1e+30 }
 0x455   :  { %v1587_v15 = vmax.f32 %v1586_v26, %v1585_v10  ;;  %v5732_v26 = vld [vmem:[#allocation21 + $0x30] sm:$0xff]   ;;  %v5736_v10 = vld [vmem:[#allocation21 + $0x38] sm:$0xff]  }
 0x456   :  { %3839 = vmatpush3.bf16.msra.mxu1 %v5720_v6 }
 0x457   :  { %v1588_v44 = vrot.slane %v1587_v15, 4  ;;  %3840 = vmatprep.subr.bf16.mxu1 %v5724_v49 }
 0x459   :  { %v1589_v45 = vmax.f32 %v1587_v15, %v1588_v44 }
 0x45a   :  { %3841 = vmatpush3.bf16.msra.mxu1 %v5724_v49 }
 0x45b   :  { %v1590_v47 = vrot.slane %v1589_v45, 2  ;;  %3842 = vmatprep.subr.bf16.mxu1 %v5728_v20 }
 0x45d   :  { %v1591_v50 = vmax.f32 %v1589_v45, %v1590_v47 }
 0x45e   :  { %3843 = vmatpush3.bf16.msra.mxu1 %v5728_v20 }
 0x45f   :  { %v1592_v52 = vrot.slane %v1591_v50, 1  ;;  %3844 = vmatprep.subr.bf16.mxu1 %v5732_v26 }
 0x461   :  { %v1593_v16 = vmax.f32 %v1591_v50, %v1592_v52 }
 0x462   :  { %3845 = vmatpush3.bf16.msra.mxu1 %v5732_v26 }
 0x463   :  { %v1595_v40 = vsel %vm5332_vm6, %v1593_v16, -1e+30  ;;  %v1594_v37 = vsel %vm5326_vm5, %v1593_v16, -1e+30  ;;  %v1596_v48 = vsel %vm5372_vm10, %v1593_v16, -1e+30  ;;  %3846 = vmatprep.subr.bf16.mxu1 %v5736_v10 }
 0x464   :  { %1599 = vmax.xlane.f32.xlu0 %v1595_v40  ;;  %1597 = vmax.xlane.f32.xlu1 %v1594_v37 }
 0x466   :  { %3847 = vmatpush3.bf16.msra.mxu1 %v5736_v10 }
 0x468   :  { %1601 = vmax.xlane.f32.xlu1 %v1596_v48 }
 0x469   :  { %3849 = vmatmul.mubr.bf16.vlgmr.msra.gmra.mrb[12].mxu1 %v5253_v11 }
 0x46a   :  { %3852 = vmatprep.mubr.bf16.mxu1 %v5262_v19 }
 0x471   :  { %3853 = vmatmul.mubr.bf16.gmra.mrb[16].mxu1 %v5266_v21 }
 0x472   :  { %3856 = vmatprep.mubr.bf16.mxu1 %v5271_v27 }
 0x479   :  { %3857 = vmatmul.mubr.bf16.gmra.mrb[20].mxu1 %v5275_v30 }
 0x47a   :  { %3860 = vmatprep.mubr.bf16.mxu1 %v5279_v33 }
 0x481   :  { %3861 = vmatmul.mubr.bf16.gmra.mrb[24].mxu1 %v5283_v34 }
 0x4f1   :  { %v1600_v15 = vpop.xlane.xlu0 %1599  ;;  %v1598_v44 = vpop.xlane.xlu1 %1597 }
 0x4f2   :  { %v1604_v45 = vsub.f32 %v1581_v5, %v1600_v15  ;;  %v1603_v47 = vsub.f32 %v1580_v23, %v1598_v44 }
 0x4f4   :  { %v1607_v50 = vmin.f32 %v1604_v45, 0.0  ;;  %v1606_v52 = vmin.f32 %v1603_v47, 0.0 }
 0x4f5   :  { %v1602_v16 = vpop.xlane.xlu1 %1601 }
 0x4f6   :  { %v1611_v40 = vmul.f32 1.442695, %v1607_v50  ;;  %v1609_v37 = vmul.f32 1.442695, %v1606_v52  ;;  %v1605_v48 = vsub.f32 %v1582_v28, %v1602_v16 }
 0x4f8   :  { %4442 = vpow2.f32 %v1611_v40  ;;  %v1608_v61 = vmin.f32 %v1605_v48, 0.0 }
 0x4f9   :  { %4444 = vpow2.f32 %v1609_v37 }
 0x4fa   :  { %v1613_v53 = vmul.f32 1.442695, %v1608_v61 }
 0x4fc   :  { %4446 = vpow2.f32 %v1613_v53 }
 0x502   :  { %v5748_v54 = vpop.eup %4442 }
 0x503   :  { %v5750_v29 = vpop.eup %4444  ;;  %v1616_v5 = vsel %vm5332_vm6, %v5748_v54, 0.0 }
 0x504   :  { %v1615_v23 = vsel %vm5326_vm5, %v5750_v29, 0.0 }
 0x505   :  { %v1618_v28 = vadd.f32 %v1616_v5, %v1615_v23 }
 0x506   :  { %v5758_v15 = vpop.eup %4446 }
 0x507   :  { %v1617_v61 = vsel %vm5372_vm10, %v5758_v15, 0.0 }
 0x508   :  { %v1619_v53 = vadd.f32 %v1618_v28, %v1617_v61  ;;  %v6386_v28 = vlaneseq }
 0x50a   :  { %v1620_v44 = vrot.slane %v1619_v53, 4  ;;  %v375_v61 = vshrl.u32 %v6386_v28, 7 }
 0x50c   :  { %v1621_v45 = vadd.f32 %v1620_v44, %v1619_v53  ;;  %v376_v53 = vadd.s32 8, %v375_v61  ;;  %v3298_v44 = vld [vmem:[#allocation8] ss:$0 sm:$0xff]  ;;  %v380_v28 = vadd.s32 40, %v375_v61  ;;  %v382_v60 = vadd.s32 56, %v375_v61 }
 0x50d   :  { %vm396_vm4 = vcmp.eq.s32.totalorder %v375_v61, %v3298_v44  ;;  %v383_v22 = vadd.s32 64, %v375_v61  ;;  %v384_v25 = vadd.s32 72, %v375_v61  ;;  %v385_v8 = vadd.s32 80, %v375_v61 }
 0x50e   :  { %v1622_v47 = vrot.slane %v1621_v45, 2  ;;  %vm397_vm11 = vcmp.eq.s32.totalorder %v376_v53, %v3298_v44  ;;  %v381_v53 = vadd.s32 48, %v375_v61  ;;  %vm401_vm3 = vcmp.eq.s32.totalorder %v380_v28, %v3298_v44 }
 0x50f   :  { %vm403_vm9 = vcmp.eq.s32.totalorder %v382_v60, %v3298_v44  ;;  %vm404_vm12 = vcmp.eq.s32.totalorder %v383_v22, %v3298_v44  ;;  %v389_v18 = vadd.s32 112, %v375_v61  ;;  %v390_v14 = vadd.s32 120, %v375_v61 }
 0x510   :  { %v1623_v50 = vadd.f32 %v1622_v47, %v1621_v45  ;;  %v377_v45 = vadd.s32 16, %v375_v61  ;;  %v378_v47 = vadd.s32 24, %v375_v61  ;;  %vm402_vm8 = vcmp.eq.s32.totalorder %v381_v53, %v3298_v44 }
 0x512   :  { %v1624_v52 = vrot.slane %v1623_v50, 1  ;;  %vm398_vm13 = vcmp.eq.s32.totalorder %v377_v45, %v3298_v44  ;;  %vm399_vm0 = vcmp.eq.s32.totalorder %v378_v47, %v3298_v44 }
 0x514   :  { %v1625_v16 = vadd.f32 %v1624_v52, %v1623_v50  ;;  %v6326_v50 = vmov 0.0  }
 0x515   :  { %v3299_v52 = vsel %vm396_vm4, 1.0, %v6326_v50  ;;  %v3304_v47 = vsel %vm401_vm3, 1.0, %v6326_v50  ;;  %vm405_vm4 = vcmp.eq.s32.totalorder %v384_v25, %v3298_v44  ;;  %v3307_v60 = vsel %vm404_vm12, 1.0, %v6326_v50 }
 0x516   :  { %v1626_v40 = vadd.f32 1e-16, %v1625_v16  ;;  %v3300_v16 = vsel %vm397_vm11, 1.0, %v6326_v50  ;;  %vm406_vm11 = vcmp.eq.s32.totalorder %v385_v8, %v3298_v44  ;;  %vm410_vm3 = vcmp.eq.s32.totalorder %v389_v18, %v3298_v44 }
 0x517   :  { %v3309_v28 = vsel %vm406_vm11, 1.0, %v6326_v50  ;;  %v3313_v25 = vsel %vm410_vm3, 1.0, %v6326_v50 }
 0x518   :  { %4448 = vrcp.f32 %v1626_v40  ;;  %v3301_v40 = vsel %vm398_vm13, 1.0, %v6326_v50 }
 0x522   :  { %v4449_v37 = vpop.eup %4448 }
 0x523   :  { %v1629_v48 = vsel %vm5332_vm6, %v4449_v37, 0.0  ;;  %v1628_v5 = vsel %vm5326_vm5, %v4449_v37, 0.0  ;;  %v1630_v23 = vsel %vm5372_vm10, %v4449_v37, 0.0  ;;  %v5773_v37 = vpack.c.bf16 %v3300_v16, %v3299_v52 }
 0x524   :  { %1633 = vadd.xlane.f32.xlu1 %v1629_v48  ;;  %1631 = vadd.xlane.f32.xlu0 %v1628_v5  ;;  %v3302_v48 = vsel %vm399_vm0, 1.0, %v6326_v50  ;;  %v3305_v52 = vsel %vm402_vm8, 1.0, %v6326_v50  ;;  %v3306_v16 = vsel %vm403_vm9, 1.0, %v6326_v50  ;;  %vm411_vm8 = vcmp.eq.s32.totalorder %v390_v14, %v3298_v44 }
 0x525   :  { %6387 = vst [vmem:[#allocation61_spill] sm:$0xff] %v5773_v37  ;;  %v5776_v5 = vpack.c.bf16 %v3302_v48, %v3301_v40  ;;  %3868 = vmatprep.mubr.msk.bf16.mxu1 %vm1790_vm14, %v5773_v37  ;;  %v5786_v48 = vpack.c.bf16 %v3306_v16, %v3305_v52  ;;  %v386_v37 = vadd.s32 88, %v375_v61  ;;  %v387_v52 = vadd.s32 96, %v375_v61 }
 0x526   :  { %v388_v16 = vadd.s32 104, %v375_v61  ;;  %vm1815_vm9 = vcmask 1043456  }
 0x527   :  { %vm407_vm13 = vcmp.eq.s32.totalorder %v386_v37, %v3298_v44  ;;  %vm408_vm0 = vcmp.eq.s32.totalorder %v387_v52, %v3298_v44  ;;  %v3314_v37 = vsel %vm411_vm8, 1.0, %v6326_v50 }
 0x528   :  { %1635 = vadd.xlane.f32.xlu0 %v1630_v23  ;;  %v379_v23 = vadd.s32 32, %v375_v61  ;;  %v3310_v53 = vsel %vm407_vm13, 1.0, %v6326_v50  ;;  %v3311_v8 = vsel %vm408_vm0, 1.0, %v6326_v50 }
 0x52a   :  { %vm400_vm2 = vcmp.eq.s32.totalorder %v379_v23, %v3298_v44  ;;  %v3308_v23 = vsel %vm405_vm4, 1.0, %v6326_v50 }
 0x52b   :  { %v3303_v45 = vsel %vm400_vm2, 1.0, %v6326_v50  ;;  %vm409_vm2 = vcmp.eq.s32.totalorder %v388_v16, %v3298_v44 }
 0x52c   :  { %v5784_v40 = vpack.c.bf16 %v3304_v47, %v3303_v45  ;;  %v5792_v45 = vpack.c.bf16 %v3308_v23, %v3307_v60  ;;  %v5794_v47 = vpack.c.bf16 %v3310_v53, %v3309_v28  ;;  %v3312_v22 = vsel %vm409_vm2, 1.0, %v6326_v50  ;;  %v3349_v28 = vld [vmem:[#allocation20] ss:$0 sm:$0xff] }
 0x52d   :  { %v5800_v60 = vpack.c.bf16 %v3312_v22, %v3311_v8  ;;  %v5802_v23 = vpack.c.bf16 %v3314_v37, %v3313_v25  ;;  %v5805_v53 = vadd.f32 %v3349_v28, %v5670_v63  ;;  %v5808_v61 = vadd.f32 %v3349_v28, %v5672_v42 }
 0x52e   :  { %v5817_v22 = vadd.f32 %v5668_v13, %v3349_v28  ;;  %v5859_v28 = vld [vmem:[#allocation24 + $0x30] sm:$0xff]  }
 0x52f   :  { %v1558_v44 = vadd.f32 %v5693_v17, %v5805_v53  ;;  %v1561_v52 = vadd.f32 %v5695_v51, %v5808_v61 }
 0x530   :  { %v1566_v42 = vadd.f32 %v5691_v7, %v5817_v22  ;;  %v5839_v7 = vld [vmem:[#allocation24 + $0x18] sm:$0xff]  }
 0x5b1   :  { %v1634_v14 = vpop.xlane.xlu1 %1633  ;;  %v1632_v18 = vpop.xlane.xlu0 %1631 }
 0x5b2   :  { %v1638_v16 = vmul.f32 %v5748_v54, %v1634_v14  ;;  %v1637_v8 = vmul.f32 %v5750_v29, %v1632_v18  ;;  %v5822_v54 = vld [vmem:[#allocation24] sm:$0xff]   ;;  %v5827_v29 = vld [vmem:[#allocation24 + $0x8] sm:$0xff]   ;;  %v5863_v14 = vld [vmem:[#allocation24 + $0x38] sm:$0xff]  }
 0x5b3   :  { %v4522_v18 = vld [vmem:[#allocation15] sm:$0xff]  }
 0x5b4   :  { %v1641_v63 = vmul.f32 %v1638_v16, %v1561_v52  ;;  %v1640_v25 = vmul.f32 %v1637_v8, %v1558_v44  ;;  %v4523_v44 = vld [vmem:[#allocation15 + $0x8] sm:$0xff]   ;;  %v4524_v52 = vld [vmem:[#allocation15 + $0x10] sm:$0xff]   ;;  %v4526_v16 = vld [vmem:[#allocation15 + $0x20] sm:$0xff]  }
 0x5b5   :  { %v1636_v37 = vpop.xlane.xlu0 %1635 }
 0x5b6   :  { %v1639_v50 = vmul.f32 %v5758_v15, %v1636_v37  ;;  %v1643_v56 = vpack.c.bf16 %v1641_v63, %v1640_v25  ;;  %v5847_v15 = vld [vmem:[#allocation24 + $0x20] sm:$0xff]  }
 0x5b8   :  { %v1642_v17 = vmul.f32 %v1639_v50, %v1566_v42  ;;  %3864 = vmatprep.subr.bf16.mxu1 %v1643_v56  ;;  %v5851_v50 = vld [vmem:[#allocation24 + $0x28] sm:$0xff]  }
 0x5b9   :  { %3865 = vmatpush3.bf16.msra.mxu1 %v1643_v56  ;;  %v5835_v56 = vld [vmem:[#allocation24 + $0x10] sm:$0xff]  }
 0x5ba   :  { %v1644_v51 = vpack.c.bf16 %v1642_v17, %v1642_v17 }
 0x5bc   :  { %4280 = vmatprep.subr.msk.bf16.mxu1 %vm1815_vm9, %v1644_v51  ;;  %v1817_v13 = vsel %vm1815_vm9, %v1644_v51, 0 }
 0x5bd   :  { %3867 = vmatpush3.bf16.msra.mxu1 %v1817_v13 }
 0x5be   :  { %3884 = vmatprep.subr.bf16.mxu1 %v5822_v54 }
 0x5c0   :  { %3869 = vmatmul.mubr.msk.bf16.vlgmr.msra.gmra.mrb[12].mxu1 %vm1790_vm14, %v5776_v5 }
 0x5c1   :  { %3885 = vmatpush3.bf16.msra.mxu1 %v5822_v54  ;;  %3872 = vmatprep.mubr.msk.bf16.mxu1 %vm1790_vm14, %v5784_v40 }
 0x5c2   :  { %3886 = vmatprep.subr.bf16.mxu1 %v5827_v29 }
 0x5c5   :  { %3887 = vmatpush3.bf16.msra.mxu1 %v5827_v29 }
 0x5c6   :  { %3888 = vmatprep.subr.bf16.mxu1 %v5835_v56 }
 0x5c8   :  { %3873 = vmatmul.mubr.msk.bf16.gmra.mrb[16].mxu1 %vm1790_vm14, %v5786_v48 }
 0x5c9   :  { %3889 = vmatpush3.bf16.msra.mxu1 %v5835_v56  ;;  %3876 = vmatprep.mubr.msk.bf16.mxu1 %vm1790_vm14, %v5792_v45 }
 0x5ca   :  { %3890 = vmatprep.subr.bf16.mxu1 %v5839_v7 }
 0x5cd   :  { %3891 = vmatpush3.bf16.msra.mxu1 %v5839_v7 }
 0x5ce   :  { %3892 = vmatprep.subr.bf16.mxu1 %v5847_v15 }
 0x5d0   :  { %3877 = vmatmul.mubr.msk.bf16.gmra.mrb[20].mxu1 %vm1790_vm14, %v5794_v47 }
 0x5d1   :  { %3893 = vmatpush3.bf16.msra.mxu1 %v5847_v15  ;;  %3880 = vmatprep.mubr.msk.bf16.mxu1 %vm1790_vm14, %v5800_v60 }
 0x5d2   :  { %3894 = vmatprep.subr.bf16.mxu1 %v5851_v50 }
 0x5d5   :  { %3895 = vmatpush3.bf16.msra.mxu1 %v5851_v50 }
 0x5d6   :  { %3896 = vmatprep.subr.bf16.mxu1 %v5859_v28 }
 0x5d8   :  { %3881 = vmatmul.mubr.msk.bf16.gmra.mrb[24].mxu1 %vm1790_vm14, %v5802_v23 }
 0x5d9   :  { %3897 = vmatpush3.bf16.msra.mxu1 %v5859_v28  ;;  %3900 = vmatprep.mubr.bf16.mxu1 %v5251_v9  ;;  %v4525_v9 = vld [vmem:[#allocation15 + $0x18] sm:$0xff]  }
 0x5da   :  { %3898 = vmatprep.subr.bf16.mxu1 %v5863_v14 }
 0x5dd   :  { %3899 = vmatpush3.bf16.msra.mxu1 %v5863_v14 }
 0x5de   :  { %3976 = vmatprep.subr.bf16.mxu1 %v4522_v18 }
 0x5e0   :  { %3901 = vmatmul.mubr.bf16.vlgmr.msra.gmra.mrb[12].mxu1 %v5253_v11  ;;  %v5885_v11 = vld [vmem:[#allocation23] ss:$0 sm:$0xff] }
 0x5e1   :  { %3904 = vmatprep.mubr.bf16.mxu1 %v5262_v19  ;;  %3977 = vmatpush3.bf16.msra.mxu1 %v4522_v18  ;;  %v5887_v19 = vld [vmem:[#allocation26] ss:$0 sm:$0xff] }
 0x5e2   :  { %3978 = vmatprep.subr.bf16.mxu1 %v4523_v44 }
 0x5e5   :  { %3979 = vmatpush3.bf16.msra.mxu1 %v4523_v44 }
 0x5e6   :  { %3980 = vmatprep.subr.bf16.mxu1 %v4524_v52 }
 0x5e8   :  { %3905 = vmatmul.mubr.bf16.gmra.mrb[16].mxu1 %v5266_v21 }
 0x5e9   :  { %3908 = vmatprep.mubr.bf16.mxu1 %v5271_v27  ;;  %3981 = vmatpush3.bf16.msra.mxu1 %v4524_v52 }
 0x5ea   :  { %3982 = vmatprep.subr.bf16.mxu1 %v4525_v9 }
 0x5ed   :  { %3983 = vmatpush3.bf16.msra.mxu1 %v4525_v9 }
 0x5ee   :  { %3984 = vmatprep.subr.bf16.mxu1 %v4526_v16 }
 0x5f0   :  { %3909 = vmatmul.mubr.bf16.gmra.mrb[20].mxu1 %v5275_v30 }
 0x5f1   :  { %3912 = vmatprep.mubr.bf16.mxu1 %v5279_v33  ;;  %3985 = vmatpush3.bf16.msra.mxu1 %v4526_v16 }
 0x5f2   :  { %3986 = vmatprep.subr.bf16.mxu1 %v5496_v36 }
 0x5f5   :  { %3987 = vmatpush3.bf16.msra.mxu1 %v5496_v36 }
 0x5f6   :  { %3988 = vmatprep.subr.bf16.mxu1 %v5508_v58 }
 0x5f8   :  { %3913 = vmatmul.mubr.bf16.gmra.mrb[24].mxu1 %v5283_v34 }
 0x5f9   :  { %3989 = vmatpush3.bf16.msra.mxu1 %v5508_v58 }
 0x5fa   :  { %3990 = vmatprep.subr.bf16.mxu1 %v5579_v41 }
 0x5fd   :  { %3991 = vmatpush3.bf16.msra.mxu1 %v5579_v41 }
 0x5fe   :  { %4016 = vmatprep.subr.bf16.mxu1 %v5709_v55 }
 0x6b3   :  { %v3902_v21 = vpop.f32.mrb[12].mxu1 }
 0x6b4   :  { %v4180_v27 = vadd.f32 %v3902_v21, %v5885_v11  ;;  %v2014_v30 = vpop.f32.mrb[13].mxu1 }
 0x6b5   :  { %v4181_v33 = vadd.f32 %v5885_v11, %v2014_v30  ;;  %v3903_v36 = vpop.f32.mrb[14].mxu1 }
 0x6b6   :  { %v2079_v34 = vadd.f32 %v4180_v27, %v5887_v19  ;;  %v4182_v58 = vadd.f32 %v3903_v36, %v5885_v11  ;;  %v2017_v8 = vpop.f32.mrb[15].mxu1 }
 0x6b7   :  { %v2077_v41 = vadd.f32 %v4181_v33, %v5887_v19  ;;  %v4183_v63 = vadd.f32 %v5885_v11, %v2017_v8 }
 0x6b8   :  { %4450 = vtanh.f32 %v2079_v34  ;;  %v2080_v25 = vadd.f32 %v4182_v58, %v5887_v19 }
 0x6b9   :  { %4452 = vtanh.f32 %v2077_v41  ;;  %v2078_v37 = vadd.f32 %v4183_v63, %v5887_v19 }
 0x6ba   :  { %4454 = vtanh.f32 %v2080_v25 }
 0x6bb   :  { %4456 = vtanh.f32 %v2078_v37  ;;  %v3906_v42 = vpop.f32.mrb[16].mxu1 }
 0x6bc   :  { %v4184_v17 = vadd.f32 %v3906_v42, %v5885_v11  ;;  %v2030_v51 = vpop.f32.mrb[17].mxu1 }
 0x6bd   :  { %v4185_v13 = vadd.f32 %v5885_v11, %v2030_v51  ;;  %v3907_v18 = vpop.f32.mrb[18].mxu1 }
 0x6be   :  { %v2083_v44 = vadd.f32 %v4184_v17, %v5887_v19  ;;  %v4186_v52 = vadd.f32 %v3907_v18, %v5885_v11  ;;  %v2033_v9 = vpop.f32.mrb[19].mxu1 }
 0x6bf   :  { %v2081_v16 = vadd.f32 %v4185_v13, %v5887_v19  ;;  %v4187_v21 = vadd.f32 %v5885_v11, %v2033_v9  ;;  %v4527_v9 = vld [vmem:[#allocation3] sm:$0xff] }
 0x6c0   :  { %4458 = vtanh.f32 %v2083_v44  ;;  %v2084_v27 = vadd.f32 %v4186_v52, %v5887_v19 }
 0x6c1   :  { %4460 = vtanh.f32 %v2081_v16  ;;  %v2082_v30 = vadd.f32 %v4187_v21, %v5887_v19 }
 0x6c2   :  { %v4451_v33 = vpop.eup %4450  ;;  %4462 = vtanh.f32 %v2084_v27 }
 0x6c3   :  { %v4453_v36 = vpop.eup %4452  ;;  %4464 = vtanh.f32 %v2082_v30  ;;  %v3910_v34 = vpop.f32.mrb[20].mxu1  ;;  %v2111_v51 = vmul.f32 0.1, %v4451_v33  ;;  %v4528_v30 = vld [vmem:[#allocation3 + $0x18] sm:$0xff] }
 0x6c4   :  { %v4455_v58 = vpop.eup %4454  ;;  %v2109_v8 = vmul.f32 0.1, %v4453_v36  ;;  %v4188_v41 = vadd.f32 %v3910_v34, %v5885_v11  ;;  %v2046_v63 = vpop.f32.mrb[21].mxu1  ;;  %v4529_v34 = vld [vmem:[#allocation3 + $0x8] sm:$0xff] }
 0x6c5   :  { %v4457_v25 = vpop.eup %4456  ;;  %v2112_v37 = vmul.f32 0.1, %v4455_v58  ;;  %v4189_v42 = vadd.f32 %v5885_v11, %v2046_v63  ;;  %v3911_v17 = vpop.f32.mrb[22].mxu1 }
 0x6c6   :  { %v2110_v13 = vmul.f32 0.1, %v4457_v25  ;;  %v2087_v18 = vadd.f32 %v4188_v41, %v5887_v19  ;;  %v4190_v44 = vadd.f32 %v3911_v17, %v5885_v11  ;;  %v2049_v52 = vpop.f32.mrb[23].mxu1  ;;  %v5909_v16 = vadd.f32 %v4527_v9, %v2109_v8  ;;  %v4530_v25 = vld [vmem:[#allocation3 + $0x10] sm:$0xff] }
 0x6c7   :  { %v2085_v21 = vadd.f32 %v4189_v42, %v5887_v19  ;;  %v4191_v27 = vadd.f32 %v5885_v11, %v2049_v52  ;;  %v5913_v36 = vadd.f32 %v4528_v30, %v2112_v37  ;;  %v5919_v8 = vadd.f32 %v4530_v25, %v2111_v51 }
 0x6c8   :  { %6388 = vst [vmem:[#allocation62_spill] sm:$0xff] %v5909_v16  ;;  %v5915_v58 = vadd.f32 %v4529_v34, %v2110_v13  ;;  %4466 = vtanh.f32 %v2087_v18  ;;  %v2088_v33 = vadd.f32 %v4190_v44, %v5887_v19 }
 0x6c9   :  { %6389 = vst [vmem:[#allocation63_spill] sm:$0xff] %v5913_v36  ;;  %4468 = vtanh.f32 %v2085_v21  ;;  %v2086_v41 = vadd.f32 %v4191_v27, %v5887_v19  ;;  %6391 = vst [vmem:[#allocation65_spill] sm:$0xff] %v5919_v8  ;;  %v5927_v18 = vpack.c.bf16 %v5913_v36, %v5919_v8  ;;  %v4533_v8 = vld [vmem:[#allocation3 + $0x28] sm:$0xff] }
 0x6ca   :  { %6390 = vst [vmem:[#allocation64_spill] sm:$0xff] %v5915_v58  ;;  %v4459_v63 = vpop.eup %4458  ;;  %v5923_v42 = vpack.c.bf16 %v5915_v58, %v5909_v16  ;;  %4470 = vtanh.f32 %v2088_v33 }
 0x6cb   :  { %v4461_v37 = vpop.eup %4460  ;;  %4472 = vtanh.f32 %v2086_v41  ;;  %v3914_v17 = vpop.f32.mrb[24].mxu1  ;;  %v2115_v34 = vmul.f32 0.1, %v4459_v63 }
 0x6cc   :  { %v4463_v13 = vpop.eup %4462  ;;  %v2113_v44 = vmul.f32 0.1, %v4461_v37  ;;  %v4192_v52 = vadd.f32 %v3914_v17, %v5885_v11  ;;  %v2062_v9 = vpop.f32.mrb[25].mxu1  ;;  %3916 = vmatprep.subr.bf16.mxu0 %v5923_v42  ;;  %v4531_v37 = vld [vmem:[#allocation3 + $0x20] sm:$0xff] }
 0x6cd   :  { %v4465_v51 = vpop.eup %4464  ;;  %v2116_v21 = vmul.f32 0.1, %v4463_v13  ;;  %v4193_v27 = vadd.f32 %v5885_v11, %v2062_v9  ;;  %v3915_v30 = vpop.f32.mrb[26].mxu1  ;;  %3917 = vmatpush3.bf16.msra.mxu0 %v5923_v42  ;;  %v4532_v9 = vld [vmem:[#allocation3 + $0x38] sm:$0xff] }
 0x6ce   :  { %v2114_v33 = vmul.f32 0.1, %v4465_v51  ;;  %v2091_v41 = vadd.f32 %v4192_v52, %v5887_v19  ;;  %v4194_v25 = vadd.f32 %v3915_v30, %v5885_v11  ;;  %v2065_v58 = vpop.f32.mrb[27].mxu1  ;;  %3918 = vmatprep.subr.bf16.mxu0 %v5927_v18  ;;  %v5936_v17 = vadd.f32 %v4531_v37, %v2113_v44  ;;  %v4534_v30 = vld [vmem:[#allocation3 + $0x30] sm:$0xff] }
 0x6cf   :  { %v2089_v36 = vadd.f32 %v4193_v27, %v5887_v19  ;;  %v4195_v13 = vadd.f32 %v5885_v11, %v2065_v58  ;;  %v5940_v16 = vadd.f32 %v4532_v9, %v2116_v21  ;;  %v5947_v37 = vadd.f32 %v4534_v30, %v2115_v34  ;;  %v4537_v30 = vld [vmem:[#allocation3 + $0x48] sm:$0xff] }
 0x6d0   :  { %6392 = vst [vmem:[#allocation66_spill] sm:$0xff] %v5936_v17  ;;  %v5942_v63 = vadd.f32 %v4533_v8, %v2114_v33  ;;  %4474 = vtanh.f32 %v2091_v41  ;;  %v2092_v52 = vadd.f32 %v4194_v25, %v5887_v19 }
 0x6d1   :  { %6393 = vst [vmem:[#allocation67_spill] sm:$0xff] %v5940_v16  ;;  %4476 = vtanh.f32 %v2089_v36  ;;  %v2090_v51 = vadd.f32 %v4195_v13, %v5887_v19  ;;  %3919 = vmatpush3.bf16.msra.mxu0 %v5927_v18  ;;  %6395 = vst [vmem:[#allocation69_spill] sm:$0xff] %v5947_v37  ;;  %v5955_v27 = vpack.c.bf16 %v5940_v16, %v5947_v37  ;;  %v4535_v13 = vld [vmem:[#allocation3 + $0x40] sm:$0xff]  ;;  %v4538_v16 = vld [vmem:[#allocation3 + $0x50] sm:$0xff] }
 0x6d2   :  { %6394 = vst [vmem:[#allocation68_spill] sm:$0xff] %v5942_v63  ;;  %v4467_v44 = vpop.eup %4466  ;;  %v5951_v58 = vpack.c.bf16 %v5942_v63, %v5936_v17  ;;  %4478 = vtanh.f32 %v2092_v52  ;;  %v4536_v52 = vld [vmem:[#allocation3 + $0x58] sm:$0xff]  ;;  %v4541_v37 = vld [vmem:[#allocation3 + $0x68] sm:$0xff] }
 0x6d3   :  { %v4469_v21 = vpop.eup %4468  ;;  %4480 = vtanh.f32 %v2090_v51  ;;  %v2119_v34 = vmul.f32 0.1, %v4467_v44 }
 0x6d4   :  { %v4471_v8 = vpop.eup %4470  ;;  %v2117_v36 = vmul.f32 0.1, %v4469_v21  ;;  %3920 = vmatprep.subr.bf16.mxu0 %v5951_v58 }
 0x6d5   :  { %v4473_v33 = vpop.eup %4472  ;;  %v2120_v41 = vmul.f32 0.1, %v4471_v8  ;;  %3921 = vmatpush3.bf16.msra.mxu0 %v5951_v58  ;;  %v5967_v8 = vadd.f32 %v4538_v16, %v2119_v34  ;;  %v4539_v34 = vld [vmem:[#allocation3 + $0x60] sm:$0xff] }
 0x6d6   :  { %v2118_v25 = vmul.f32 0.1, %v4473_v33  ;;  %3922 = vmatprep.subr.bf16.mxu0 %v5955_v27  ;;  %v5960_v9 = vadd.f32 %v4535_v13, %v2117_v36 }
 0x6d7   :  { %v5962_v51 = vadd.f32 %v4536_v52, %v2120_v41  ;;  %6399 = vst [vmem:[#allocation73_spill] sm:$0xff] %v5967_v8 }
 0x6d8   :  { %6396 = vst [vmem:[#allocation70_spill] sm:$0xff] %v5960_v9  ;;  %v5964_v63 = vadd.f32 %v4537_v30, %v2118_v25 }
 0x6d9   :  { %6397 = vst [vmem:[#allocation71_spill] sm:$0xff] %v5962_v51  ;;  %3923 = vmatpush3.bf16.msra.mxu0 %v5955_v27  ;;  %v5975_v36 = vpack.c.bf16 %v5962_v51, %v5967_v8 }
 0x6da   :  { %6398 = vst [vmem:[#allocation72_spill] sm:$0xff] %v5964_v63  ;;  %v4475_v21 = vpop.eup %4474  ;;  %v5971_v44 = vpack.c.bf16 %v5964_v63, %v5960_v9  ;;  %v4540_v63 = vld [vmem:[#allocation3 + $0x78] sm:$0xff] }
 0x6db   :  { %v4477_v33 = vpop.eup %4476  ;;  %v2123_v52 = vmul.f32 0.1, %v4475_v21 }
 0x6dc   :  { %v4479_v17 = vpop.eup %4478  ;;  %v2121_v41 = vmul.f32 0.1, %v4477_v33  ;;  %3924 = vmatprep.subr.bf16.mxu0 %v5971_v44  ;;  %v4542_v33 = vld [vmem:[#allocation3 + $0x70] sm:$0xff] }
 0x6dd   :  { %v4481_v25 = vpop.eup %4480  ;;  %v2124_v13 = vmul.f32 0.1, %v4479_v17  ;;  %3925 = vmatpush3.bf16.msra.mxu0 %v5971_v44  ;;  %v5987_v8 = vadd.f32 %v4542_v33, %v2123_v52  ;;  %v6408_v33 = vld [vmem:[#allocation57_spill] sm:$0xff] }
 0x6de   :  { %v2122_v16 = vmul.f32 0.1, %v4481_v25  ;;  %3926 = vmatprep.subr.bf16.mxu0 %v5975_v36  ;;  %v5980_v30 = vadd.f32 %v4539_v34, %v2121_v41 }
 0x6df   :  { %v5982_v9 = vadd.f32 %v4540_v63, %v2124_v13  ;;  %v6400_v63 = vmov 1.0|1.0  }
 0x6e0   :  { %v5984_v51 = vadd.f32 %v4541_v37, %v2122_v16  ;;  %v6407_v16 = vld [vmem:[#allocation58_spill] sm:$0xff] }
 0x6e1   :  { %3927 = vmatpush3.bf16.msra.mxu0 %v5975_v36  ;;  %v5995_v21 = vpack.c.bf16 %v5982_v9, %v5987_v8 }
 0x6e2   :  { %v5991_v17 = vpack.c.bf16 %v5984_v51, %v5980_v30 }
 0x6e4   :  { %3928 = vmatprep.subr.bf16.mxu0 %v5991_v17 }
 0x6e5   :  { %3929 = vmatpush3.bf16.msra.mxu0 %v5991_v17 }
 0x6e6   :  { %3930 = vmatprep.subr.bf16.mxu0 %v5995_v21 }
 0x6e9   :  { %3931 = vmatpush3.bf16.msra.mxu0 %v5995_v21 }
 0x6ea   :  { %3936 = vmatprep.subr.bf16.mxu0 %v5923_v42 }
 0x6ec   :  { %3933 = vmatmul.mubr.msk.bf16.vlgmr.msra.gmra.mrb[12].mxu0 %vm5309_vm1, %v6400_v63  ;;  %vm4997_vm1 = vmmov 0  }
 0x6ed   :  { %3937 = vmatpush3.bf16.msra.mxu0 %v5923_v42  ;;  %3952 = vmatprep.mubr.msk.bf16.mxu0 %vm3356_vm7, %v6400_v63 }
 0x6ee   :  { %3938 = vmatprep.subr.bf16.mxu0 %v5927_v18 }
 0x6f1   :  { %3939 = vmatpush3.bf16.msra.mxu0 %v5927_v18 }
 0x6f2   :  { %3940 = vmatprep.subr.bf16.mxu0 %v5951_v58 }
 0x6f5   :  { %3941 = vmatpush3.bf16.msra.mxu0 %v5951_v58 }
 0x6f6   :  { %3942 = vmatprep.subr.bf16.mxu0 %v5955_v27 }
 0x6f9   :  { %3943 = vmatpush3.bf16.msra.mxu0 %v5955_v27 }
 0x6fa   :  { %3944 = vmatprep.subr.bf16.mxu0 %v5971_v44 }
 0x6fd   :  { %3945 = vmatpush3.bf16.msra.mxu0 %v5971_v44 }
 0x6fe   :  { %3946 = vmatprep.subr.bf16.mxu0 %v5975_v36 }
 0x701   :  { %3947 = vmatpush3.bf16.msra.mxu0 %v5975_v36 }
 0x702   :  { %3948 = vmatprep.subr.bf16.mxu0 %v5991_v17 }
 0x705   :  { %3949 = vmatpush3.bf16.msra.mxu0 %v5991_v17 }
 0x706   :  { %3950 = vmatprep.subr.bf16.mxu0 %v5995_v21 }
 0x709   :  { %3951 = vmatpush3.bf16.msra.mxu0 %v5995_v21 }
 0x70a   :  { %3956 = vmatprep.subr.bf16.mxu0 %v4543_v59 }
 0x70c   :  { %3953 = vmatmul.mubr.msk.bf16.vlgmr.msra.gmra.mrb[16].mxu0 %vm3358_vm15, %v6400_v63 }
 0x70d   :  { %3957 = vmatpush3.bf16.msra.mxu0 %v4543_v59 }
 0x70e   :  { %3958 = vmatprep.subr.bf16.mxu0 %v5604_v32 }
 0x711   :  { %3959 = vmatpush3.bf16.msra.mxu0 %v5604_v32 }
 0x712   :  { %3960 = vmatprep.subr.bf16.mxu0 %v5607_v39 }
 0x715   :  { %3961 = vmatpush3.bf16.msra.mxu0 %v5607_v39 }
 0x716   :  { %3962 = vmatprep.subr.bf16.mxu0 %v5611_v38 }
 0x719   :  { %3963 = vmatpush3.bf16.msra.mxu0 %v5611_v38 }
 0x71a   :  { %3964 = vmatprep.subr.bf16.mxu0 %v5615_v24 }
 0x71d   :  { %3965 = vmatpush3.bf16.msra.mxu0 %v5615_v24 }
 0x71e   :  { %3966 = vmatprep.subr.bf16.mxu0 %v5619_v57 }
 0x721   :  { %3967 = vmatpush3.bf16.msra.mxu0 %v5619_v57 }
 0x722   :  { %3968 = vmatprep.subr.bf16.mxu0 %v5623_v31 }
 0x725   :  { %3969 = vmatpush3.bf16.msra.mxu0 %v5623_v31 }
 0x726   :  { %3970 = vmatprep.subr.bf16.mxu0 %v5627_v35 }
 0x729   :  { %3971 = vmatpush3.bf16.msra.mxu0 %v5627_v35 }
 0x72a   :  { %3996 = vmatprep.subr.bf16.mxu0 %v5631_v46 }
 0x7bf   :  { %v3934_v32 = vpop.f32.mrb[12].mxu0 }
 0x7c0   :  { %v2183_v39 = vpop.f32.mrb[13].mxu0  ;;  %v2198_v24 = vpack.c.bf16 %v3934_v32, %v3934_v32 }
 0x7c1   :  { %v3935_v38 = vpop.f32.mrb[14].mxu0 }
 0x7c2   :  { %v2186_v37 = vpop.f32.mrb[15].mxu0 }
 0x7c3   :  { %v2197_v41 = vpack.c.bf16 %v2186_v37, %v2183_v39  ;;  %v6409_v39 = vld [vmem:[#allocation59_spill] sm:$0xff] }
 0x7c5   :  { %3992 = vmatprep.mubr.bf16.mxu1 %v2197_v41 }
 0x7c6   :  { %3993 = vmatmul.mubr.bf16.vlgmr.msra.gmra.mrb[28].mxu1 %v2198_v24 }
 0x7c7   :  { %4017 = vmatpush3.bf16.msra.mxu1 %v5709_v55  ;;  %4032 = vmatprep.mubr.bf16.mxu1 %v5923_v42 }
 0x7c8   :  { %4018 = vmatprep.subr.bf16.mxu1 %v5711_v62 }
 0x7cb   :  { %4019 = vmatpush3.bf16.msra.mxu1 %v5711_v62 }
 0x7cc   :  { %4020 = vmatprep.subr.bf16.mxu1 %v5716_v12 }
 0x7cf   :  { %4021 = vmatpush3.bf16.msra.mxu1 %v5716_v12  ;;  %v4544_v12 = vld [vmem:[#allocation18] sm:$0xff]  }
 0x7d0   :  { %4022 = vmatprep.subr.bf16.mxu1 %v5720_v6 }
 0x7d3   :  { %4023 = vmatpush3.bf16.msra.mxu1 %v5720_v6  ;;  %v6401_v6 = vld [vmem:[#allocation53_spill] sm:$0xff] }
 0x7d4   :  { %4024 = vmatprep.subr.bf16.mxu1 %v5724_v49 }
 0x7d7   :  { %4025 = vmatpush3.bf16.msra.mxu1 %v5724_v49  ;;  %v6403_v49 = vld [vmem:[#allocation55_spill] sm:$0xff] }
 0x7d8   :  { %4026 = vmatprep.subr.bf16.mxu1 %v5728_v20 }
 0x7db   :  { %4027 = vmatpush3.bf16.msra.mxu1 %v5728_v20  ;;  %v6406_v20 = vmov 0.0  }
 0x7dc   :  { %4028 = vmatprep.subr.bf16.mxu1 %v5732_v26 }
 0x7df   :  { %4029 = vmatpush3.bf16.msra.mxu1 %v5732_v26  ;;  %v3954_v57 = vpop.f32.mrb[16].mxu0 }
 0x7e0   :  { %v2233_v31 = vpop.f32.mrb[17].mxu0  ;;  %4030 = vmatprep.subr.bf16.mxu1 %v5736_v10  ;;  %v2248_v62 = vpack.c.bf16 %v3954_v57, %v3954_v57 }
 0x7e1   :  { %v3955_v35 = vpop.f32.mrb[18].mxu0 }
 0x7e2   :  { %v2236_v46 = vpop.f32.mrb[19].mxu0  ;;  %v6410_v35 = vld [vmem:[#allocation60_spill] sm:$0xff] }
 0x7e3   :  { %v2247_v55 = vpack.c.bf16 %v2236_v46, %v2233_v31  ;;  %4031 = vmatpush3.bf16.msra.mxu1 %v5736_v10 }
 0x7e5   :  { %3972 = vmatprep.mubr.bf16.mxu0 %v2247_v55 }
 0x7e6   :  { %4033 = vmatmul.mubr.bf16.vlgmr.msra.gmra.mrb[32].mxu1 %v5927_v18  ;;  %3973 = vmatmul.mubr.bf16.vlgmr.msra.gmra.mrb[20].mxu0 %v2248_v62 }
 0x7e7   :  { %3997 = vmatpush3.bf16.msra.mxu0 %v4544_v12  ;;  %4036 = vmatprep.mubr.bf16.mxu1 %v5951_v58 }
 0x7e8   :  { %4012 = vmatprep.mubr.bf16.mxu0 %v2197_v41  ;;  %3998 = vmatprep.subr.bf16.mxu0 %v5636_v2 }
 0x7eb   :  { %3999 = vmatpush3.bf16.msra.mxu0 %v5636_v2  ;;  %v6402_v2 = vld [vmem:[#allocation54_spill] sm:$0xff] }
 0x7ec   :  { %4000 = vmatprep.subr.bf16.mxu0 %v5640_v3 }
 0x7ee   :  { %4037 = vmatmul.mubr.bf16.gmra.mrb[36].mxu1 %v5955_v27 }
 0x7ef   :  { %4001 = vmatpush3.bf16.msra.mxu0 %v5640_v3  ;;  %4040 = vmatprep.mubr.bf16.mxu1 %v5971_v44  ;;  %v6404_v3 = vld [vmem:[#allocation61_spill] sm:$0xff] }
 0x7f0   :  { %4002 = vmatprep.subr.bf16.mxu0 %v5644_v4 }
 0x7f3   :  { %4003 = vmatpush3.bf16.msra.mxu0 %v5644_v4  ;;  %v6405_v4 = vld [vmem:[#allocation56_spill] sm:$0xff] }
 0x7f4   :  { %4004 = vmatprep.subr.bf16.mxu0 %v6401_v6 }
 0x7f6   :  { %4041 = vmatmul.mubr.bf16.gmra.mrb[40].mxu1 %v5975_v36 }
 0x7f7   :  { %4005 = vmatpush3.bf16.msra.mxu0 %v6401_v6  ;;  %4044 = vmatprep.mubr.bf16.mxu1 %v5991_v17 }
 0x7f8   :  { %4006 = vmatprep.subr.bf16.mxu0 %v6402_v2 }
 0x7fb   :  { %4007 = vmatpush3.bf16.msra.mxu0 %v6402_v2 }
 0x7fc   :  { %4008 = vmatprep.subr.bf16.mxu0 %v6403_v49 }
 0x7fe   :  { %4045 = vmatmul.mubr.bf16.gmra.mrb[44].mxu1 %v5995_v21 }
 0x7ff   :  { %4009 = vmatpush3.bf16.msra.mxu0 %v6403_v49  ;;  %4052 = vmatprep.mubr.msk.bf16.mxu1 %vm1790_vm14, %v6404_v3 }
 0x800   :  { %4010 = vmatprep.subr.bf16.mxu0 %v6405_v4 }
 0x803   :  { %4011 = vmatpush3.bf16.msra.mxu0 %v6405_v4 }
 0x804   :  { %4100 = vmatprep.subr.bf16.mxu0 %v6406_v20 }
 0x806   :  { %4013 = vmatmul.mubr.bf16.vlgmr.msra.gmra.mrb[24].mxu0 %v2198_v24 }
 0x807   :  { %4116 = vmatprep.mubr.msk.bf16.mxu0 %vm4997_vm1, %v6406_v20 }
 0x899   :  { %v3994_v26 = vpop.f32.mrb[28].mxu1 }
 0x89a   :  { %v2331_v10 = vpop.f32.mrb[29].mxu1  ;;  %v2340_v34 = vadd.f32 %v3994_v26, %v6407_v16 }
 0x89b   :  { %v3995_v25 = vpop.f32.mrb[30].mxu1  ;;  %v2332_v38 = vadd.f32 %v2331_v10, %v6409_v39 }
 0x89c   :  { %v2334_v13 = vpop.f32.mrb[31].mxu1 }
 0x89d   :  { %v2335_v46 = vadd.f32 %v2334_v13, %v6410_v35 }
 0x8b9   :  { %v3974_v52 = vpop.f32.mrb[20].mxu0 }
 0x8ba   :  { %v2292_v59 = vadd.f32 %v3974_v52, %v6408_v33  ;;  %v2283_v32 = vpop.f32.mrb[21].mxu0 }
 0x8bb   :  { %v2284_v37 = vadd.f32 %v6408_v33, %v2283_v32  ;;  %v3975_v41 = vpop.f32.mrb[22].mxu0 }
 0x8bc   :  { %v2286_v57 = vpop.f32.mrb[23].mxu0  ;;  %v2395_v31 = vmul.f32 %v2340_v34, %v2292_v59 }
 0x8bd   :  { %v2287_v24 = vadd.f32 %v6408_v33, %v2286_v57  ;;  %v2393_v55 = vmul.f32 %v2332_v38, %v2284_v37 }
 0x8bf   :  { %2396 = vadd.xlane.f32.xlu1 %v2393_v55  ;;  %v2394_v62 = vmul.f32 %v2335_v46, %v2287_v24 }
 0x8c1   :  { %2398 = vadd.xlane.f32.xlu0 %v2394_v62 }
 0x8c3   :  { %2400 = vadd.xlane.f32.xlu1 %v2395_v31 }
 0x8d9   :  { %v6093_v12 = vpop.f32.mrb[24].mxu0 }
 0x8da   :  { %v6095_v6 = vpop.f32.mrb[25].mxu0 }
 0x8db   :  { %v4015_v2 = vpop.f32.mrb[26].mxu0  ;;  %v2380_v0 = vadd.f32 %v6095_v6, %v5805_v53 }
 0x8dc   :  { %v6097_v49 = vpop.f32.mrb[27].mxu0 }
 0x94c   :  { %v2397_v3 = vpop.xlane.xlu1 %2396 }
 0x94d   :  { %v2402_v4 = vmul.f32 0.17677669, %v2397_v3 }
 0x94e   :  { %v2399_v26 = vpop.xlane.xlu0 %2398 }
 0x94f   :  { %v2403_v10 = vmul.f32 0.17677669, %v2399_v26  ;;  %v2405_v13 = vsel %vm5326_vm5, %v2402_v4, -1e+30 }
 0x950   :  { %v2401_v25 = vpop.xlane.xlu1 %2400 }
 0x951   :  { %v2406_v52 = vsel %vm5332_vm6, %v2403_v10, -1e+30  ;;  %v2404_v16 = vmul.f32 0.17677669, %v2401_v25 }
 0x952   :  { %v2408_v34 = vmax.f32 %v2405_v13, %v2406_v52 }
 0x953   :  { %v2407_v33 = vsel %vm5372_vm10, %v2404_v16, -1e+30 }
 0x954   :  { %v2409_v59 = vmax.f32 %v2408_v34, %v2407_v33 }
 0x956   :  { %v2410_v32 = vrot.slane %v2409_v59, 4 }
 0x958   :  { %v2411_v39 = vmax.f32 %v2409_v59, %v2410_v32 }
 0x95a   :  { %v2412_v38 = vrot.slane %v2411_v39, 2 }
 0x95c   :  { %v2413_v37 = vmax.f32 %v2411_v39, %v2412_v38 }
 0x95e   :  { %v2414_v41 = vrot.slane %v2413_v37, 1 }
 0x960   :  { %v2415_v57 = vmax.f32 %v2413_v37, %v2414_v41 }
 0x962   :  { %v2417_v31 = vsel %vm5332_vm6, %v2415_v57, -1e+30  ;;  %v2416_v35 = vsel %vm5326_vm5, %v2415_v57, -1e+30  ;;  %v2418_v46 = vsel %vm5372_vm10, %v2415_v57, -1e+30 }
 0x963   :  { %2421 = vmax.xlane.f32.xlu1 %v2417_v31  ;;  %2419 = vmax.xlane.f32.xlu0 %v2416_v35 }
 0x967   :  { %2423 = vmax.xlane.f32.xlu0 %v2418_v46 }
 0x9f0   :  { %v2422_v24 = vpop.xlane.xlu1 %2421  ;;  %v2420_v55 = vpop.xlane.xlu0 %2419 }
 0x9f1   :  { %v2426_v62 = vsub.f32 %v2403_v10, %v2422_v24  ;;  %v2425_v2 = vsub.f32 %v2402_v4, %v2420_v55 }
 0x9f3   :  { %v2429_v3 = vmin.f32 %v2426_v62, 0.0  ;;  %v2428_v26 = vmin.f32 %v2425_v2, 0.0 }
 0x9f4   :  { %v2424_v25 = vpop.xlane.xlu0 %2423 }
 0x9f5   :  { %v2433_v13 = vmul.f32 1.442695, %v2429_v3  ;;  %v2431_v52 = vmul.f32 1.442695, %v2428_v26  ;;  %v2427_v34 = vsub.f32 %v2404_v16, %v2424_v25 }
 0x9f7   :  { %4482 = vpow2.f32 %v2433_v13  ;;  %v2430_v33 = vmin.f32 %v2427_v34, 0.0  ;;  %v2866_v13 = vld [vmem:[%s6411_s0 + $0x8] sm:$0xff]  ;;  %v2922_v34 = vld [vmem:[%s6412_s6] sm:$0xff] }
 0x9f8   :  { %4484 = vpow2.f32 %v2431_v52  ;;  %v2865_v52 = vld [vmem:[%s6411_s0] sm:$0xff] }
 0x9f9   :  { %v2435_v59 = vmul.f32 1.442695, %v2430_v33  ;;  %v2923_v33 = vld [vmem:[%s6412_s6 + $0x8] sm:$0xff] }
 0x9fb   :  { %4486 = vpow2.f32 %v2435_v59 }
 0xa01   :  { %v4483_v32 = vpop.eup %4482 }
 0xa02   :  { %v4485_v39 = vpop.eup %4484  ;;  %v2438_v38 = vsel %vm5332_vm6, %v4483_v32, 0.0 }
 0xa03   :  { %v2437_v10 = vsel %vm5326_vm5, %v4485_v39, 0.0 }
 0xa04   :  { %v2440_v37 = vadd.f32 %v2438_v38, %v2437_v10  ;;  %v2383_v38 = vadd.f32 %v6097_v49, %v5808_v61 }
 0xa05   :  { %v4487_v4 = vpop.eup %4486 }
 0xa06   :  { %v2439_v41 = vsel %vm5372_vm10, %v4487_v4, 0.0 }
 0xa07   :  { %v2441_v57 = vadd.f32 %v2440_v37, %v2439_v41 }
 0xa09   :  { %v2442_v16 = vrot.slane %v2441_v57, 4 }
 0xa0b   :  { %v2443_v31 = vadd.f32 %v2442_v16, %v2441_v57  ;;  %v2388_v16 = vadd.f32 %v6093_v12, %v5817_v22 }
 0xa0d   :  { %v2444_v35 = vrot.slane %v2443_v31, 2 }
 0xa0f   :  { %v2445_v46 = vadd.f32 %v2444_v35, %v2443_v31 }
 0xa11   :  { %v2446_v24 = vrot.slane %v2445_v46, 1 }
 0xa13   :  { %v2447_v55 = vadd.f32 %v2446_v24, %v2445_v46 }
 0xa15   :  { %v2448_v62 = vadd.f32 1e-16, %v2447_v55 }
 0xa17   :  { %4488 = vrcp.f32 %v2448_v62 }
 0xa21   :  { %v4489_v2 = vpop.eup %4488 }
 0xa22   :  { %v2451_v3 = vsel %vm5332_vm6, %v4489_v2, 0.0  ;;  %v2450_v26 = vsel %vm5326_vm5, %v4489_v2, 0.0  ;;  %v2452_v25 = vsel %vm5372_vm10, %v4489_v2, 0.0  ;;  %v6413_v2 = vld [vmem:[#allocation65_spill] sm:$0xff] }
 0xa23   :  { %2455 = vadd.xlane.f32.xlu0 %v2451_v3  ;;  %2453 = vadd.xlane.f32.xlu1 %v2450_v26 }
 0xa27   :  { %2457 = vadd.xlane.f32.xlu1 %v2452_v25 }
 0xa38   :  { %2871 = vperm.xlu1 %4355, %v2866_v13  }
 0xa39   :  { %2868 = vperm.xlu0 %4354, %v2865_v52   ;;  %v6414_v52 = vld [vmem:[#allocation62_spill] sm:$0xff] }
 0xa3c   :  { %2925 = vperm.xlu1 %4355, %v2922_v34  }
 0xa3d   :  { %2928 = vperm.xlu0 %4354, %v2923_v33  }
 0xab0   :  { %v2456_v59 = vpop.xlane.xlu0 %2455  ;;  %v2454_v1 = vpop.xlane.xlu1 %2453 }
 0xab1   :  { %v2460_v10 = vmul.f32 %v4483_v32, %v2456_v59  ;;  %v2459_v43 = vmul.f32 %v4485_v39, %v2454_v1 }
 0xab3   :  { %v2463_v37 = vmul.f32 %v2460_v10, %v2383_v38  ;;  %v2462_v41 = vmul.f32 %v2459_v43, %v2380_v0  ;;  %v6415_v38 = vld [vmem:[#allocation63_spill] sm:$0xff] }
 0xab4   :  { %v2458_v57 = vpop.xlane.xlu1 %2457 }
 0xab5   :  { %v2461_v31 = vmul.f32 %v4487_v4, %v2458_v57  ;;  %v2465_v35 = vpack.c.bf16 %v2463_v37, %v2462_v41  ;;  %v6416_v41 = vld [vmem:[#allocation64_spill] sm:$0xff] }
 0xab7   :  { %v2464_v46 = vmul.f32 %v2461_v31, %v2388_v16  ;;  %4048 = vmatprep.subr.bf16.mxu1 %v2465_v35 }
 0xab8   :  { %4049 = vmatpush3.bf16.msra.mxu1 %v2465_v35 }
 0xab9   :  { %v2466_v24 = vpack.c.bf16 %v2464_v46, %v2464_v46 }
 0xabb   :  { %4281 = vmatprep.subr.msk.bf16.mxu1 %vm1815_vm9, %v2466_v24  ;;  %v2565_v53 = vsel %vm1815_vm9, %v2466_v24, 0 }
 0xabc   :  { %4051 = vmatpush3.bf16.msra.mxu1 %v2565_v53 }
 0xabd   :  { %4068 = vmatprep.subr.bf16.mxu1 %v5822_v54 }
 0xabf   :  { %4053 = vmatmul.mubr.msk.bf16.vlgmr.msra.gmra.mrb[32].mxu1 %vm1790_vm14, %v5776_v5 }
 0xac0   :  { %4069 = vmatpush3.bf16.msra.mxu1 %v5822_v54  ;;  %4056 = vmatprep.mubr.msk.bf16.mxu1 %vm1790_vm14, %v5784_v40 }
 0xac1   :  { %4070 = vmatprep.subr.bf16.mxu1 %v5827_v29 }
 0xac4   :  { %4071 = vmatpush3.bf16.msra.mxu1 %v5827_v29 }
 0xac5   :  { %4072 = vmatprep.subr.bf16.mxu1 %v5835_v56 }
 0xac7   :  { %4057 = vmatmul.mubr.msk.bf16.gmra.mrb[36].mxu1 %vm1790_vm14, %v5786_v48 }
 0xac8   :  { %4073 = vmatpush3.bf16.msra.mxu1 %v5835_v56  ;;  %4060 = vmatprep.mubr.msk.bf16.mxu1 %vm1790_vm14, %v5792_v45 }
 0xac9   :  { %4074 = vmatprep.subr.bf16.mxu1 %v5839_v7 }
 0xacc   :  { %4075 = vmatpush3.bf16.msra.mxu1 %v5839_v7 }
 0xacd   :  { %4076 = vmatprep.subr.bf16.mxu1 %v5847_v15 }
 0xacf   :  { %4061 = vmatmul.mubr.msk.bf16.gmra.mrb[40].mxu1 %vm1790_vm14, %v5794_v47 }
 0xad0   :  { %4077 = vmatpush3.bf16.msra.mxu1 %v5847_v15  ;;  %4064 = vmatprep.mubr.msk.bf16.mxu1 %vm1790_vm14, %v5800_v60 }
 0xad1   :  { %4078 = vmatprep.subr.bf16.mxu1 %v5851_v50 }
 0xad4   :  { %4079 = vmatpush3.bf16.msra.mxu1 %v5851_v50 }
 0xad5   :  { %4080 = vmatprep.subr.bf16.mxu1 %v5859_v28 }
 0xad7   :  { %4065 = vmatmul.mubr.msk.bf16.gmra.mrb[44].mxu1 %vm1790_vm14, %v5802_v23 }
 0xad8   :  { %4081 = vmatpush3.bf16.msra.mxu1 %v5859_v28  ;;  %4084 = vmatprep.mubr.bf16.mxu1 %v5923_v42 }
 0xad9   :  { %4082 = vmatprep.subr.bf16.mxu1 %v5863_v14 }
 0xadc   :  { %4083 = vmatpush3.bf16.msra.mxu1 %v5863_v14 }
 0xadd   :  { %4160 = vmatprep.subr.bf16.mxu1 %v6406_v20 }
 0xadf   :  { %4085 = vmatmul.mubr.bf16.vlgmr.msra.gmra.mrb[32].mxu1 %v5927_v18 }
 0xae0   :  { %4088 = vmatprep.mubr.bf16.mxu1 %v5951_v58 }
 0xae7   :  { %4089 = vmatmul.mubr.bf16.gmra.mrb[36].mxu1 %v5955_v27 }
 0xae8   :  { %4092 = vmatprep.mubr.bf16.mxu1 %v5971_v44 }
 0xaef   :  { %4093 = vmatmul.mubr.bf16.gmra.mrb[40].mxu1 %v5975_v36 }
 0xaf0   :  { %4096 = vmatprep.mubr.bf16.mxu1 %v5991_v17 }
 0xaf7   :  { %4097 = vmatmul.mubr.bf16.gmra.mrb[44].mxu1 %v5995_v21 }
 0xaf8   :  { %4176 = vmatprep.mubr.msk.bf16.mxu1 %vm4997_vm1, %v6406_v20 }
 0xbb2   :  { %v4086_v5 = vpop.f32.mrb[32].mxu1 }
 0xbb3   :  { %v4196_v40 = vadd.f32 %v4086_v5, %v5885_v11  ;;  %v2714_v48 = vpop.f32.mrb[33].mxu1 }
 0xbb4   :  { %v4197_v45 = vadd.f32 %v5885_v11, %v2714_v48  ;;  %v4087_v47 = vpop.f32.mrb[34].mxu1 }
 0xbb5   :  { %v2779_v60 = vadd.f32 %v4196_v40, %v5887_v19  ;;  %v4198_v23 = vadd.f32 %v4087_v47, %v5885_v11  ;;  %v2717_v61 = vpop.f32.mrb[35].mxu1 }
 0xbb6   :  { %v2777_v22 = vadd.f32 %v4197_v45, %v5887_v19  ;;  %v4199_v54 = vadd.f32 %v5885_v11, %v2717_v61  ;;  %v6417_v61 = vld [vmem:[#allocation69_spill] sm:$0xff] }
 0xbb7   :  { %4490 = vtanh.f32 %v2779_v60  ;;  %v2780_v29 = vadd.f32 %v4198_v23, %v5887_v19 }
 0xbb8   :  { %4492 = vtanh.f32 %v2777_v22  ;;  %v2778_v56 = vadd.f32 %v4199_v54, %v5887_v19 }
 0xbb9   :  { %4494 = vtanh.f32 %v2780_v29 }
 0xbba   :  { %4496 = vtanh.f32 %v2778_v56  ;;  %v4090_v7 = vpop.f32.mrb[36].mxu1 }
 0xbbb   :  { %v4200_v15 = vadd.f32 %v4090_v7, %v5885_v11  ;;  %v2730_v50 = vpop.f32.mrb[37].mxu1  ;;  %v6418_v7 = vld [vmem:[#allocation66_spill] sm:$0xff] }
 0xbbc   :  { %v4201_v28 = vadd.f32 %v5885_v11, %v2730_v50  ;;  %v4091_v14 = vpop.f32.mrb[38].mxu1 }
 0xbbd   :  { %v2783_v42 = vadd.f32 %v4200_v15, %v5887_v19  ;;  %v4202_v18 = vadd.f32 %v4091_v14, %v5885_v11  ;;  %v2733_v58 = vpop.f32.mrb[39].mxu1 }
 0xbbe   :  { %v2781_v27 = vadd.f32 %v4201_v28, %v5887_v19  ;;  %v4203_v44 = vadd.f32 %v5885_v11, %v2733_v58 }
 0xbbf   :  { %4498 = vtanh.f32 %v2783_v42  ;;  %v2784_v36 = vadd.f32 %v4202_v18, %v5887_v19  ;;  %v6419_v18 = vld [vmem:[#allocation67_spill] sm:$0xff] }
 0xbc0   :  { %4500 = vtanh.f32 %v2781_v27  ;;  %v2782_v17 = vadd.f32 %v4203_v44, %v5887_v19 }
 0xbc1   :  { %v4491_v21 = vpop.eup %4490  ;;  %4502 = vtanh.f32 %v2784_v36  ;;  %v6420_v36 = vld [vmem:[#allocation68_spill] sm:$0xff] }
 0xbc2   :  { %v4493_v12 = vpop.eup %4492  ;;  %v2811_v6 = vmul.f32 0.1, %v4491_v21  ;;  %4504 = vtanh.f32 %v2782_v17  ;;  %v4094_v49 = vpop.f32.mrb[40].mxu1 }
 0xbc3   :  { %v4495_v32 = vpop.eup %4494  ;;  %v2809_v39 = vmul.f32 0.1, %v4493_v12  ;;  %v4204_v4 = vadd.f32 %v4094_v49, %v5885_v11  ;;  %v2746_v55 = vpop.f32.mrb[41].mxu1 }
 0xbc4   :  { %v4497_v62 = vpop.eup %4496  ;;  %v2827_v3 = vadd.f32 %v2811_v6, %v6413_v2  ;;  %v2812_v26 = vmul.f32 0.1, %v4495_v32  ;;  %v4205_v25 = vadd.f32 %v5885_v11, %v2746_v55  ;;  %v4095_v13 = vpop.f32.mrb[42].mxu1  ;;  %v6421_v2 = vld [vmem:[#allocation73_spill] sm:$0xff] }
 0xbc5   :  { %v2825_v34 = vadd.f32 %v2809_v39, %v6414_v52  ;;  %v2810_v33 = vmul.f32 0.1, %v4497_v62  ;;  %v2787_v59 = vadd.f32 %v4204_v4, %v5887_v19  ;;  %v4206_v1 = vadd.f32 %v4095_v13, %v5885_v11  ;;  %v2749_v0 = vpop.f32.mrb[43].mxu1  ;;  %v6423_v52 = vld [vmem:[#allocation71_spill] sm:$0xff] }
 0xbc6   :  { %2843 = vst [vmem:[#allocation29 + $0x10] sm:$0xff] %v2827_v3  ;;  %v2828_v10 = vadd.f32 %v2812_v26, %v6415_v38  ;;  %v2785_v43 = vadd.f32 %v4205_v25, %v5887_v19  ;;  %v4207_v37 = vadd.f32 %v5885_v11, %v2749_v0 }
 0xbc7   :  { %2841 = vst [vmem:[#allocation29] sm:$0xff] %v2825_v34  ;;  %v2826_v57 = vadd.f32 %v2810_v33, %v6416_v41  ;;  %4506 = vtanh.f32 %v2787_v59  ;;  %v2788_v16 = vadd.f32 %v4206_v1, %v5887_v19  ;;  %v6424_v33 = vld [vmem:[#allocation72_spill] sm:$0xff] }
 0xbc8   :  { %2844 = vst [vmem:[#allocation29 + $0x18] sm:$0xff] %v2828_v10  ;;  %4508 = vtanh.f32 %v2785_v43  ;;  %v2786_v31 = vadd.f32 %v4207_v37, %v5887_v19  ;;  %v6206_v35 = vpack.c.bf16 %v2828_v10, %v2827_v3 }
 0xbc9   :  { %v4499_v46 = vpop.eup %4498  ;;  %2842 = vst [vmem:[#allocation29 + $0x8] sm:$0xff] %v2826_v57  ;;  %4510 = vtanh.f32 %v2788_v16  ;;  %v6208_v24 = vpack.c.bf16 %v2826_v57, %v2825_v34 }
 0xbca   :  { %v4501_v53 = vpop.eup %4500  ;;  %v2815_v5 = vmul.f32 0.1, %v4499_v46  ;;  %4512 = vtanh.f32 %v2786_v31  ;;  %v4098_v40 = vpop.f32.mrb[44].mxu1 }
 0xbcb   :  { %v4503_v48 = vpop.eup %4502  ;;  %v2813_v45 = vmul.f32 0.1, %v4501_v53  ;;  %v4208_v47 = vadd.f32 %v4098_v40, %v5885_v11  ;;  %v2762_v60 = vpop.f32.mrb[45].mxu1  ;;  %4101 = vmatpush3.bf16.msra.mxu0 %v6208_v24 }
 0xbcc   :  { %v4505_v23 = vpop.eup %4504  ;;  %v2831_v22 = vadd.f32 %v2815_v5, %v6417_v61  ;;  %v2816_v54 = vmul.f32 0.1, %v4503_v48  ;;  %v4209_v29 = vadd.f32 %v5885_v11, %v2762_v60  ;;  %v4099_v56 = vpop.f32.mrb[46].mxu1  ;;  %4102 = vmatprep.subr.bf16.mxu0 %v6406_v20  ;;  %v4416_v60 = vld [vmem:[%s6426_s21 + $0x10] sm:$0xff]   ;;  %v4418_v61 = vld [vmem:[%s6426_s21 + $0x20] sm:$0xff]  }
 0xbcd   :  { %v2829_v15 = vadd.f32 %v2813_v45, %v6418_v7  ;;  %v2814_v50 = vmul.f32 0.1, %v4505_v23  ;;  %v2791_v28 = vadd.f32 %v4208_v47, %v5887_v19  ;;  %v4210_v14 = vadd.f32 %v4099_v56, %v5885_v11  ;;  %v2765_v42 = vpop.f32.mrb[47].mxu1  ;;  %v2872_v47 = vpop.permute.xlu1 %2871  ;;  %v4417_v23 = vld [vmem:[%s6426_s21 + $0x18] sm:$0xff]   ;;  %v4423_v56 = vld [vmem:[#allocation27 + $0x8] sm:$0xff]   ;;  %v4424_v7 = vld [vmem:[#allocation27 + $0x10] sm:$0xff]  }
 0xbce   :  { %2847 = vst [vmem:[#allocation29 + $0x30] sm:$0xff] %v2831_v22  ;;  %v2832_v58 = vadd.f32 %v2816_v54, %v6419_v18  ;;  %v2789_v27 = vadd.f32 %v4209_v29, %v5887_v19  ;;  %v4211_v44 = vadd.f32 %v5885_v11, %v2765_v42  ;;  %v4421_v54 = vld [vmem:[%s6426_s21 + $0x38] sm:$0xff]  }
 0xbcf   :  { %2845 = vst [vmem:[#allocation29 + $0x20] sm:$0xff] %v2829_v15  ;;  %v2830_v17 = vadd.f32 %v2814_v50, %v6420_v36  ;;  %4514 = vtanh.f32 %v2791_v28  ;;  %v2792_v21 = vadd.f32 %v4210_v14, %v5887_v19  ;;  %4103 = vmatpush3.bf16.msra.mxu0 %v6206_v35  ;;  %v4422_v29 = vld [vmem:[#allocation27] sm:$0xff]   ;;  %v4427_v28 = vld [vmem:[#allocation27 + $0x28] sm:$0xff]   ;;  %v4428_v14 = vld [vmem:[#allocation27 + $0x30] sm:$0xff]  }
 0xbd0   :  { %2848 = vst [vmem:[#allocation29 + $0x38] sm:$0xff] %v2832_v58  ;;  %4516 = vtanh.f32 %v2789_v27  ;;  %v2790_v12 = vadd.f32 %v4211_v44, %v5887_v19  ;;  %4104 = vmatprep.subr.bf16.mxu0 %v6406_v20  ;;  %v6226_v6 = vpack.c.bf16 %v2832_v58, %v2831_v22  ;;  %v6422_v19 = vld [vmem:[#allocation70_spill] sm:$0xff]  ;;  %4161 = vmatpush3.bf16.msra.mxu1 %v4422_v29  ;;  %v4426_v50 = vld [vmem:[#allocation27 + $0x20] sm:$0xff]   ;;  %v4429_v42 = vld [vmem:[#allocation27 + $0x38] sm:$0xff]  }
 0xbd1   :  { %v4507_v49 = vpop.eup %4506  ;;  %2846 = vst [vmem:[#allocation29 + $0x28] sm:$0xff] %v2830_v17  ;;  %4518 = vtanh.f32 %v2792_v21  ;;  %v2859_v11 = vpack.c.bf16 %v2830_v17, %v2829_v15  ;;  %v4420_v22 = vld [vmem:[%s6426_s21 + $0x30] sm:$0xff]   ;;  %4162 = vmatprep.subr.bf16.mxu1 %v6406_v20 }
 0xbd2   :  { %v4509_v32 = vpop.eup %4508  ;;  %v2819_v39 = vmul.f32 0.1, %v4507_v49  ;;  %4520 = vtanh.f32 %v2790_v12  ;;  %v4425_v15 = vld [vmem:[#allocation27 + $0x18] sm:$0xff]  }
 0xbd3   :  { %v4511_v4 = vpop.eup %4510  ;;  %v2817_v55 = vmul.f32 0.1, %v4509_v32  ;;  %4105 = vmatpush3.bf16.msra.mxu0 %v2859_v11 }
 0xbd4   :  { %v4513_v62 = vpop.eup %4512  ;;  %v2835_v3 = vadd.f32 %v2819_v39, %v6421_v2  ;;  %v2820_v26 = vmul.f32 0.1, %v4511_v4  ;;  %4106 = vmatprep.subr.bf16.mxu0 %v6406_v20  ;;  %4163 = vmatpush3.bf16.msra.mxu1 %v4423_v56  ;;  %v3432_v4 = vld [vmem:[%s6427_s16] ss:$0 sm:$0xff] }
 0xbd5   :  { %v2833_v25 = vadd.f32 %v2817_v55, %v6422_v19  ;;  %v2818_v13 = vmul.f32 0.1, %v4513_v62  ;;  %4164 = vmatprep.subr.bf16.mxu1 %v6406_v20  ;;  %v3449_v2 = vld [vmem:[%s6428_s30] ss:$0 sm:$0xff] }
 0xbd6   :  { %2851 = vst [vmem:[#allocation29 + $0x50] sm:$0xff] %v2835_v3  ;;  %v2836_v34 = vadd.f32 %v2820_v26, %v6423_v52 }
 0xbd7   :  { %2849 = vst [vmem:[#allocation29 + $0x40] sm:$0xff] %v2833_v25  ;;  %v2834_v59 = vadd.f32 %v2818_v13, %v6424_v33  ;;  %4107 = vmatpush3.bf16.msra.mxu0 %v6226_v6  ;;  %v3450_v33 = vld [vmem:[%s5137_s9] ss:$0 sm:$0xff] }
 0xbd8   :  { %2852 = vst [vmem:[#allocation29 + $0x58] sm:$0xff] %v2836_v34  ;;  %4108 = vmatprep.subr.bf16.mxu0 %v6406_v20  ;;  %v2862_v1 = vpack.c.bf16 %v2836_v34, %v2835_v3  ;;  %4165 = vmatpush3.bf16.msra.mxu1 %v4424_v7 }
 0xbd9   :  { %v4515_v0 = vpop.eup %4514  ;;  %2850 = vst [vmem:[#allocation29 + $0x48] sm:$0xff] %v2834_v59  ;;  %v2861_v38 = vpack.c.bf16 %v2834_v59, %v2833_v25  ;;  %4166 = vmatprep.subr.bf16.mxu1 %v6406_v20 }
 0xbda   :  { %v4517_v10 = vpop.eup %4516  ;;  %v2823_v43 = vmul.f32 0.1, %v4515_v0 }
 0xbdb   :  { %v4519_v37 = vpop.eup %4518  ;;  %v2821_v41 = vmul.f32 0.1, %v4517_v10  ;;  %4109 = vmatpush3.bf16.msra.mxu0 %v2861_v38 }
 0xbdc   :  { %v4521_v57 = vpop.eup %4520  ;;  %v2839_v16 = vadd.f32 %v2823_v43, %v5987_v8  ;;  %v2824_v31 = vmul.f32 0.1, %v4519_v37  ;;  %4110 = vmatprep.subr.bf16.mxu0 %v6406_v20  ;;  %v2869_v8 = vpop.permute.xlu0 %2868  ;;  %4167 = vmatpush3.bf16.msra.mxu1 %v4425_v15 }
 0xbdd   :  { %v2837_v46 = vadd.f32 %v2821_v41, %v5980_v30  ;;  %v2822_v53 = vmul.f32 0.1, %v4521_v57  ;;  %v6425_v30 = vld [vmem:[#allocation52_spill] sm:$0xff]  ;;  %4168 = vmatprep.subr.bf16.mxu1 %v6406_v20 }
 0xbde   :  { %2855 = vst [vmem:[#allocation29 + $0x70] sm:$0xff] %v2839_v16  ;;  %v2840_v5 = vadd.f32 %v2824_v31, %v5982_v9  ;;  %vm2873_vm5 = vcmp.eq.s32.totalorder %v6425_v30, %v2869_v8  ;;  %vm2874_vm6 = vcmp.eq.s32.totalorder %v6425_v30, %v2872_v47 }
 0xbdf   :  { %2853 = vst [vmem:[#allocation29 + $0x60] sm:$0xff] %v2837_v46  ;;  %v2838_v40 = vadd.f32 %v2822_v53, %v5984_v51  ;;  %4111 = vmatpush3.bf16.msra.mxu0 %v2862_v1  ;;  %vm3426_vm7 = vmpackc.low %vm2874_vm6, %vm2873_vm5  ;;  %v2926_v51 = vpop.permute.xlu1 %2925 }
 0xbe0   :  { %2856 = vst [vmem:[#allocation29 + $0x78] sm:$0xff] %v2840_v5  ;;  %4112 = vmatprep.subr.bf16.mxu0 %v6406_v20  ;;  %v2864_v48 = vpack.c.bf16 %v2840_v5, %v2839_v16  ;;  %v2929_v9 = vpop.permute.xlu0 %2928  ;;  %vm2930_vm15 = vcmp.eq.s32.totalorder %v6425_v30, %v2926_v51  ;;  %4169 = vmatpush3.bf16.msra.mxu1 %v4426_v50 }
 0xbe1   :  { %2854 = vst [vmem:[#allocation29 + $0x68] sm:$0xff] %v2838_v40  ;;  %v2863_v45 = vpack.c.bf16 %v2838_v40, %v2837_v46  ;;  %vm2931_vm10 = vcmp.eq.s32.totalorder %v6425_v30, %v2929_v9  ;;  %4170 = vmatprep.subr.bf16.mxu1 %v6406_v20 }
 0xbe2   :  { %vm3430_vm14 = vmpackc.low %vm2931_vm10, %vm2930_vm15 }
 0xbe3   :  { %4113 = vmatpush3.bf16.msra.mxu0 %v2863_v45 }
 0xbe4   :  { %4114 = vmatprep.subr.bf16.mxu0 %v6406_v20  ;;  %4171 = vmatpush3.bf16.msra.mxu1 %v4427_v28 }
 0xbe5   :  { %4172 = vmatprep.subr.bf16.mxu1 %v6406_v20 }
 0xbe7   :  { %4115 = vmatpush3.bf16.msra.mxu0 %v2864_v48 }
 0xbe8   :  { %4120 = vmatprep.subr.bf16.mxu0 %v6406_v20  ;;  %4173 = vmatpush3.bf16.msra.mxu1 %v4428_v14 }
 0xbe9   :  { %4174 = vmatprep.subr.bf16.mxu1 %v6406_v20 }
 0xbea   :  { %4117 = vmatmul.mubr.msk.bf16.vlgmr.msra.gmra.mrb[28].mxu0 %vm3426_vm7, %v6400_v63 }
 0xbeb   :  { %4121 = vmatpush3.bf16.msra.mxu0 %v6208_v24  ;;  %4136 = vmatprep.mubr.msk.bf16.mxu0 %vm4997_vm1, %v6406_v20  ;;  %v4415_v24 = vld [vmem:[%s6426_s21 + $0x8] sm:$0xff]  }
 0xbec   :  { %4122 = vmatprep.subr.bf16.mxu0 %v6406_v20  ;;  %4175 = vmatpush3.bf16.msra.mxu1 %v4429_v42 }
 0xbef   :  { %4123 = vmatpush3.bf16.msra.mxu0 %v6206_v35  ;;  %v4414_v35 = vld [vmem:[%s6426_s21] sm:$0xff]  }
 0xbf0   :  { %4124 = vmatprep.subr.bf16.mxu0 %v6406_v20 }
 0xbf3   :  { %4125 = vmatpush3.bf16.msra.mxu0 %v2859_v11 }
 0xbf4   :  { %4126 = vmatprep.subr.bf16.mxu0 %v6406_v20 }
 0xbf7   :  { %4127 = vmatpush3.bf16.msra.mxu0 %v6226_v6 }
 0xbf8   :  { %4128 = vmatprep.subr.bf16.mxu0 %v6406_v20 }
 0xbfb   :  { %4129 = vmatpush3.bf16.msra.mxu0 %v2861_v38 }
 0xbfc   :  { %4130 = vmatprep.subr.bf16.mxu0 %v6406_v20 }
 0xbff   :  { %4131 = vmatpush3.bf16.msra.mxu0 %v2862_v1 }
 0xc00   :  { %4132 = vmatprep.subr.bf16.mxu0 %v6406_v20 }
 0xc03   :  { %4133 = vmatpush3.bf16.msra.mxu0 %v2863_v45 }
 0xc04   :  { %4134 = vmatprep.subr.bf16.mxu0 %v6406_v20 }
 0xc07   :  { %4135 = vmatpush3.bf16.msra.mxu0 %v2864_v48 }
 0xc08   :  { %4140 = vmatprep.subr.bf16.mxu0 %v6406_v20 }
 0xc0a   :  { %4137 = vmatmul.mubr.msk.bf16.vlgmr.msra.gmra.mrb[32].mxu0 %vm3430_vm14, %v6400_v63  ;;  %v4419_v63 = vld [vmem:[%s6426_s21 + $0x28] sm:$0xff]  }
 0xc0b   :  { %4141 = vmatpush3.bf16.msra.mxu0 %v4414_v35  ;;  %4156 = vmatprep.mubr.msk.bf16.mxu0 %vm4997_vm1, %v6406_v20 }
 0xc0c   :  { %4142 = vmatprep.subr.bf16.mxu0 %v6406_v20 }
 0xc0f   :  { %4143 = vmatpush3.bf16.msra.mxu0 %v4415_v24 }
 0xc10   :  { %4144 = vmatprep.subr.bf16.mxu0 %v6406_v20 }
 0xc13   :  { %4145 = vmatpush3.bf16.msra.mxu0 %v4416_v60 }
 0xc14   :  { %4146 = vmatprep.subr.bf16.mxu0 %v6406_v20 }
 0xc17   :  { %4147 = vmatpush3.bf16.msra.mxu0 %v4417_v23 }
 0xc18   :  { %4148 = vmatprep.subr.bf16.mxu0 %v6406_v20 }
 0xc1b   :  { %4149 = vmatpush3.bf16.msra.mxu0 %v4418_v61 }
 0xc1c   :  { %4150 = vmatprep.subr.bf16.mxu0 %v6406_v20 }
 0xc1f   :  { %4151 = vmatpush3.bf16.msra.mxu0 %v4419_v63 }
 0xc20   :  { %4152 = vmatprep.subr.bf16.mxu0 %v6406_v20 }
 0xc23   :  { %4153 = vmatpush3.bf16.msra.mxu0 %v4420_v22 }
 0xc24   :  { %4154 = vmatprep.subr.bf16.mxu0 %v6406_v20 }
 0xc27   :  { %4155 = vmatpush3.bf16.msra.mxu0 %v4421_v54 }
 0xcbd   :  { %v2914_v18 = vpop.f32.mrb[28].mxu0 }
 0xcbe   :  { %v4118_v58 = vpop.f32.mrb[29].mxu0 }
 0xcbf   :  { %v2917_v27 = vpop.f32.mrb[30].mxu0 }
 0xcc0   :  { %v2921_v44 = vpack.c.bf16 %v2917_v27, %v2914_v18  ;;  %v4119_v36 = vpop.f32.mrb[31].mxu0 }
 0xcc2   :  { %4157 = vmatmul.mubr.bf16.vlgmr.msra.gmra.mrb[36].mxu0 %v2921_v44 }
 0xcdd   :  { %v2971_v17 = vpop.f32.mrb[32].mxu0 }
 0xcde   :  { %v4138_v21 = vpop.f32.mrb[33].mxu0 }
 0xcdf   :  { %v2974_v12 = vpop.f32.mrb[34].mxu0 }
 0xce0   :  { %v2978_v6 = vpack.c.bf16 %v2974_v12, %v2971_v17  ;;  %v4139_v49 = vpop.f32.mrb[35].mxu0 }
 0xce2   :  { %4177 = vmatmul.mubr.bf16.vlgmr.msra.gmra.mrb[48].mxu1 %v2978_v6 }
 0xd95   :  { %v3084_v11 = vpop.f32.mrb[36].mxu0 }
 0xd96   :  { %v4158_v32 = vpop.f32.mrb[37].mxu0  ;;  %v3085_v55 = vadd.f32 %v3432_v4, %v3084_v11 }
 0xd97   :  { %v3087_v20 = vpop.f32.mrb[38].mxu0 }
 0xd98   :  { %v4159_v39 = vpop.f32.mrb[39].mxu0  ;;  %v3088_v3 = vadd.f32 %v3432_v4, %v3087_v20 }
 0xdb5   :  { %v3189_v62 = vpop.f32.mrb[48].mxu1 }
 0xdb6   :  { %v3196_v26 = vadd.f32 %v3189_v62, %v3085_v55  ;;  %v4178_v19 = vpop.f32.mrb[49].mxu1 }
 0xdb7   :  { %v3192_v25 = vpop.f32.mrb[50].mxu1 }
 0xdb8   :  { %v3205_v13 = vadd.f32 %v3449_v2, %v3196_v26  ;;  %v3197_v52 = vadd.f32 %v3192_v25, %v3088_v3  ;;  %v4179_v34 = vpop.f32.mrb[51].mxu1 }
 0xdba   :  { %v3207_v59 = vmax.f32 %v3205_v13, 0.0  ;;  %v3206_v1 = vadd.f32 %v3449_v2, %v3197_v52 }
 0xdbc   :  { %v3208_v0 = vmax.f32 %v3206_v1, 0.0  ;;  %v3216_v38 = vmul.f32 %v3450_v33, %v3207_v59 }
 0xdbe   :  { %3218 = vadd.xlane.f32.xlu1 %v3216_v38  ;;  %v3217_v10 = vmul.f32 %v3450_v33, %v3208_v0 }
 0xdc0   :  { %3220 = vadd.xlane.f32.xlu0 %v3217_v10 }
 0xdc1   :  { %4908 = shalt.err (!%p4905_p6)
}
 0xdc2   :  { %s4909_s9 = scalar_lea.hbm %s5145_s17, 2048 }
 0xdc3   :  { %p4910_p7 = scmp.ne.s32.totalorder %s5145_s17, %s4909_s9  ;;  %p4913_p8 = scmp.lt.u32.totalorder %s4909_s9, %s5145_s17 }
 0xdc5   :  { %p4915_p9 = pnand %p4913_p8, %p4910_p7 }
 0xdc7   :  { %4918 = shalt.err (!%p4915_p9)
}
 0xdc8   :  { %3245 = dma.vmem_to_hbm [thread:$0]  %s3240_s12, 2048, %s5145_s17, [#allocation5], %s4978_s10, %s4978_s10, %s4979_s19   ;;  %v3451_v43 = vld [vmem:[#allocation2] ss:$0 sm:$0xff]  ;;  %vm3231_vm12 = vcmask 7168  }
 0xe4b   :  { %v3219_v37 = vpop.xlane.xlu1 %3218 }
 0xe4c   :  { %v3229_v41 = vadd.f32 %v3451_v43, %v3219_v37 }
 0xe4d   :  { %v3221_v57 = vpop.xlane.xlu0 %3220 }
 0xe4e   :  { %3232 = vst.msk [vmem:[%s5150_s24] sm:$0xff] %vm3231_vm12, %v3229_v41  ;;  %v3230_v16 = vadd.f32 %v3451_v43, %v3221_v57 }
 0xe50   :  { %3233 = vst.msk [vmem:[%s5150_s24 + $0x8] sm:$0xff] %vm3231_vm12, %v3230_v16 }
 0xe51   :  { %4937 = dma.done.wait [#allocation5], 2048  }
 0xe52   :  { %4938 = vsyncadd [#allocation5], 4294965248 }
 0xe53   :  { %3253 = vsyncpa [#allocation4], 1 }
 0xe54   :  { %3254 = vsyncpa [#allocation7], 1 }
 0xe55   :  { %3255 = vsyncpa [#allocation10], 1 }
 0xe56   :  { %3256 = vsyncpa [#allocation13], 1 }
 0xe57   :  { %3257 = vsyncpa [#allocation16], 1 }
 0xe58   :  { %3258 = vsyncpa [#allocation19], 1 }
 0xe59   :  { %3259 = vsyncpa [#allocation22], 1 }
 0xe5a   :  { %3260 = vsyncpa [#allocation25], 1 }
 0xe5b   :  { %3261 = vsyncpa [#allocation28], 1 }
 0xe5c   :  { %3262 = vsyncpa [#allocation5], 1 }

</bundles_post_ra>
